<compile_context>
chip_gen: v6e
topology: v6e:2x2x1
jax: 0.10.0
libtpu: 0.0.40
codegen_flags: <defaults>
</compile_context>

<pallas_src>
import functools

import jax
import jax.numpy as jnp
from jax.experimental import pallas as pl
from jax.experimental.pallas import tpu as pltpu


def transformer_block_kernel(q_ref, k_ref, v_ref, bias_ref,
                             wq_ref, wk_ref, wv_ref, wo_ref,
                             w1_ref, w2_ref, vec_ref,
                             o_ref, *, heads, head_dim, eps=1e-5):
    B, Sq, E = q_ref.shape
    Sk = k_ref.shape[1]
    f32 = jnp.float32
    bf16 = jnp.bfloat16

    # Activations: load once, merge leading dims (free).  Keep an f32 copy of
    # the query for the residual; K/V are only needed as bf16 matmul operands.
    q2 = q_ref[...].reshape(B * Sq, E)                       # f32 (residual)
    k2b = k_ref[...].reshape(B * Sk, E).astype(bf16)
    v2b = v_ref[...].reshape(B * Sk, E).astype(bf16)
    bias = bias_ref[...]                                     # (B,Sq,Sk) additive mask

    # Packed bias / LayerNorm vectors (single const DMA), f32.
    vec = vec_ref[...]                                       # (8, hidden)
    bo, g1, bt1 = vec[0:1, :E], vec[1:2, :E], vec[2:3, :E]
    b1 = vec[3:4, :]                                         # (1, hidden)
    b2, g2, bt2 = vec[4:5, :E], vec[5:6, :E], vec[6:7, :E]

    # Q/K/V projections for all heads: one bf16 (E x E) matmul each
    # (block-diagonal weights built on the host, 1/sqrt(E) folded into Wq).
    q_all = jnp.dot(q2.astype(bf16), wq_ref[...],
                    preferred_element_type=f32).reshape(B, Sq, E)
    k_all = jnp.dot(k2b, wk_ref[...],
                    preferred_element_type=f32).reshape(B, Sk, E)
    v_all = jnp.dot(v2b, wv_ref[...],
                    preferred_element_type=f32).reshape(B, Sk, E)

    # Per-head attention.  Each head's context is folded straight into the
    # output projection (ctx_h @ Wo_h) and accumulated in one f32 slab.
    attn_out = None
    for h in range(heads):
        lo = h * head_dim
        qh = q_all[:, :, lo:lo + head_dim].astype(bf16)      # (B,Sq,hd)
        kh = k_all[:, :, lo:lo + head_dim].astype(bf16)      # (B,Sk,hd)
        vh = v_all[:, :, lo:lo + head_dim].astype(bf16)      # (B,Sk,hd)

        e = jnp.einsum('bqd,bkd->bqk', qh, kh,
                       preferred_element_type=f32)           # (B,Sq,Sk)
        e = e + bias                                         # masked_fill as an add
        m = jnp.max(e, axis=-1, keepdims=True)
        p = jnp.exp(e - m)
        denom = jnp.sum(p, axis=-1, keepdims=True)
        attn = p * pl.reciprocal(denom, approx=True)         # softmax(dim=3), EUP

        ctx = jnp.einsum('bqk,bkd->bqd', attn.astype(bf16), vh,
                         preferred_element_type=f32)         # (B,Sq,hd)
        part = jnp.dot(ctx.reshape(B * Sq, head_dim).astype(bf16), wo_ref[h],
                       preferred_element_type=f32)           # (B*Sq,E), lane-dense
        attn_out = part if attn_out is None else attn_out + part

    attn_out = attn_out + bo                                 # fc_out bias

    def layernorm(x, gamma, beta):
        mu = jnp.mean(x, axis=-1, keepdims=True)
        xc = x - mu
        var = jnp.mean(xc * xc, axis=-1, keepdims=True)
        return xc * jax.lax.rsqrt(var + eps) * gamma + beta

    # x = dropout(norm1(attention + query)); dropout == identity (eval mode).
    x1 = layernorm(attn_out + q2, g1, bt1)

    # Feed-forward: Linear -> ReLU -> Linear (bf16 operands, f32 accum/elementwise).
    h1 = jnp.dot(x1.astype(bf16), w1_ref[...], preferred_element_type=f32) + b1
    h1 = jnp.maximum(h1, 0.0)
    ffn = jnp.dot(h1.astype(bf16), w2_ref[...], preferred_element_type=f32) + b2

    out = layernorm(ffn + x1, g2, bt2)
    o_ref[...] = out.reshape(B, Sq, E).astype(o_ref.dtype)


def _pick_batch_block(n, seq, embed, hidden):
    # Larger blocks amortize the ~0.35us/step grid overhead and raise MXU row
    # occupancy (target >= 256 rows per step), capped by a rough f32
    # activation VMEM budget.  The grid may collapse to a single step: on
    # v5e/v6e the grid is a serial loop on one TensorCore anyway; on v7x a
    # single-step grid idles the second core, acceptable at these demo sizes.
    target_rows = 256
    budget = 24 * 1024 * 1024
    best = 1
    for cand in range(1, n + 1):
        if n % cand:
            continue
        rows = cand * seq
        approx_bytes = 4 * rows * (10 * embed + 3 * hidden + 2 * seq)
        if approx_bytes > budget:
            break
        best = cand
        if rows >= target_rows:
            break
    return best


def transformer_block(value, key, query, mask, params, heads):
    N, Sq, E = query.shape
    head_dim = E // heads
    hidden = params['w1'].shape[0]
    b_blk = _pick_batch_block(N, Sq, E, hidden)

    # ---- One-time host-side weight preprocessing (keeps every transpose, the
    # softmax scale and the bf16 casts out of the per-grid-step kernel). ----
    f32, bf16 = jnp.float32, jnp.bfloat16
    eye_h = jnp.eye(heads, dtype=f32)
    scale = 1.0 / jnp.sqrt(f32(E))
    # nn.Linear stores W as [out,in]; kernel computes x @ W_t with W_t=[in,out].
    # The same (hd,hd) projection is shared by every head -> block-diagonal
    # (E,E) matrix kron(I_heads, W.T); 1/sqrt(E) folded into Wq.
    wq_full = (jnp.kron(eye_h, params['wq'].astype(f32).T) * scale).astype(bf16)
    wk_full = jnp.kron(eye_h, params['wk'].astype(f32).T).astype(bf16)
    wv_full = jnp.kron(eye_h, params['wv'].astype(f32).T).astype(bf16)
    # fc_out split per input-head block: concat(ctx_h) @ Wo.T == sum_h ctx_h @ Wo_h.
    wo_heads = params['wo'].astype(f32).T.reshape(heads, head_dim, E).astype(bf16)
    w1_t = params['w1'].astype(f32).T.astype(bf16)           # (E, hidden)
    w2_t = params['w2'].astype(f32).T.astype(bf16)           # (hidden, E)

    # Additive attention mask (0 / -1e20) computed once on the host: the
    # kernel adds it per head instead of re-selecting with a bool mask.
    bias = jnp.where(mask == 0, jnp.float32(-1e20), jnp.float32(0.0))

    # Pack the seven small (1,E)/(1,hidden) vectors into one (8,hidden) const
    # block (one DMA / one padded VMEM allocation instead of seven).
    def row(v):
        v = v.reshape(-1).astype(f32)
        return jnp.pad(v, (0, hidden - v.shape[0]))
    vecs = jnp.stack([row(params['bo']), row(params['g1']), row(params['bt1']),
                      row(params['b1']), row(params['b2']), row(params['g2']),
                      row(params['bt2']), jnp.zeros((hidden,), f32)])

    kernel = functools.partial(transformer_block_kernel,
                               heads=heads, head_dim=head_dim)

    def act_spec(shape):
        return pl.BlockSpec((b_blk,) + tuple(shape[1:]), lambda b: (b, 0, 0))

    def const_spec(arr):
        zeros = (0,) * arr.ndim
        return pl.BlockSpec(arr.shape, lambda b, _z=zeros: _z)

    weights = (wq_full, wk_full, wv_full, wo_heads, w1_t, w2_t, vecs)
    in_specs = ([act_spec(query.shape), act_spec(key.shape),
                 act_spec(value.shape), act_spec(bias.shape)]
                + [const_spec(w) for w in weights])
    out_spec = pl.BlockSpec((b_blk, Sq, E), lambda b: (b, 0, 0))

    # TODO(synk): for production E/hidden, add a K-tiled ("arbitrary") grid
    # axis + f32 accumulator for the FFN weights and single-buffer the const
    # weight blocks (pipeline_mode=pl.Buffered(1)) -- needed for v7x's 64 MiB VMEM.
    return pl.pallas_call(
        kernel,
        out_shape=jax.ShapeDtypeStruct((N, Sq, E), jnp.float32),
        grid_spec=pltpu.PrefetchScalarGridSpec(
            num_scalar_prefetch=0,
            grid=(N // b_blk,),
            in_specs=in_specs,
            out_specs=out_spec),
        compiler_params=pltpu.CompilerParams(
            dimension_semantics=("parallel",),
            vmem_limit_bytes=64 * 1024 * 1024),
    )(query, key, value, bias, *weights)


def reference(value, key, query, mask, params, heads):
    """Plain-JAX mirror of the PyTorch forward (for correctness checking)."""
    N, Sq, E = query.shape
    hd = E // heads

    def split(x):
        return x.reshape(N, -1, heads, hd)

    v = split(value) @ params['wv'].T
    k = split(key) @ params['wk'].T
    q = split(query) @ params['wq'].T
    energy = jnp.einsum('nqhd,nkhd->nhqk', q, k)
    energy = jnp.where(mask[:, None, :, :] == 0, -1e20, energy)
    attn = jax.nn.softmax(energy / jnp.sqrt(jnp.float32(E)), axis=3)
    out = jnp.einsum('nhql,nlhd->nqhd', attn, v).reshape(N, Sq, E)
    attn_out = out @ params['wo'].T + params['bo'][0]

    def ln(x, g, b):
        mu = x.mean(-1, keepdims=True)
        var = ((x - mu) ** 2).mean(-1, keepdims=True)
        return (x - mu) / jnp.sqrt(var + 1e-5) * g[0] + b[0]

    x1 = ln(attn_out + query, params['g1'], params['bt1'])
    h1 = jnp.maximum(x1 @ params['w1'].T + params['b1'][0], 0.0)
    ffn = h1 @ params['w2'].T + params['b2'][0]
    return ln(ffn + x1, params['g2'], params['bt2'])


def init_params(key, embed_size, heads, forward_expansion):
    hd = embed_size // heads
    hidden = forward_expansion * embed_size
    keys = jax.random.split(key, 8)
    return {
        'wv': 0.2 * jax.random.normal(keys[0], (hd, hd), jnp.float32),
        'wk': 0.2 * jax.random.normal(keys[1], (hd, hd), jnp.float32),
        'wq': 0.2 * jax.random.normal(keys[2], (hd, hd), jnp.float32),
        'wo': 0.1 * jax.random.normal(keys[3], (embed_size, embed_size), jnp.float32),
        'bo': 0.1 * jax.random.normal(keys[4], (1, embed_size), jnp.float32),
        'g1': jnp.ones((1, embed_size), jnp.float32),
        'bt1': jnp.zeros((1, embed_size), jnp.float32),
        'w1': 0.1 * jax.random.normal(keys[5], (hidden, embed_size), jnp.float32),
        'b1': 0.1 * jax.random.normal(keys[6], (1, hidden), jnp.float32),
        'w2': 0.1 * jax.random.normal(keys[7], (embed_size, hidden), jnp.float32),
        'b2': jnp.zeros((1, embed_size), jnp.float32),
        'g2': jnp.ones((1, embed_size), jnp.float32),
        'bt2': jnp.zeros((1, embed_size), jnp.float32),
    }


if __name__ == "__main__":
    # batch, seq, embed, heads, forward_expansion -> lane-dense E=128, hd=32
    N, S, E, H, FE = 4, 16, 128, 4, 2

    root = jax.random.PRNGKey(0)
    kp, kv, kk, kq = jax.random.split(root, 4)
    params = init_params(kp, E, H, FE)

    value = jax.random.normal(kv, (N, S, E), jnp.float32)
    key_ = jax.random.normal(kk, (N, S, E), jnp.float32)
    query = jax.random.normal(kq, (N, S, E), jnp.float32)
    # causal mask, broadcast over heads (same as a torch mask of shape (N,1,Sq,Sk))
    mask = jnp.broadcast_to(jnp.tril(jnp.ones((S, S), jnp.float32)), (N, S, S))

    out = transformer_block(value, key_, query, mask, params, H)
    out = jax.block_until_ready(out)

    ref = reference(value, key_, query, mask, params, H)
    assert out.shape == (N, S, E)
    # Tolerance accounts for bf16 MXU operands + approximate reciprocal in softmax.
    assert jnp.allclose(out, ref, rtol=5e-2, atol=5e-2), \
        f"max abs diff {jnp.max(jnp.abs(out - ref))}"

    print("KERNEL_OK")
</pallas_src>

<mosaic_0001>
module attributes {stable_mosaic.version = 11 : i64} {
  func.func @transformer_block_kernel(%arg0: i32, %arg1: memref<4x16x128xf32, #tpu.memory_space<vmem>>, %arg2: memref<4x16x128xf32, #tpu.memory_space<vmem>>, %arg3: memref<4x16x128xf32, #tpu.memory_space<vmem>>, %arg4: memref<4x16x16xf32, #tpu.memory_space<vmem>>, %arg5: memref<128x128xbf16, #tpu.memory_space<vmem>>, %arg6: memref<128x128xbf16, #tpu.memory_space<vmem>>, %arg7: memref<128x128xbf16, #tpu.memory_space<vmem>>, %arg8: memref<4x32x128xbf16, #tpu.memory_space<vmem>>, %arg9: memref<128x256xbf16, #tpu.memory_space<vmem>>, %arg10: memref<256x128xbf16, #tpu.memory_space<vmem>>, %arg11: memref<8x256xf32, #tpu.memory_space<vmem>>, %arg12: memref<4x16x128xf32, #tpu.memory_space<vmem>>) attributes {dimension_semantics = [#tpu.dimension_semantics<parallel>], iteration_bounds = array<i64: 1>, scalar_prefetch = 0 : i64, scratch_operands = 0 : i64, tpu.core_type = #tpu.core_type<tc>, window_params = [{transform_indices = @transform_0, window_bounds = array<i64: 4, 16, 128>}, {transform_indices = @transform_1, window_bounds = array<i64: 4, 16, 128>}, {transform_indices = @transform_2, window_bounds = array<i64: 4, 16, 128>}, {transform_indices = @transform_3, window_bounds = array<i64: 4, 16, 16>}, {pipeline_mode = #tpu.pipeline_mode<synchronous>, transform_indices = @transform_4, window_bounds = array<i64: 128, 128>}, {pipeline_mode = #tpu.pipeline_mode<synchronous>, transform_indices = @transform_5, window_bounds = array<i64: 128, 128>}, {pipeline_mode = #tpu.pipeline_mode<synchronous>, transform_indices = @transform_6, window_bounds = array<i64: 128, 128>}, {pipeline_mode = #tpu.pipeline_mode<synchronous>, transform_indices = @transform_7, window_bounds = array<i64: 4, 32, 128>}, {pipeline_mode = #tpu.pipeline_mode<synchronous>, transform_indices = @transform_8, window_bounds = array<i64: 128, 256>}, {pipeline_mode = #tpu.pipeline_mode<synchronous>, transform_indices = @transform_9, window_bounds = array<i64: 256, 128>}, {pipeline_mode = #tpu.pipeline_mode<synchronous>, transform_indices = @transform_10, window_bounds = array<i64: 8, 256>}, {transform_indices = @transform_11, window_bounds = array<i64: 4, 16, 128>}]} {
    %c0 = arith.constant 0 : index
    %c0_0 = arith.constant 0 : index
    %c0_1 = arith.constant 0 : index
    %0 = vector.load %arg1[%c0, %c0_0, %c0_1] : memref<4x16x128xf32, #tpu.memory_space<vmem>>, vector<4x16x128xf32>
    %1 = vector.shape_cast %0 : vector<4x16x128xf32> to vector<64x128xf32>
    %c0_2 = arith.constant 0 : index
    %c0_3 = arith.constant 0 : index
    %c0_4 = arith.constant 0 : index
    %2 = vector.load %arg2[%c0_2, %c0_3, %c0_4] : memref<4x16x128xf32, #tpu.memory_space<vmem>>, vector<4x16x128xf32>
    %3 = vector.shape_cast %2 : vector<4x16x128xf32> to vector<64x128xf32>
    %4 = arith.truncf %3 : vector<64x128xf32> to vector<64x128xbf16>
    %c0_5 = arith.constant 0 : index
    %c0_6 = arith.constant 0 : index
    %c0_7 = arith.constant 0 : index
    %5 = vector.load %arg3[%c0_5, %c0_6, %c0_7] : memref<4x16x128xf32, #tpu.memory_space<vmem>>, vector<4x16x128xf32>
    %6 = vector.shape_cast %5 : vector<4x16x128xf32> to vector<64x128xf32>
    %7 = arith.truncf %6 : vector<64x128xf32> to vector<64x128xbf16>
    %c0_8 = arith.constant 0 : index
    %c0_9 = arith.constant 0 : index
    %c0_10 = arith.constant 0 : index
    %8 = vector.load %arg4[%c0_8, %c0_9, %c0_10] : memref<4x16x16xf32, #tpu.memory_space<vmem>>, vector<4x16x16xf32>
    %c0_11 = arith.constant 0 : index
    %c0_12 = arith.constant 0 : index
    %9 = vector.load %arg11[%c0_11, %c0_12] : memref<8x256xf32, #tpu.memory_space<vmem>>, vector<8x256xf32>
    %10 = vector.extract_strided_slice %9 {offsets = [0, 0], sizes = [1, 128], strides = [1, 1]} : vector<8x256xf32> to vector<1x128xf32>
    %11 = vector.extract_strided_slice %9 {offsets = [1, 0], sizes = [1, 128], strides = [1, 1]} : vector<8x256xf32> to vector<1x128xf32>
    %12 = vector.extract_strided_slice %9 {offsets = [2, 0], sizes = [1, 128], strides = [1, 1]} : vector<8x256xf32> to vector<1x128xf32>
    %13 = vector.extract_strided_slice %9 {offsets = [3, 0], sizes = [1, 256], strides = [1, 1]} : vector<8x256xf32> to vector<1x256xf32>
    %14 = vector.extract_strided_slice %9 {offsets = [4, 0], sizes = [1, 128], strides = [1, 1]} : vector<8x256xf32> to vector<1x128xf32>
    %15 = vector.extract_strided_slice %9 {offsets = [5, 0], sizes = [1, 128], strides = [1, 1]} : vector<8x256xf32> to vector<1x128xf32>
    %16 = vector.extract_strided_slice %9 {offsets = [6, 0], sizes = [1, 128], strides = [1, 1]} : vector<8x256xf32> to vector<1x128xf32>
    %17 = arith.truncf %1 : vector<64x128xf32> to vector<64x128xbf16>
    %c0_13 = arith.constant 0 : index
    %c0_14 = arith.constant 0 : index
    %18 = vector.load %arg5[%c0_13, %c0_14] : memref<128x128xbf16, #tpu.memory_space<vmem>>, vector<128x128xbf16>
    %cst = arith.constant dense<0.000000e+00> : vector<64x128xf32>
    %19 = tpu.matmul %17, %18, %cst {dimension_numbers = #tpu.dot_dimension_numbers<[1], [0], [0], [1], [0, 0, 1, 1], [], []>} : vector<64x128xbf16>, vector<128x128xbf16>, vector<64x128xf32> -> vector<64x128xf32>
    %20 = vector.shape_cast %19 : vector<64x128xf32> to vector<4x16x128xf32>
    %c0_15 = arith.constant 0 : index
    %c0_16 = arith.constant 0 : index
    %21 = vector.load %arg6[%c0_15, %c0_16] : memref<128x128xbf16, #tpu.memory_space<vmem>>, vector<128x128xbf16>
    %cst_17 = arith.constant dense<0.000000e+00> : vector<64x128xf32>
    %22 = tpu.matmul %4, %21, %cst_17 {dimension_numbers = #tpu.dot_dimension_numbers<[1], [0], [0], [1], [0, 0, 1, 1], [], []>} : vector<64x128xbf16>, vector<128x128xbf16>, vector<64x128xf32> -> vector<64x128xf32>
    %23 = vector.shape_cast %22 : vector<64x128xf32> to vector<4x16x128xf32>
    %c0_18 = arith.constant 0 : index
    %c0_19 = arith.constant 0 : index
    %24 = vector.load %arg7[%c0_18, %c0_19] : memref<128x128xbf16, #tpu.memory_space<vmem>>, vector<128x128xbf16>
    %cst_20 = arith.constant dense<0.000000e+00> : vector<64x128xf32>
    %25 = tpu.matmul %7, %24, %cst_20 {dimension_numbers = #tpu.dot_dimension_numbers<[1], [0], [0], [1], [0, 0, 1, 1], [], []>} : vector<64x128xbf16>, vector<128x128xbf16>, vector<64x128xf32> -> vector<64x128xf32>
    %26 = vector.shape_cast %25 : vector<64x128xf32> to vector<4x16x128xf32>
    %27 = vector.extract_strided_slice %20 {offsets = [0, 0, 0], sizes = [4, 16, 32], strides = [1, 1, 1]} : vector<4x16x128xf32> to vector<4x16x32xf32>
    %28 = arith.truncf %27 : vector<4x16x32xf32> to vector<4x16x32xbf16>
    %29 = vector.extract_strided_slice %23 {offsets = [0, 0, 0], sizes = [4, 16, 32], strides = [1, 1, 1]} : vector<4x16x128xf32> to vector<4x16x32xf32>
    %30 = arith.truncf %29 : vector<4x16x32xf32> to vector<4x16x32xbf16>
    %31 = vector.extract_strided_slice %26 {offsets = [0, 0, 0], sizes = [4, 16, 32], strides = [1, 1, 1]} : vector<4x16x128xf32> to vector<4x16x32xf32>
    %32 = arith.truncf %31 : vector<4x16x32xf32> to vector<4x16x32xbf16>
    "tpu.trace_start"() <{level = 10 : i32, message = "bqd,bkd->bqk"}> : () -> ()
    %cst_21 = arith.constant dense<0.000000e+00> : vector<4x16x16xf32>
    %33 = tpu.matmul %28, %30, %cst_21 {dimension_numbers = #tpu.dot_dimension_numbers<[2], [2], [1], [1], [0, 0, 0, 1, 1, 1], [0], [0]>} : vector<4x16x32xbf16>, vector<4x16x32xbf16>, vector<4x16x16xf32> -> vector<4x16x16xf32>
    "tpu.trace_stop"() : () -> ()
    %34 = arith.addf %33, %8 : vector<4x16x16xf32>
    %cst_22 = arith.constant dense<0xFF800000> : vector<4x16xf32>
    %35 = vector.multi_reduction <maximumf>, %34, %cst_22 [2] : vector<4x16x16xf32> to vector<4x16xf32>
    %36 = vector.shape_cast %35 : vector<4x16xf32> to vector<4x16x1xf32>
    %37 = vector.broadcast %36 : vector<4x16x1xf32> to vector<4x16x16xf32>
    %38 = arith.subf %34, %37 : vector<4x16x16xf32>
    %39 = math.exp %38 : vector<4x16x16xf32>
    %cst_23 = arith.constant dense<0.000000e+00> : vector<4x16xf32>
    %40 = vector.multi_reduction <add>, %39, %cst_23 [2] : vector<4x16x16xf32> to vector<4x16xf32>
    %41 = vector.shape_cast %40 : vector<4x16xf32> to vector<4x16x1xf32>
    %42 = tpu.reciprocal %41 {approx = true} : vector<4x16x1xf32> -> vector<4x16x1xf32>
    %43 = vector.broadcast %42 : vector<4x16x1xf32> to vector<4x16x16xf32>
    %44 = arith.mulf %39, %43 : vector<4x16x16xf32>
    %45 = arith.truncf %44 : vector<4x16x16xf32> to vector<4x16x16xbf16>
    "tpu.trace_start"() <{level = 10 : i32, message = "bqk,bkd->bqd"}> : () -> ()
    %cst_24 = arith.constant dense<0.000000e+00> : vector<4x16x32xf32>
    %46 = tpu.matmul %45, %32, %cst_24 {dimension_numbers = #tpu.dot_dimension_numbers<[2], [1], [1], [2], [0, 0, 0, 1, 1, 2], [0], [0]>} : vector<4x16x16xbf16>, vector<4x16x32xbf16>, vector<4x16x32xf32> -> vector<4x16x32xf32>
    "tpu.trace_stop"() : () -> ()
    %47 = vector.shape_cast %46 : vector<4x16x32xf32> to vector<64x32xf32>
    %48 = arith.truncf %47 : vector<64x32xf32> to vector<64x32xbf16>
    %c0_25 = arith.constant 0 : index
    %c0_26 = arith.constant 0 : index
    %c0_27 = arith.constant 0 : index
    %49 = vector.load %arg8[%c0_25, %c0_26, %c0_27] : memref<4x32x128xbf16, #tpu.memory_space<vmem>>, vector<1x32x128xbf16>
    %50 = vector.shape_cast %49 : vector<1x32x128xbf16> to vector<32x128xbf16>
    %cst_28 = arith.constant dense<0.000000e+00> : vector<64x128xf32>
    %51 = tpu.matmul %48, %50, %cst_28 {dimension_numbers = #tpu.dot_dimension_numbers<[1], [0], [0], [1], [0, 0, 1, 1], [], []>} : vector<64x32xbf16>, vector<32x128xbf16>, vector<64x128xf32> -> vector<64x128xf32>
    %52 = vector.extract_strided_slice %20 {offsets = [0, 0, 32], sizes = [4, 16, 32], strides = [1, 1, 1]} : vector<4x16x128xf32> to vector<4x16x32xf32>
    %53 = arith.truncf %52 : vector<4x16x32xf32> to vector<4x16x32xbf16>
    %54 = vector.extract_strided_slice %23 {offsets = [0, 0, 32], sizes = [4, 16, 32], strides = [1, 1, 1]} : vector<4x16x128xf32> to vector<4x16x32xf32>
    %55 = arith.truncf %54 : vector<4x16x32xf32> to vector<4x16x32xbf16>
    %56 = vector.extract_strided_slice %26 {offsets = [0, 0, 32], sizes = [4, 16, 32], strides = [1, 1, 1]} : vector<4x16x128xf32> to vector<4x16x32xf32>
    %57 = arith.truncf %56 : vector<4x16x32xf32> to vector<4x16x32xbf16>
    "tpu.trace_start"() <{level = 10 : i32, message = "bqd,bkd->bqk"}> : () -> ()
    %cst_29 = arith.constant dense<0.000000e+00> : vector<4x16x16xf32>
    %58 = tpu.matmul %53, %55, %cst_29 {dimension_numbers = #tpu.dot_dimension_numbers<[2], [2], [1], [1], [0, 0, 0, 1, 1, 1], [0], [0]>} : vector<4x16x32xbf16>, vector<4x16x32xbf16>, vector<4x16x16xf32> -> vector<4x16x16xf32>
    "tpu.trace_stop"() : () -> ()
    %59 = arith.addf %58, %8 : vector<4x16x16xf32>
    %cst_30 = arith.constant dense<0xFF800000> : vector<4x16xf32>
    %60 = vector.multi_reduction <maximumf>, %59, %cst_30 [2] : vector<4x16x16xf32> to vector<4x16xf32>
    %61 = vector.shape_cast %60 : vector<4x16xf32> to vector<4x16x1xf32>
    %62 = vector.broadcast %61 : vector<4x16x1xf32> to vector<4x16x16xf32>
    %63 = arith.subf %59, %62 : vector<4x16x16xf32>
    %64 = math.exp %63 : vector<4x16x16xf32>
    %cst_31 = arith.constant dense<0.000000e+00> : vector<4x16xf32>
    %65 = vector.multi_reduction <add>, %64, %cst_31 [2] : vector<4x16x16xf32> to vector<4x16xf32>
    %66 = vector.shape_cast %65 : vector<4x16xf32> to vector<4x16x1xf32>
    %67 = tpu.reciprocal %66 {approx = true} : vector<4x16x1xf32> -> vector<4x16x1xf32>
    %68 = vector.broadcast %67 : vector<4x16x1xf32> to vector<4x16x16xf32>
    %69 = arith.mulf %64, %68 : vector<4x16x16xf32>
    %70 = arith.truncf %69 : vector<4x16x16xf32> to vector<4x16x16xbf16>
    "tpu.trace_start"() <{level = 10 : i32, message = "bqk,bkd->bqd"}> : () -> ()
    %cst_32 = arith.constant dense<0.000000e+00> : vector<4x16x32xf32>
    %71 = tpu.matmul %70, %57, %cst_32 {dimension_numbers = #tpu.dot_dimension_numbers<[2], [1], [1], [2], [0, 0, 0, 1, 1, 2], [0], [0]>} : vector<4x16x16xbf16>, vector<4x16x32xbf16>, vector<4x16x32xf32> -> vector<4x16x32xf32>
    "tpu.trace_stop"() : () -> ()
    %72 = vector.shape_cast %71 : vector<4x16x32xf32> to vector<64x32xf32>
    %73 = arith.truncf %72 : vector<64x32xf32> to vector<64x32xbf16>
    %c1 = arith.constant 1 : index
    %c0_33 = arith.constant 0 : index
    %c0_34 = arith.constant 0 : index
    %74 = vector.load %arg8[%c1, %c0_33, %c0_34] : memref<4x32x128xbf16, #tpu.memory_space<vmem>>, vector<1x32x128xbf16>
    %75 = vector.shape_cast %74 : vector<1x32x128xbf16> to vector<32x128xbf16>
    %cst_35 = arith.constant dense<0.000000e+00> : vector<64x128xf32>
    %76 = tpu.matmul %73, %75, %cst_35 {dimension_numbers = #tpu.dot_dimension_numbers<[1], [0], [0], [1], [0, 0, 1, 1], [], []>} : vector<64x32xbf16>, vector<32x128xbf16>, vector<64x128xf32> -> vector<64x128xf32>
    %77 = arith.addf %51, %76 : vector<64x128xf32>
    %78 = vector.extract_strided_slice %20 {offsets = [0, 0, 64], sizes = [4, 16, 32], strides = [1, 1, 1]} : vector<4x16x128xf32> to vector<4x16x32xf32>
    %79 = arith.truncf %78 : vector<4x16x32xf32> to vector<4x16x32xbf16>
    %80 = vector.extract_strided_slice %23 {offsets = [0, 0, 64], sizes = [4, 16, 32], strides = [1, 1, 1]} : vector<4x16x128xf32> to vector<4x16x32xf32>
    %81 = arith.truncf %80 : vector<4x16x32xf32> to vector<4x16x32xbf16>
    %82 = vector.extract_strided_slice %26 {offsets = [0, 0, 64], sizes = [4, 16, 32], strides = [1, 1, 1]} : vector<4x16x128xf32> to vector<4x16x32xf32>
    %83 = arith.truncf %82 : vector<4x16x32xf32> to vector<4x16x32xbf16>
    "tpu.trace_start"() <{level = 10 : i32, message = "bqd,bkd->bqk"}> : () -> ()
    %cst_36 = arith.constant dense<0.000000e+00> : vector<4x16x16xf32>
    %84 = tpu.matmul %79, %81, %cst_36 {dimension_numbers = #tpu.dot_dimension_numbers<[2], [2], [1], [1], [0, 0, 0, 1, 1, 1], [0], [0]>} : vector<4x16x32xbf16>, vector<4x16x32xbf16>, vector<4x16x16xf32> -> vector<4x16x16xf32>
    "tpu.trace_stop"() : () -> ()
    %85 = arith.addf %84, %8 : vector<4x16x16xf32>
    %cst_37 = arith.constant dense<0xFF800000> : vector<4x16xf32>
    %86 = vector.multi_reduction <maximumf>, %85, %cst_37 [2] : vector<4x16x16xf32> to vector<4x16xf32>
    %87 = vector.shape_cast %86 : vector<4x16xf32> to vector<4x16x1xf32>
    %88 = vector.broadcast %87 : vector<4x16x1xf32> to vector<4x16x16xf32>
    %89 = arith.subf %85, %88 : vector<4x16x16xf32>
    %90 = math.exp %89 : vector<4x16x16xf32>
    %cst_38 = arith.constant dense<0.000000e+00> : vector<4x16xf32>
    %91 = vector.multi_reduction <add>, %90, %cst_38 [2] : vector<4x16x16xf32> to vector<4x16xf32>
    %92 = vector.shape_cast %91 : vector<4x16xf32> to vector<4x16x1xf32>
    %93 = tpu.reciprocal %92 {approx = true} : vector<4x16x1xf32> -> vector<4x16x1xf32>
    %94 = vector.broadcast %93 : vector<4x16x1xf32> to vector<4x16x16xf32>
    %95 = arith.mulf %90, %94 : vector<4x16x16xf32>
    %96 = arith.truncf %95 : vector<4x16x16xf32> to vector<4x16x16xbf16>
    "tpu.trace_start"() <{level = 10 : i32, message = "bqk,bkd->bqd"}> : () -> ()
    %cst_39 = arith.constant dense<0.000000e+00> : vector<4x16x32xf32>
    %97 = tpu.matmul %96, %83, %cst_39 {dimension_numbers = #tpu.dot_dimension_numbers<[2], [1], [1], [2], [0, 0, 0, 1, 1, 2], [0], [0]>} : vector<4x16x16xbf16>, vector<4x16x32xbf16>, vector<4x16x32xf32> -> vector<4x16x32xf32>
    "tpu.trace_stop"() : () -> ()
    %98 = vector.shape_cast %97 : vector<4x16x32xf32> to vector<64x32xf32>
    %99 = arith.truncf %98 : vector<64x32xf32> to vector<64x32xbf16>
    %c2 = arith.constant 2 : index
    %c0_40 = arith.constant 0 : index
    %c0_41 = arith.constant 0 : index
    %100 = vector.load %arg8[%c2, %c0_40, %c0_41] : memref<4x32x128xbf16, #tpu.memory_space<vmem>>, vector<1x32x128xbf16>
    %101 = vector.shape_cast %100 : vector<1x32x128xbf16> to vector<32x128xbf16>
    %cst_42 = arith.constant dense<0.000000e+00> : vector<64x128xf32>
    %102 = tpu.matmul %99, %101, %cst_42 {dimension_numbers = #tpu.dot_dimension_numbers<[1], [0], [0], [1], [0, 0, 1, 1], [], []>} : vector<64x32xbf16>, vector<32x128xbf16>, vector<64x128xf32> -> vector<64x128xf32>
    %103 = arith.addf %77, %102 : vector<64x128xf32>
    %104 = vector.extract_strided_slice %20 {offsets = [0, 0, 96], sizes = [4, 16, 32], strides = [1, 1, 1]} : vector<4x16x128xf32> to vector<4x16x32xf32>
    %105 = arith.truncf %104 : vector<4x16x32xf32> to vector<4x16x32xbf16>
    %106 = vector.extract_strided_slice %23 {offsets = [0, 0, 96], sizes = [4, 16, 32], strides = [1, 1, 1]} : vector<4x16x128xf32> to vector<4x16x32xf32>
    %107 = arith.truncf %106 : vector<4x16x32xf32> to vector<4x16x32xbf16>
    %108 = vector.extract_strided_slice %26 {offsets = [0, 0, 96], sizes = [4, 16, 32], strides = [1, 1, 1]} : vector<4x16x128xf32> to vector<4x16x32xf32>
    %109 = arith.truncf %108 : vector<4x16x32xf32> to vector<4x16x32xbf16>
    "tpu.trace_start"() <{level = 10 : i32, message = "bqd,bkd->bqk"}> : () -> ()
    %cst_43 = arith.constant dense<0.000000e+00> : vector<4x16x16xf32>
    %110 = tpu.matmul %105, %107, %cst_43 {dimension_numbers = #tpu.dot_dimension_numbers<[2], [2], [1], [1], [0, 0, 0, 1, 1, 1], [0], [0]>} : vector<4x16x32xbf16>, vector<4x16x32xbf16>, vector<4x16x16xf32> -> vector<4x16x16xf32>
    "tpu.trace_stop"() : () -> ()
    %111 = arith.addf %110, %8 : vector<4x16x16xf32>
    %cst_44 = arith.constant dense<0xFF800000> : vector<4x16xf32>
    %112 = vector.multi_reduction <maximumf>, %111, %cst_44 [2] : vector<4x16x16xf32> to vector<4x16xf32>
    %113 = vector.shape_cast %112 : vector<4x16xf32> to vector<4x16x1xf32>
    %114 = vector.broadcast %113 : vector<4x16x1xf32> to vector<4x16x16xf32>
    %115 = arith.subf %111, %114 : vector<4x16x16xf32>
    %116 = math.exp %115 : vector<4x16x16xf32>
    %cst_45 = arith.constant dense<0.000000e+00> : vector<4x16xf32>
    %117 = vector.multi_reduction <add>, %116, %cst_45 [2] : vector<4x16x16xf32> to vector<4x16xf32>
    %118 = vector.shape_cast %117 : vector<4x16xf32> to vector<4x16x1xf32>
    %119 = tpu.reciprocal %118 {approx = true} : vector<4x16x1xf32> -> vector<4x16x1xf32>
    %120 = vector.broadcast %119 : vector<4x16x1xf32> to vector<4x16x16xf32>
    %121 = arith.mulf %116, %120 : vector<4x16x16xf32>
    %122 = arith.truncf %121 : vector<4x16x16xf32> to vector<4x16x16xbf16>
    "tpu.trace_start"() <{level = 10 : i32, message = "bqk,bkd->bqd"}> : () -> ()
    %cst_46 = arith.constant dense<0.000000e+00> : vector<4x16x32xf32>
    %123 = tpu.matmul %122, %109, %cst_46 {dimension_numbers = #tpu.dot_dimension_numbers<[2], [1], [1], [2], [0, 0, 0, 1, 1, 2], [0], [0]>} : vector<4x16x16xbf16>, vector<4x16x32xbf16>, vector<4x16x32xf32> -> vector<4x16x32xf32>
    "tpu.trace_stop"() : () -> ()
    %124 = vector.shape_cast %123 : vector<4x16x32xf32> to vector<64x32xf32>
    %125 = arith.truncf %124 : vector<64x32xf32> to vector<64x32xbf16>
    %c3 = arith.constant 3 : index
    %c0_47 = arith.constant 0 : index
    %c0_48 = arith.constant 0 : index
    %126 = vector.load %arg8[%c3, %c0_47, %c0_48] : memref<4x32x128xbf16, #tpu.memory_space<vmem>>, vector<1x32x128xbf16>
    %127 = vector.shape_cast %126 : vector<1x32x128xbf16> to vector<32x128xbf16>
    %cst_49 = arith.constant dense<0.000000e+00> : vector<64x128xf32>
    %128 = tpu.matmul %125, %127, %cst_49 {dimension_numbers = #tpu.dot_dimension_numbers<[1], [0], [0], [1], [0, 0, 1, 1], [], []>} : vector<64x32xbf16>, vector<32x128xbf16>, vector<64x128xf32> -> vector<64x128xf32>
    %129 = arith.addf %103, %128 : vector<64x128xf32>
    %130 = vector.broadcast %10 : vector<1x128xf32> to vector<64x128xf32>
    %131 = arith.addf %129, %130 : vector<64x128xf32>
    %132 = arith.addf %131, %1 : vector<64x128xf32>
    %cst_50 = arith.constant dense<0.000000e+00> : vector<64xf32>
    %133 = vector.multi_reduction <add>, %132, %cst_50 [1] : vector<64x128xf32> to vector<64xf32>
    %134 = vector.shape_cast %133 : vector<64xf32> to vector<64x1xf32>
    %cst_51 = arith.constant 1.280000e+02 : f32
    %135 = vector.broadcast %cst_51 : f32 to vector<64x1xf32>
    %136 = arith.divf %134, %135 : vector<64x1xf32>
    %137 = vector.broadcast %136 : vector<64x1xf32> to vector<64x128xf32>
    %138 = arith.subf %132, %137 : vector<64x128xf32>
    %139 = arith.mulf %138, %138 : vector<64x128xf32>
    %cst_52 = arith.constant dense<0.000000e+00> : vector<64xf32>
    %140 = vector.multi_reduction <add>, %139, %cst_52 [1] : vector<64x128xf32> to vector<64xf32>
    %141 = vector.shape_cast %140 : vector<64xf32> to vector<64x1xf32>
    %cst_53 = arith.constant 1.280000e+02 : f32
    %142 = vector.broadcast %cst_53 : f32 to vector<64x1xf32>
    %143 = arith.divf %141, %142 : vector<64x1xf32>
    %cst_54 = arith.constant 9.99999974E-6 : f32
    %144 = vector.broadcast %cst_54 : f32 to vector<64x1xf32>
    %145 = arith.addf %143, %144 : vector<64x1xf32>
    %146 = math.rsqrt %145 : vector<64x1xf32>
    %147 = vector.broadcast %146 : vector<64x1xf32> to vector<64x128xf32>
    %148 = arith.mulf %138, %147 : vector<64x128xf32>
    %149 = vector.broadcast %11 : vector<1x128xf32> to vector<64x128xf32>
    %150 = arith.mulf %148, %149 : vector<64x128xf32>
    %151 = vector.broadcast %12 : vector<1x128xf32> to vector<64x128xf32>
    %152 = arith.addf %150, %151 : vector<64x128xf32>
    %153 = arith.truncf %152 : vector<64x128xf32> to vector<64x128xbf16>
    %c0_55 = arith.constant 0 : index
    %c0_56 = arith.constant 0 : index
    %154 = vector.load %arg9[%c0_55, %c0_56] : memref<128x256xbf16, #tpu.memory_space<vmem>>, vector<128x256xbf16>
    %cst_57 = arith.constant dense<0.000000e+00> : vector<64x256xf32>
    %155 = tpu.matmul %153, %154, %cst_57 {dimension_numbers = #tpu.dot_dimension_numbers<[1], [0], [0], [1], [0, 0, 1, 1], [], []>} : vector<64x128xbf16>, vector<128x256xbf16>, vector<64x256xf32> -> vector<64x256xf32>
    %156 = vector.broadcast %13 : vector<1x256xf32> to vector<64x256xf32>
    %157 = arith.addf %155, %156 : vector<64x256xf32>
    %cst_58 = arith.constant 0.000000e+00 : f32
    %158 = vector.broadcast %cst_58 : f32 to vector<64x256xf32>
    %159 = arith.maximumf %157, %158 : vector<64x256xf32>
    %160 = arith.truncf %159 : vector<64x256xf32> to vector<64x256xbf16>
    %c0_59 = arith.constant 0 : index
    %c0_60 = arith.constant 0 : index
    %161 = vector.load %arg10[%c0_59, %c0_60] : memref<256x128xbf16, #tpu.memory_space<vmem>>, vector<256x128xbf16>
    %cst_61 = arith.constant dense<0.000000e+00> : vector<64x128xf32>
    %162 = tpu.matmul %160, %161, %cst_61 {dimension_numbers = #tpu.dot_dimension_numbers<[1], [0], [0], [1], [0, 0, 1, 1], [], []>} : vector<64x256xbf16>, vector<256x128xbf16>, vector<64x128xf32> -> vector<64x128xf32>
    %163 = vector.broadcast %14 : vector<1x128xf32> to vector<64x128xf32>
    %164 = arith.addf %162, %163 : vector<64x128xf32>
    %165 = arith.addf %164, %152 : vector<64x128xf32>
    %cst_62 = arith.constant dense<0.000000e+00> : vector<64xf32>
    %166 = vector.multi_reduction <add>, %165, %cst_62 [1] : vector<64x128xf32> to vector<64xf32>
    %167 = vector.shape_cast %166 : vector<64xf32> to vector<64x1xf32>
    %cst_63 = arith.constant 1.280000e+02 : f32
    %168 = vector.broadcast %cst_63 : f32 to vector<64x1xf32>
    %169 = arith.divf %167, %168 : vector<64x1xf32>
    %170 = vector.broadcast %169 : vector<64x1xf32> to vector<64x128xf32>
    %171 = arith.subf %165, %170 : vector<64x128xf32>
    %172 = arith.mulf %171, %171 : vector<64x128xf32>
    %cst_64 = arith.constant dense<0.000000e+00> : vector<64xf32>
    %173 = vector.multi_reduction <add>, %172, %cst_64 [1] : vector<64x128xf32> to vector<64xf32>
    %174 = vector.shape_cast %173 : vector<64xf32> to vector<64x1xf32>
    %cst_65 = arith.constant 1.280000e+02 : f32
    %175 = vector.broadcast %cst_65 : f32 to vector<64x1xf32>
    %176 = arith.divf %174, %175 : vector<64x1xf32>
    %cst_66 = arith.constant 9.99999974E-6 : f32
    %177 = vector.broadcast %cst_66 : f32 to vector<64x1xf32>
    %178 = arith.addf %176, %177 : vector<64x1xf32>
    %179 = math.rsqrt %178 : vector<64x1xf32>
    %180 = vector.broadcast %179 : vector<64x1xf32> to vector<64x128xf32>
    %181 = arith.mulf %171, %180 : vector<64x128xf32>
    %182 = vector.broadcast %15 : vector<1x128xf32> to vector<64x128xf32>
    %183 = arith.mulf %181, %182 : vector<64x128xf32>
    %184 = vector.broadcast %16 : vector<1x128xf32> to vector<64x128xf32>
    %185 = arith.addf %183, %184 : vector<64x128xf32>
    %186 = vector.shape_cast %185 : vector<64x128xf32> to vector<4x16x128xf32>
    %c0_67 = arith.constant 0 : index
    %c0_68 = arith.constant 0 : index
    %c0_69 = arith.constant 0 : index
    %187 = vector.load %arg12[%c0_67, %c0_68, %c0_69] : memref<4x16x128xf32, #tpu.memory_space<vmem>>, vector<4x16x128xf32>
    tpu.vector_store %arg12[%c0_67, %c0_68, %c0_69], %186 {strides = array<i32>} : memref<4x16x128xf32, #tpu.memory_space<vmem>>, vector<4x16x128xf32>,
    return
  }
  func.func @transform_0(%arg0: i32) -> (i32, i32, i32) {
    %c0_i32 = arith.constant 0 : i32
    %c0_i32_0 = arith.constant 0 : i32
    %c0_i32_1 = arith.constant 0 : i32
    return %arg0, %c0_i32, %c0_i32_0 : i32, i32, i32
  }
  func.func @transform_1(%arg0: i32) -> (i32, i32, i32) {
    %c0_i32 = arith.constant 0 : i32
    %c0_i32_0 = arith.constant 0 : i32
    %c0_i32_1 = arith.constant 0 : i32
    return %arg0, %c0_i32, %c0_i32_0 : i32, i32, i32
  }
  func.func @transform_2(%arg0: i32) -> (i32, i32, i32) {
    %c0_i32 = arith.constant 0 : i32
    %c0_i32_0 = arith.constant 0 : i32
    %c0_i32_1 = arith.constant 0 : i32
    return %arg0, %c0_i32, %c0_i32_0 : i32, i32, i32
  }
  func.func @transform_3(%arg0: i32) -> (i32, i32, i32) {
    %c0_i32 = arith.constant 0 : i32
    %c0_i32_0 = arith.constant 0 : i32
    %c0_i32_1 = arith.constant 0 : i32
    return %arg0, %c0_i32, %c0_i32_0 : i32, i32, i32
  }
  func.func @transform_4(%arg0: i32) -> (i32, i32) {
    %c0_i32 = arith.constant 0 : i32
    %c0_i32_0 = arith.constant 0 : i32
    %c0_i32_1 = arith.constant 0 : i32
    return %c0_i32, %c0_i32_0 : i32, i32
  }
  func.func @transform_5(%arg0: i32) -> (i32, i32) {
    %c0_i32 = arith.constant 0 : i32
    %c0_i32_0 = arith.constant 0 : i32
    %c0_i32_1 = arith.constant 0 : i32
    return %c0_i32, %c0_i32_0 : i32, i32
  }
  func.func @transform_6(%arg0: i32) -> (i32, i32) {
    %c0_i32 = arith.constant 0 : i32
    %c0_i32_0 = arith.constant 0 : i32
    %c0_i32_1 = arith.constant 0 : i32
    return %c0_i32, %c0_i32_0 : i32, i32
  }
  func.func @transform_7(%arg0: i32) -> (i32, i32, i32) {
    %c0_i32 = arith.constant 0 : i32
    %c0_i32_0 = arith.constant 0 : i32
    %c0_i32_1 = arith.constant 0 : i32
    %c0_i32_2 = arith.constant 0 : i32
    return %c0_i32, %c0_i32_0, %c0_i32_1 : i32, i32, i32
  }
  func.func @transform_8(%arg0: i32) -> (i32, i32) {
    %c0_i32 = arith.constant 0 : i32
    %c0_i32_0 = arith.constant 0 : i32
    %c0_i32_1 = arith.constant 0 : i32
    return %c0_i32, %c0_i32_0 : i32, i32
  }
  func.func @transform_9(%arg0: i32) -> (i32, i32) {
    %c0_i32 = arith.constant 0 : i32
    %c0_i32_0 = arith.constant 0 : i32
    %c0_i32_1 = arith.constant 0 : i32
    return %c0_i32, %c0_i32_0 : i32, i32
  }
  func.func @transform_10(%arg0: i32) -> (i32, i32) {
    %c0_i32 = arith.constant 0 : i32
    %c0_i32_0 = arith.constant 0 : i32
    %c0_i32_1 = arith.constant 0 : i32
    return %c0_i32, %c0_i32_0 : i32, i32
  }
  func.func @transform_11(%arg0: i32) -> (i32, i32, i32) {
    %c0_i32 = arith.constant 0 : i32
    %c0_i32_0 = arith.constant 0 : i32
    %c0_i32_1 = arith.constant 0 : i32
    return %arg0, %c0_i32, %c0_i32_0 : i32, i32, i32
  }
}

</mosaic_0001>

<bundles_post_ra>
// kernel: tpu_custom_call.1
= control target key start
LH: loop header
LB: loop body
LE: loop exit
PB: predicated region body
PF: predicated region fallthrough
CT: control target
= control target key end

     0   :  { %16 = vsyncpa [#allocation3], 0  ;;  %s5571_s0 = inlined_call_operand.hbm [shape: f32[4,16,128], index: 0, kind: input, shape index: {}]   ;;  %s5572_s1 = inlined_call_operand.hbm [shape: f32[4,16,128], index: 1, kind: input, shape index: {}]   ;;  %s5573_s2 = inlined_call_operand.hbm [shape: f32[4,16,128], index: 2, kind: input, shape index: {}]   ;;  %s5574_s3 = inlined_call_operand.hbm [shape: f32[4,16,16], index: 3, kind: input, shape index: {}]   ;;  %s5575_s4 = inlined_call_operand.hbm [shape: bf16[128,128], index: 4, kind: input, shape index: {}]   ;;  %s5576_s5 = inlined_call_operand.hbm [shape: bf16[128,128], index: 5, kind: input, shape index: {}]   ;;  %s5577_s6 = inlined_call_operand.hbm [shape: bf16[128,128], index: 6, kind: input, shape index: {}]   ;;  %s5578_s7 = inlined_call_operand.hbm [shape: bf16[4,32,128], index: 7, kind: input, shape index: {}]   ;;  %s5579_s8 = inlined_call_operand.hbm [shape: bf16[128,256], index: 8, kind: input, shape index: {}]   ;;  %s5580_s9 = inlined_call_operand.hbm [shape: bf16[256,128], index: 9, kind: input, shape index: {}]   ;;  %s5581_s10 = inlined_call_operand.vmem [shape: f32[8,256], index: 10, kind: input, shape index: {}]   ;;  %s5582_s11 = inlined_call_operand.hbm [shape: f32[4,16,128], index: 11, kind: output, shape index: {}]  }
   0x1   :  { %17 = vsyncpa [#allocation6], 0 }
   0x2   :  { %18 = vsyncpa [#allocation9], 0 }
   0x3   :  { %19 = vsyncpa [#allocation12], 0 }
   0x4   :  { %20 = vsyncpa [#allocation15], 0 }
   0x5   :  { %21 = vsyncpa [#allocation18], 0 }
   0x6   :  { %22 = vsyncpa [#allocation4], 0  ;;  %s4725_s17 = smov [#allocation5]   ;;  %s4726_s19 = smov [#allocation8]  }
   0x7   :  { %s40_s18 = sshll.u32 %s4725_s17, 4  ;;  %s64_s20 = sshll.u32 %s4726_s19, 4  ;;  %s41_s18 = int_to_ptr.vmem [resolvable:$true] %s40_s18  ;;  %s65_s20 = int_to_ptr.vmem [resolvable:$true] %s64_s20 }
   0x8   :  { %s4499_s21 = scalar_lea.vmem %s41_s18, 1024  ;;  %p4504_p1 = scmp.lt.s32.totalorder %s41_s18, %s41_s18 }
   0x9   :  { %p4500_p0 = scmp.ne.s32.totalorder %s41_s18, %s4499_s21  ;;  %p4505_p2 = scmp.lt.s32.totalorder %s4499_s21, %s4499_s21 }
   0xb   :  { %p4506_p3 = por %p4505_p2, %p4504_p1 }
   0xd   :  { %p4507_p4 = pnand %p4506_p3, %p4500_p0 }
   0xf   :  { %4510 = shalt.err (!%p4507_p4)
}
  0x10   :  { %s4727_s22 = smov 128   ;;  %s4728_s23 = smov 8  }
  0x11   :  { %46 = dma.hbm_to_vmem [thread:$0]  %s5572_s1, 1024, %s41_s18, [#allocation6], %s4727_s22, %s4727_s22, %s4728_s23  }
  0x12   :  { %s4519_s26 = scalar_lea.vmem %s65_s20, 1024  ;;  %p4524_p6 = scmp.lt.s32.totalorder %s65_s20, %s65_s20 }
  0x13   :  { %p4520_p5 = scmp.ne.s32.totalorder %s65_s20, %s4519_s26  ;;  %p4525_p7 = scmp.lt.s32.totalorder %s4519_s26, %s4519_s26 }
  0x15   :  { %p4526_p8 = por %p4525_p7, %p4524_p6 }
  0x17   :  { %p4527_p9 = pnand %p4526_p8, %p4520_p5 }
  0x19   :  { %4530 = shalt.err (!%p4527_p9)
}
  0x1a   :  { %70 = dma.hbm_to_vmem [thread:$0]  %s5574_s3, 1024, %s65_s20, [#allocation9], %s4727_s22, %s4727_s22, %s4728_s23  }
  0x1b   :  { %s4729_s29 = smov [#allocation11]   ;;  %s4730_s12 = smov [#allocation14]  }
  0x1c   :  { %s88_s30 = sshll.u32 %s4729_s29, 4  ;;  %s112_s13 = sshll.u32 %s4730_s12, 4  ;;  %s89_s30 = int_to_ptr.vmem [resolvable:$true] %s88_s30  ;;  %s113_s13 = int_to_ptr.vmem [resolvable:$true] %s112_s13 }
  0x1d   :  { %s4539_s1 = scalar_lea.vmem %s89_s30, 1024  ;;  %p4544_p11 = scmp.lt.s32.totalorder %s89_s30, %s89_s30 }
  0x1e   :  { %p4540_p10 = scmp.ne.s32.totalorder %s89_s30, %s4539_s1  ;;  %p4545_p12 = scmp.lt.s32.totalorder %s4539_s1, %s4539_s1 }
  0x20   :  { %p4546_p13 = por %p4545_p12, %p4544_p11 }
  0x22   :  { %p4547_p0 = pnand %p4546_p13, %p4540_p10 }
  0x24   :  { %4550 = shalt.err (!%p4547_p0)
}
  0x25   :  { %s4731_s14 = smov 64   ;;  %s4732_s15 = smov 4  }
  0x26   :  { %94 = dma.hbm_to_vmem [thread:$0]  %s5576_s5, 1024, %s89_s30, [#allocation12], %s4731_s14, %s4731_s14, %s4732_s15  }
  0x27   :  { %s4559_s17 = scalar_lea.vmem %s113_s13, 1024  ;;  %p4564_p2 = scmp.lt.s32.totalorder %s113_s13, %s113_s13 }
  0x28   :  { %p4560_p1 = scmp.ne.s32.totalorder %s113_s13, %s4559_s17  ;;  %p4565_p3 = scmp.lt.s32.totalorder %s4559_s17, %s4559_s17 }
  0x2a   :  { %p4566_p4 = por %p4565_p3, %p4564_p2 }
  0x2c   :  { %p4567_p5 = pnand %p4566_p4, %p4560_p1 }
  0x2e   :  { %4570 = shalt.err (!%p4567_p5)
}
  0x2f   :  { %118 = dma.hbm_to_vmem [thread:$0]  %s5578_s7, 1024, %s113_s13, [#allocation15], %s4731_s14, %s4731_s14, %s4732_s15  }
  0x30   :  { %s4733_s20 = smov [#allocation2]   ;;  %s4734_s24 = smov [#allocation7]  }
  0x31   :  { %s28_s21 = sshll.u32 %s4733_s20, 4  ;;  %s52_s25 = sshll.u32 %s4734_s24, 4  ;;  %s29_s21 = int_to_ptr.vmem [resolvable:$true] %s28_s21  ;;  %s53_s25 = int_to_ptr.vmem [resolvable:$true] %s52_s25 }
  0x32   :  { %s4579_s5 = scalar_lea.vmem %s29_s21, 1024  ;;  %p4584_p7 = scmp.lt.s32.totalorder %s29_s21, %s29_s21 }
  0x33   :  { %p4580_p6 = scmp.ne.s32.totalorder %s29_s21, %s4579_s5  ;;  %p4585_p8 = scmp.lt.s32.totalorder %s4579_s5, %s4579_s5 }
  0x35   :  { %p4586_p9 = por %p4585_p8, %p4584_p7 }
  0x37   :  { %p4587_p10 = pnand %p4586_p9, %p4580_p6 }
  0x39   :  { %4590 = shalt.err (!%p4587_p10)
}
  0x3a   :  { %34 = dma.hbm_to_vmem [thread:$0]  %s5571_s0, 1024, %s29_s21, [#allocation3], %s4727_s22, %s4727_s22, %s4728_s23  }
  0x3b   :  { %s4599_s7 = scalar_lea.vmem %s53_s25, 1024  ;;  %p4604_p12 = scmp.lt.s32.totalorder %s53_s25, %s53_s25 }
  0x3c   :  { %p4600_p11 = scmp.ne.s32.totalorder %s53_s25, %s4599_s7  ;;  %p4605_p13 = scmp.lt.s32.totalorder %s4599_s7, %s4599_s7 }
  0x3e   :  { %p4606_p0 = por %p4605_p13, %p4604_p12 }
  0x40   :  { %p4607_p1 = pnand %p4606_p0, %p4600_p11 }
  0x42   :  { %4610 = shalt.err (!%p4607_p1)
}
  0x43   :  { %58 = dma.hbm_to_vmem [thread:$0]  %s5573_s2, 1024, %s53_s25, [#allocation6], %s4727_s22, %s4727_s22, %s4728_s23  }
  0x44   :  { %s4735_s30 = smov [#allocation10]   ;;  %s4736_s13 = smov [#allocation13]  }
  0x45   :  { %s76_s12 = sshll.u32 %s4735_s30, 4  ;;  %s100_s1 = sshll.u32 %s4736_s13, 4  ;;  %s77_s12 = int_to_ptr.vmem [resolvable:$true] %s76_s12  ;;  %s101_s1 = int_to_ptr.vmem [resolvable:$true] %s100_s1 }
  0x46   :  { %s4619_s0 = scalar_lea.vmem %s77_s12, 1024  ;;  %p4624_p3 = scmp.lt.s32.totalorder %s77_s12, %s77_s12 }
  0x47   :  { %p4620_p2 = scmp.ne.s32.totalorder %s77_s12, %s4619_s0  ;;  %p4625_p4 = scmp.lt.s32.totalorder %s4619_s0, %s4619_s0 }
  0x49   :  { %p4626_p5 = por %p4625_p4, %p4624_p3 }
  0x4b   :  { %p4627_p6 = pnand %p4626_p5, %p4620_p2 }
  0x4d   :  { %4630 = shalt.err (!%p4627_p6)
}
  0x4e   :  { %82 = dma.hbm_to_vmem [thread:$0]  %s5575_s4, 1024, %s77_s12, [#allocation9], %s4731_s14, %s4731_s14, %s4732_s15  }
  0x4f   :  { %s4639_s2 = scalar_lea.vmem %s101_s1, 1024  ;;  %p4644_p8 = scmp.lt.s32.totalorder %s101_s1, %s101_s1 }
  0x50   :  { %p4640_p7 = scmp.ne.s32.totalorder %s101_s1, %s4639_s2  ;;  %p4645_p9 = scmp.lt.s32.totalorder %s4639_s2, %s4639_s2 }
  0x52   :  { %p4646_p10 = por %p4645_p9, %p4644_p8 }
  0x54   :  { %p4647_p11 = pnand %p4646_p10, %p4640_p7 }
  0x56   :  { %4650 = shalt.err (!%p4647_p11)
}
  0x57   :  { %106 = dma.hbm_to_vmem [thread:$0]  %s5577_s6, 1024, %s101_s1, [#allocation12], %s4731_s14, %s4731_s14, %s4732_s15  }
  0x58   :  { %s4737_s19 = smov [#allocation16]   ;;  %s4738_s21 = smov [#allocation17]  }
  0x59   :  { %s124_s20 = sshll.u32 %s4737_s19, 4  ;;  %s136_s24 = sshll.u32 %s4738_s21, 4  ;;  %s125_s20 = int_to_ptr.vmem [resolvable:$true] %s124_s20  ;;  %s137_s24 = int_to_ptr.vmem [resolvable:$true] %s136_s24 }
  0x5a   :  { %s4659_s4 = scalar_lea.vmem %s125_s20, 2048  ;;  %p4664_p13 = scmp.lt.s32.totalorder %s125_s20, %s125_s20 }
  0x5b   :  { %p4660_p12 = scmp.ne.s32.totalorder %s125_s20, %s4659_s4  ;;  %p4665_p0 = scmp.lt.s32.totalorder %s4659_s4, %s4659_s4 }
  0x5d   :  { %p4666_p1 = por %p4665_p0, %p4664_p13 }
  0x5f   :  { %p4667_p2 = pnand %p4666_p1, %p4660_p12 }
  0x61   :  { %4670 = shalt.err (!%p4667_p2)
}
  0x62   :  { %130 = dma.hbm_to_vmem [thread:$0]  %s5579_s8, 2048, %s125_s20, [#allocation15], %s4727_s22, %s4727_s22, %s4728_s23  }
  0x63   :  { %s4679_s6 = scalar_lea.vmem %s137_s24, 2048  ;;  %p4684_p4 = scmp.lt.s32.totalorder %s137_s24, %s137_s24 }
  0x64   :  { %p4680_p3 = scmp.ne.s32.totalorder %s137_s24, %s4679_s6  ;;  %p4685_p5 = scmp.lt.s32.totalorder %s4679_s6, %s4679_s6 }
  0x66   :  { %p4686_p6 = por %p4685_p5, %p4684_p4 }
  0x68   :  { %p4687_p7 = pnand %p4686_p6, %p4680_p3 }
  0x6a   :  { %4690 = shalt.err (!%p4687_p7)
}
  0x6b   :  { %142 = dma.hbm_to_vmem [thread:$0]  %s5580_s9, 2048, %s137_s24, [#allocation18], %s4731_s14, %s4731_s14, %s4732_s15  }
  0x6c   :  { %4711 = dma.done.wait [#allocation3], 1024  }
  0x6d   :  { %4712 = vsyncadd [#allocation3], 4294966272 }
  0x6e   :  { %4713 = dma.done.wait [#allocation6], 2048  }
  0x6f   :  { %4714 = vsyncadd [#allocation6], 4294965248 }
  0x70   :  { %4715 = dma.done.wait [#allocation9], 2048  }
  0x71   :  { %4716 = vsyncadd [#allocation9], 4294965248 }
  0x72   :  { %4717 = dma.done.wait [#allocation12], 2048  }
  0x73   :  { %4718 = vsyncadd [#allocation12], 4294965248 }
  0x74   :  { %4719 = dma.done.wait [#allocation15], 3072  }
  0x75   :  { %4720 = vsyncadd [#allocation15], 4294964224 }
  0x76   :  { %4721 = dma.done.wait [#allocation18], 2048  }
  0x77   :  { %4722 = vsyncadd [#allocation18], 4294965248  ;;  %v4243_v0 = vld [vmem:[#allocation11 + $0x38] sm:$0xff]   ;;  %v4244_v1 = vld [vmem:[#allocation11 + $0x30] sm:$0xff]   ;;  %v4739_v40 = vmov 0.0   ;;  %vm4740_vm0 = vmmov 0  }
  0x78   :  { %3935 = vmatprep.subr.bf16.mxu1 %v4243_v0  ;;  %v4245_v2 = vld [vmem:[#allocation10 + $0x38] sm:$0xff]   ;;  %v4246_v3 = vld [vmem:[#allocation11 + $0x28] sm:$0xff]   ;;  %v4247_v4 = vld [vmem:[#allocation10 + $0x30] sm:$0xff]   ;;  %vm621_vm1 = vcmask 261120   ;;  %vm810_vm2 = vcmask 130048   ;;  %s4741_s8 = smov 96  }
  0x79   :  { %3936 = vmatpush3.bf16.msra.mxu1 %v4243_v0  ;;  %3911 = vmatprep.subr.bf16.mxu0 %v4245_v2  ;;  %v4249_v5 = vld [vmem:[#allocation10 + $0x28] sm:$0xff]   ;;  %v4248_v6 = vld [vmem:[#allocation11 + $0x20] sm:$0xff]   ;;  %v4250_v8 = vld [vmem:[#allocation11 + $0x18] sm:$0xff]   ;;  %s4742_s9 = smov 32  }
  0x7a   :  { %3937 = vmatprep.subr.bf16.mxu1 %v4244_v1  ;;  %3912 = vmatpush3.bf16.msra.mxu0 %v4245_v2  ;;  %v4251_v7 = vld [vmem:[#allocation10 + $0x20] sm:$0xff]   ;;  %v4253_v9 = vld [vmem:[#allocation10 + $0x18] sm:$0xff]   ;;  %v185_v11 = vld [vmem:[#allocation5 + $0x8] sm:$0xff] }
  0x7b   :  { %3913 = vmatprep.subr.bf16.mxu0 %v4247_v4  ;;  %v184_v10 = vld [vmem:[#allocation5] sm:$0xff]  ;;  %v4252_v13 = vld [vmem:[#allocation11 + $0x10] sm:$0xff]   ;;  %v177_v15 = vld [vmem:[#allocation2 + $0x8] sm:$0xff] }
  0x7c   :  { %v192_v12 = vpack.c.bf16 %v185_v11, %v184_v10  ;;  %v176_v14 = vld [vmem:[#allocation2] sm:$0xff]  ;;  %v4255_v16 = vld [vmem:[#allocation10 + $0x10] sm:$0xff]   ;;  %v4254_v18 = vld [vmem:[#allocation11 + $0x8] sm:$0xff]  }
  0x7d   :  { %3938 = vmatpush3.bf16.msra.mxu1 %v4244_v1  ;;  %v218_v17 = vpack.c.bf16 %v177_v15, %v176_v14  ;;  %v4257_v19 = vld [vmem:[#allocation10 + $0x8] sm:$0xff]   ;;  %v4256_v20 = vld [vmem:[#allocation11] sm:$0xff]   ;;  %v186_v22 = vld [vmem:[#allocation5 + $0x10] sm:$0xff] }
  0x7e   :  { %3939 = vmatprep.subr.bf16.mxu1 %v4246_v3  ;;  %3914 = vmatpush3.bf16.msra.mxu0 %v4247_v4  ;;  %v4258_v21 = vld [vmem:[#allocation10] sm:$0xff]   ;;  %v187_v23 = vld [vmem:[#allocation5 + $0x18] sm:$0xff]  ;;  %v189_v25 = vld [vmem:[#allocation5 + $0x28] sm:$0xff] }
  0x7f   :  { %3915 = vmatprep.subr.bf16.mxu0 %v4249_v5  ;;  %3951 = vmatprep.mubr.bf16.mxu1 %v192_v12  ;;  %v188_v24 = vld [vmem:[#allocation5 + $0x20] sm:$0xff]  ;;  %v178_v26 = vld [vmem:[#allocation2 + $0x10] sm:$0xff]  ;;  %v179_v27 = vld [vmem:[#allocation2 + $0x18] sm:$0xff]  ;;  %v193_v30 = vpack.c.bf16 %v187_v23, %v186_v22 }
  0x80   :  { %3927 = vmatprep.mubr.bf16.mxu0 %v218_v17  ;;  %v180_v28 = vld [vmem:[#allocation2 + $0x20] sm:$0xff]  ;;  %v181_v29 = vld [vmem:[#allocation2 + $0x28] sm:$0xff]  ;;  %v194_v31 = vpack.c.bf16 %v189_v25, %v188_v24  ;;  %v219_v32 = vpack.c.bf16 %v179_v27, %v178_v26  ;;  %v190_v33 = vld [vmem:[#allocation5 + $0x30] sm:$0xff] }
  0x81   :  { %3940 = vmatpush3.bf16.msra.mxu1 %v4246_v3  ;;  %v191_v34 = vld [vmem:[#allocation5 + $0x38] sm:$0xff]  ;;  %v220_v35 = vpack.c.bf16 %v181_v29, %v180_v28  ;;  %v182_v36 = vld [vmem:[#allocation2 + $0x30] sm:$0xff]  ;;  %v4262_v11 = vld [vmem:[#allocation13 + $0x20] sm:$0xff]  }
  0x82   :  { %3941 = vmatprep.subr.bf16.mxu1 %v4248_v6  ;;  %3916 = vmatpush3.bf16.msra.mxu0 %v4249_v5  ;;  %v183_v37 = vld [vmem:[#allocation2 + $0x38] sm:$0xff]  ;;  %v195_v38 = vpack.c.bf16 %v191_v34, %v190_v33  ;;  %v4265_v14 = vld [vmem:[#allocation13 + $0x8] sm:$0xff]   ;;  %v4266_v15 = vld [vmem:[#allocation13] sm:$0xff]  }
  0x83   :  { %3917 = vmatprep.subr.bf16.mxu0 %v4251_v7  ;;  %v221_v39 = vpack.c.bf16 %v183_v37, %v182_v36  ;;  %v4259_v5 = vld [vmem:[#allocation13 + $0x38] sm:$0xff]   ;;  %v202_v22 = vld [vmem:[#allocation7 + $0x30] sm:$0xff]  ;;  %v4915_v25 = vld [vmem:[#allocation8] sm:$0xff] }
  0x84   :  { %v4263_v12 = vld [vmem:[#allocation13 + $0x18] sm:$0xff]   ;;  %v4918_v29 = vld [vmem:[#allocation8 + $0x8] sm:$0xff]  ;;  %v4922_v34 = vld [vmem:[#allocation8 + $0x10] sm:$0xff] }
  0x85   :  { %3942 = vmatpush3.bf16.msra.mxu1 %v4248_v6  ;;  %v4260_v6 = vld [vmem:[#allocation13 + $0x30] sm:$0xff]   ;;  %v199_v17 = vld [vmem:[#allocation7 + $0x18] sm:$0xff] }
  0x86   :  { %3943 = vmatprep.subr.bf16.mxu1 %v4250_v8  ;;  %3918 = vmatpush3.bf16.msra.mxu0 %v4251_v7  ;;  %v196_v7 = vld [vmem:[#allocation7] sm:$0xff]  ;;  %v203_v23 = vld [vmem:[#allocation7 + $0x38] sm:$0xff] }
  0x87   :  { %3919 = vmatprep.subr.bf16.mxu0 %v4253_v9  ;;  %v207_v24 = vpack.c.bf16 %v203_v23, %v202_v22 }
  0x89   :  { %3944 = vmatpush3.bf16.msra.mxu1 %v4250_v8  ;;  %v197_v8 = vld [vmem:[#allocation7 + $0x8] sm:$0xff] }
  0x8a   :  { %3945 = vmatprep.subr.bf16.mxu1 %v4252_v13  ;;  %3920 = vmatpush3.bf16.msra.mxu0 %v4253_v9  ;;  %v4261_v9 = vld [vmem:[#allocation13 + $0x28] sm:$0xff]   ;;  %v204_v10 = vpack.c.bf16 %v197_v8, %v196_v7 }
  0x8b   :  { %3921 = vmatprep.subr.bf16.mxu0 %v4255_v16 }
  0x8d   :  { %3946 = vmatpush3.bf16.msra.mxu1 %v4252_v13  ;;  %v4264_v13 = vld [vmem:[#allocation13 + $0x10] sm:$0xff]  }
  0x8e   :  { %3947 = vmatprep.subr.bf16.mxu1 %v4254_v18  ;;  %3922 = vmatpush3.bf16.msra.mxu0 %v4255_v16  ;;  %v198_v16 = vld [vmem:[#allocation7 + $0x10] sm:$0xff] }
  0x8f   :  { %3923 = vmatprep.subr.bf16.mxu0 %v4257_v19 }
  0x91   :  { %3948 = vmatpush3.bf16.msra.mxu1 %v4254_v18  ;;  %v200_v18 = vld [vmem:[#allocation7 + $0x20] sm:$0xff] }
  0x92   :  { %3949 = vmatprep.subr.bf16.mxu1 %v4256_v20  ;;  %3924 = vmatpush3.bf16.msra.mxu0 %v4257_v19  ;;  %v201_v19 = vld [vmem:[#allocation7 + $0x28] sm:$0xff] }
  0x93   :  { %3925 = vmatprep.subr.bf16.mxu0 %v4258_v21 }
  0x95   :  { %3950 = vmatpush3.bf16.msra.mxu1 %v4256_v20  ;;  %v205_v20 = vpack.c.bf16 %v199_v17, %v198_v16 }
  0x96   :  { %3926 = vmatpush3.bf16.msra.mxu0 %v4258_v21  ;;  %3983 = vmatprep.subr.bf16.mxu1 %v4739_v40  ;;  %v206_v21 = vpack.c.bf16 %v201_v19, %v200_v18 }
  0x97   :  { %3959 = vmatprep.subr.bf16.mxu0 %v4259_v5 }
  0x98   :  { %3952 = vmatmul.mubr.bf16.vlgmr.msra.gmra.mxu1 %v193_v30 }
  0x99   :  { %3955 = vmatprep.mubr.bf16.mxu1 %v194_v31  ;;  %3928 = vmatmul.mubr.bf16.vlgmr.msra.gmra.mxu0 %v219_v32 }
  0x9a   :  { %3931 = vmatprep.mubr.bf16.mxu0 %v220_v35  ;;  %3960 = vmatpush3.bf16.msra.mxu0 %v4259_v5 }
  0x9b   :  { %3961 = vmatprep.subr.bf16.mxu0 %v4260_v6 }
  0x9e   :  { %3962 = vmatpush3.bf16.msra.mxu0 %v4260_v6 }
  0x9f   :  { %3963 = vmatprep.subr.bf16.mxu0 %v4261_v9 }
  0xa0   :  { %3956 = vmatmul.mubr.bf16.gmra.mxu1 %v195_v38 }
  0xa1   :  { %3932 = vmatmul.mubr.bf16.gmra.mxu0 %v221_v39  ;;  %3985 = vmatprep.mubr.msk.bf16.mxu1 %vm4740_vm0, %v4739_v40  ;;  %v4926_v39 = vld [vmem:[#allocation8 + $0x18] sm:$0xff] }
  0xa2   :  { %3975 = vmatprep.mubr.bf16.mxu0 %v204_v10  ;;  %3964 = vmatpush3.bf16.msra.mxu0 %v4261_v9 }
  0xa3   :  { %3965 = vmatprep.subr.bf16.mxu0 %v4262_v11 }
  0xa6   :  { %3966 = vmatpush3.bf16.msra.mxu0 %v4262_v11 }
  0xa7   :  { %3967 = vmatprep.subr.bf16.mxu0 %v4263_v12 }
  0xaa   :  { %3968 = vmatpush3.bf16.msra.mxu0 %v4263_v12 }
  0xab   :  { %3969 = vmatprep.subr.bf16.mxu0 %v4264_v13 }
  0xae   :  { %3970 = vmatpush3.bf16.msra.mxu0 %v4264_v13 }
  0xaf   :  { %3971 = vmatprep.subr.bf16.mxu0 %v4265_v14 }
  0xb2   :  { %3972 = vmatpush3.bf16.msra.mxu0 %v4265_v14 }
  0xb3   :  { %3973 = vmatprep.subr.bf16.mxu0 %v4266_v15 }
  0xb6   :  { %3974 = vmatpush3.bf16.msra.mxu0 %v4266_v15 }
  0xb7   :  { %4007 = vmatprep.subr.bf16.mxu0 %v4739_v40 }
  0xb9   :  { %3976 = vmatmul.mubr.bf16.vlgmr.msra.gmra.mxu0 %v205_v20 }
  0xba   :  { %3979 = vmatprep.mubr.bf16.mxu0 %v206_v21 }
  0xc1   :  { %3980 = vmatmul.mubr.bf16.gmra.mxu0 %v207_v24 }
  0xc2   :  { %4009 = vmatprep.mubr.msk.bf16.mxu0 %vm4740_vm0, %v4739_v40 }
 0x158   :  { %v3953_v41 = vpop.f32.mrf.mxu1 }
 0x159   :  { %v3929_v43 = vpop.f32.mrf.mxu0 }
 0x15a   :  { %v449_v42 = vpop.f32.mrf.mxu1 }
 0x15b   :  { %v320_v45 = vpop.f32.mrf.mxu0 }
 0x15c   :  { %v3954_v44 = vpop.f32.mrf.mxu1 }
 0x15d   :  { %v3930_v48 = vpop.f32.mrf.mxu0  ;;  %v4873_v53 = vpack.c.bf16 %v3954_v44, %v3953_v41 }
 0x15e   :  { %v452_v46 = vpop.f32.mrf.mxu1  ;;  %v4886_v61 = vpack.c.bf16 %v3930_v48, %v3929_v43 }
 0x15f   :  { %v4868_v47 = vpack.c.bf16 %v452_v46, %v449_v42  ;;  %v323_v52 = vpop.f32.mrf.mxu0  ;;  %v673_v57 = vsel %vm621_vm1, %v4873_v53, 0 }
 0x160   :  { %v3957_v49 = vpop.f32.mrf.mxu1  ;;  %v4875_v55 = vpack.c.bf16 %v323_v52, %v320_v45  ;;  %v4930_v45 = vld [vmem:[#allocation8 + $0x20] sm:$0xff] }
 0x161   :  { %v626_v50 = vsel %vm621_vm1, %v4868_v47, 0  ;;  %v3933_v56 = vpop.f32.mrf.mxu0 }
 0x162   :  { %3984 = vmatpush3.bf16.xpose.msra.mxu1 %v626_v50  ;;  %v465_v51 = vpop.f32.mrf.mxu1 }
 0x163   :  { %3989 = vmatprep.subr.bf16.mxu1 %v4739_v40  ;;  %v336_v59 = vpop.f32.mrf.mxu0 }
 0x164   :  { %v3958_v54 = vpop.f32.mrf.mxu1 }
 0x165   :  { %v3934_v62 = vpop.f32.mrf.mxu0  ;;  %v4895_v1 = vpack.c.bf16 %v3958_v54, %v3957_v49 }
 0x166   :  { %v468_v58 = vpop.f32.mrf.mxu1  ;;  %v4906_v4 = vpack.c.bf16 %v3934_v62, %v3933_v56 }
 0x167   :  { %v4884_v60 = vpack.c.bf16 %v468_v58, %v465_v51  ;;  %v339_v0 = vpop.f32.mrf.mxu0  ;;  %v767_v3 = vsel %vm621_vm1, %v4895_v1, 0  ;;  %v4934_v51 = vld [vmem:[#allocation8 + $0x28] sm:$0xff]  ;;  %v4938_v58 = vld [vmem:[#allocation8 + $0x30] sm:$0xff] }
 0x168   :  { %v4897_v2 = vpack.c.bf16 %v339_v0, %v336_v59 }
 0x169   :  { %3986 = vmatmul.mubr.msk.bf16.vlgmr.msra.gmra.mxu1 %vm621_vm1, %v4875_v55  ;;  %v720_v63 = vsel %vm621_vm1, %v4884_v60, 0 }
 0x16a   :  { %3990 = vmatpush3.bf16.xpose.msra.mxu1 %v673_v57  ;;  %3991 = vmatprep.mubr.msk.bf16.mxu1 %vm4740_vm0, %v4739_v40 }
 0x16b   :  { %3995 = vmatprep.subr.bf16.mxu1 %v4739_v40 }
 0x171   :  { %3992 = vmatmul.mubr.msk.bf16.vlgmr.msra.gmra.mxu1 %vm621_vm1, %v4886_v61 }
 0x172   :  { %3996 = vmatpush3.bf16.xpose.msra.mxu1 %v720_v63  ;;  %3997 = vmatprep.mubr.msk.bf16.mxu1 %vm4740_vm0, %v4739_v40 }
 0x173   :  { %4001 = vmatprep.subr.bf16.mxu1 %v4739_v40 }
 0x179   :  { %3998 = vmatmul.mubr.msk.bf16.vlgmr.msra.gmra.mxu1 %vm621_vm1, %v4897_v2 }
 0x17a   :  { %4002 = vmatpush3.bf16.xpose.msra.mxu1 %v767_v3  ;;  %4003 = vmatprep.mubr.msk.bf16.mxu1 %vm4740_vm0, %v4739_v40  ;;  %v4942_v3 = vld [vmem:[#allocation8 + $0x38] sm:$0xff] }
 0x17b   :  { %4013 = vmatprep.subr.bf16.mxu1 %v4739_v40 }
 0x181   :  { %4004 = vmatmul.mubr.msk.bf16.vlgmr.msra.gmra.mxu1 %vm621_vm1, %v4906_v4 }
 0x182   :  { %4015 = vmatprep.mubr.msk.bf16.mxu1 %vm4740_vm0, %v4739_v40 }
 0x229   :  { %v662_v26 = vpop.f32.mrf.mxu1 }
 0x22a   :  { %v663_v27 = vadd.f32 %v662_v26, %v4915_v25 }
 0x22b   :  { %v3987_v28 = vpop.f32.mrf.mxu1 }
 0x22c   :  { %v811_v30 = vsel %vm810_vm2, %v663_v27, -inf }
 0x22d   :  { %812 = vmax.xlane.f32.xlu0 %v811_v30  ;;  %v665_v31 = vpop.f32.mrf.mxu1 }
 0x22e   :  { %v666_v32 = vadd.f32 %v665_v31, %v4918_v29 }
 0x22f   :  { %v3988_v33 = vpop.f32.mrf.mxu1 }
 0x230   :  { %v814_v35 = vsel %vm810_vm2, %v666_v32, -inf }
 0x231   :  { %815 = vmax.xlane.f32.xlu0 %v814_v35  ;;  %v709_v36 = vpop.f32.mrf.mxu1 }
 0x232   :  { %v710_v37 = vadd.f32 %v709_v36, %v4922_v34 }
 0x233   :  { %v3993_v38 = vpop.f32.mrf.mxu1 }
 0x234   :  { %v817_v41 = vsel %vm810_vm2, %v710_v37, -inf }
 0x235   :  { %818 = vmax.xlane.f32.xlu1 %v817_v41  ;;  %v712_v42 = vpop.f32.mrf.mxu1 }
 0x236   :  { %v713_v43 = vadd.f32 %v712_v42, %v4926_v39 }
 0x237   :  { %v3994_v44 = vpop.f32.mrf.mxu1 }
 0x238   :  { %v820_v46 = vsel %vm810_vm2, %v713_v43, -inf }
 0x239   :  { %821 = vmax.xlane.f32.xlu1 %v820_v46  ;;  %v756_v48 = vpop.f32.mrf.mxu1 }
 0x23a   :  { %v757_v49 = vadd.f32 %v756_v48, %v4930_v45 }
 0x23b   :  { %v3999_v50 = vpop.f32.mrf.mxu1 }
 0x23c   :  { %v823_v52 = vsel %vm810_vm2, %v757_v49, -inf  ;;  %v3977_v50 = vpop.f32.mrf.mxu0 }
 0x23d   :  { %824 = vmax.xlane.f32.xlu0 %v823_v52  ;;  %v759_v54 = vpop.f32.mrf.mxu1 }
 0x23e   :  { %v760_v56 = vadd.f32 %v759_v54, %v4934_v51  ;;  %v578_v54 = vpop.f32.mrf.mxu0 }
 0x23f   :  { %v4000_v57 = vpop.f32.mrf.mxu1 }
 0x240   :  { %v826_v59 = vsel %vm810_vm2, %v760_v56, -inf  ;;  %v3978_v57 = vpop.f32.mrf.mxu0 }
 0x241   :  { %827 = vmax.xlane.f32.xlu1 %v826_v59  ;;  %v803_v62 = vpop.f32.mrf.mxu1 }
 0x242   :  { %v804_v63 = vadd.f32 %v803_v62, %v4938_v58  ;;  %v581_v59 = vpop.f32.mrf.mxu0 }
 0x243   :  { %v4005_v0 = vpop.f32.mrf.mxu1  ;;  %v4978_v62 = vpack.c.bf16 %v581_v59, %v578_v54 }
 0x244   :  { %v829_v5 = vsel %vm810_vm2, %v804_v63, -inf }
 0x245   :  { %830 = vmax.xlane.f32.xlu0 %v829_v5  ;;  %v806_v6 = vpop.f32.mrf.mxu1  ;;  %4008 = vmatpush3.bf16.msra.mxu0 %v4978_v62 }
 0x246   :  { %v4946_v7 = vadd.f32 %v806_v6, %v4942_v3  ;;  %4019 = vmatprep.subr.bf16.mxu0 %v4739_v40 }
 0x247   :  { %v4006_v8 = vpop.f32.mrf.mxu1 }
 0x248   :  { %v832_v9 = vsel %vm810_vm2, %v4946_v7, -inf }
 0x249   :  { %833 = vmax.xlane.f32.xlu1 %v832_v9 }
 0x2b6   :  { %v813_v10 = vpop.xlane.xlu0 %812 }
 0x2b7   :  { %v835_v11 = vsub.f32 %v663_v27, %v813_v10 }
 0x2b9   :  { %v843_v12 = vmul.f32 1.442695, %v835_v11  ;;  %v3981_v11 = vpop.f32.mrf.mxu0 }
 0x2ba   :  { %v816_v13 = vpop.xlane.xlu0 %815 }
 0x2bb   :  { %4315 = vpow2.f32 %v843_v12  ;;  %v836_v14 = vsub.f32 %v666_v32, %v816_v13  ;;  %v594_v13 = vpop.f32.mrf.mxu0 }
 0x2bd   :  { %v845_v15 = vmul.f32 1.442695, %v836_v14 }
 0x2be   :  { %v819_v16 = vpop.xlane.xlu1 %818 }
 0x2bf   :  { %4317 = vpow2.f32 %v845_v15  ;;  %v837_v17 = vsub.f32 %v710_v37, %v819_v16  ;;  %v3982_v15 = vpop.f32.mrf.mxu0 }
 0x2c1   :  { %v847_v18 = vmul.f32 1.442695, %v837_v17 }
 0x2c2   :  { %v822_v19 = vpop.xlane.xlu1 %821 }
 0x2c3   :  { %4319 = vpow2.f32 %v847_v18  ;;  %v838_v20 = vsub.f32 %v713_v43, %v822_v19  ;;  %v597_v18 = vpop.f32.mrf.mxu0 }
 0x2c5   :  { %v849_v21 = vmul.f32 1.442695, %v838_v20 }
 0x2c6   :  { %v825_v22 = vpop.xlane.xlu0 %824 }
 0x2c7   :  { %4321 = vpow2.f32 %v849_v21  ;;  %v839_v23 = vsub.f32 %v757_v49, %v825_v22 }
 0x2c8   :  { %v4950_v24 = vpop.eup %4315 }
 0x2c9   :  { %v851_v26 = vmul.f32 1.442695, %v839_v23  ;;  %v859_v27 = vsel %vm810_vm2, %v4950_v24, 0.0  ;;  %v5009_v23 = vpack.c.bf16 %v597_v18, %v594_v13 }
 0x2ca   :  { %v828_v28 = vpop.xlane.xlu1 %827  ;;  %860 = vadd.xlane.f32.xlu0 %v859_v27 }
 0x2cb   :  { %4323 = vpow2.f32 %v851_v26  ;;  %v840_v30 = vsub.f32 %v760_v56, %v828_v28 }
 0x2cc   :  { %v4954_v31 = vpop.eup %4317 }
 0x2cd   :  { %v853_v32 = vmul.f32 1.442695, %v840_v30  ;;  %v862_v33 = vsel %vm810_vm2, %v4954_v31, 0.0 }
 0x2ce   :  { %v831_v35 = vpop.xlane.xlu0 %830  ;;  %863 = vadd.xlane.f32.xlu1 %v862_v33 }
 0x2cf   :  { %4325 = vpow2.f32 %v853_v32  ;;  %v841_v36 = vsub.f32 %v804_v63, %v831_v35  ;;  %v4980_v63 = vpack.c.bf16 %v3978_v57, %v3977_v50 }
 0x2d0   :  { %v4958_v37 = vpop.eup %4319 }
 0x2d1   :  { %v855_v38 = vmul.f32 1.442695, %v841_v36  ;;  %v865_v41 = vsel %vm810_vm2, %v4958_v37, 0.0  ;;  %4014 = vmatpush3.bf16.msra.mxu1 %v4980_v63 }
 0x2d2   :  { %866 = vadd.xlane.f32.xlu0 %v865_v41  ;;  %4025 = vmatprep.subr.bf16.mxu1 %v4739_v40  ;;  %v834_v0 = vpop.xlane.xlu1 %833 }
 0x2d3   :  { %4327 = vpow2.f32 %v855_v38  ;;  %v842_v5 = vsub.f32 %v4946_v7, %v834_v0 }
 0x2d4   :  { %v4962_v42 = vpop.eup %4321 }
 0x2d5   :  { %v868_v43 = vsel %vm810_vm2, %v4962_v42, 0.0  ;;  %v857_v6 = vmul.f32 1.442695, %v842_v5 }
 0x2d6   :  { %869 = vadd.xlane.f32.xlu1 %v868_v43 }
 0x2d7   :  { %4329 = vpow2.f32 %v857_v6 }
 0x2d8   :  { %v4966_v44 = vpop.eup %4323 }
 0x2d9   :  { %v871_v46 = vsel %vm810_vm2, %v4966_v44, 0.0 }
 0x2da   :  { %872 = vadd.xlane.f32.xlu0 %v871_v46 }
 0x2dc   :  { %v4970_v48 = vpop.eup %4325 }
 0x2dd   :  { %v874_v49 = vsel %vm810_vm2, %v4970_v48, 0.0 }
 0x2de   :  { %875 = vadd.xlane.f32.xlu1 %v874_v49 }
 0x2e0   :  { %v4974_v52 = vpop.eup %4327 }
 0x2e1   :  { %v877_v56 = vsel %vm810_vm2, %v4974_v52, 0.0 }
 0x2e2   :  { %878 = vadd.xlane.f32.xlu0 %v877_v56 }
 0x2e4   :  { %v4997_v8 = vpop.eup %4329 }
 0x2e5   :  { %v880_v9 = vsel %vm810_vm2, %v4997_v8, 0.0 }
 0x2ef   :  { %1144 = vrot.lane.b32.xlu1 %v4873_v53, %s4741_s8 }
 0x2f3   :  { %1088 = vrot.lane.b32.xlu1 %v4875_v55, %s4741_s8 }
 0x2f8   :  { %1091 = vrot.lane.b32.xlu0 %v4868_v47, %s4741_s8 }
 0x2fc   :  { %1141 = vrot.lane.b32.xlu0 %v4886_v61, %s4741_s8 }
 0x300   :  { %1194 = vrot.lane.b32.xlu0 %v4897_v2, %s4741_s8 }
 0x317   :  { %881 = vadd.xlane.f32.xlu1 %v880_v9 }
 0x328   :  { %1197 = vrot.lane.b32.xlu1 %v4884_v60, %s4741_s8 }
 0x32c   :  { %1250 = vrot.lane.b32.xlu1 %v4895_v1, %s4741_s8 }
 0x330   :  { %1247 = vrot.lane.b32.xlu1 %v4906_v4, %s4741_s8 }
 0x353   :  { %v861_v7 = vpop.xlane.xlu0 %860 }
 0x354   :  { %4331 = vrcp.f32 %v861_v7 }
 0x357   :  { %v864_v10 = vpop.xlane.xlu1 %863 }
 0x358   :  { %4333 = vrcp.f32 %v864_v10 }
 0x35b   :  { %v867_v12 = vpop.xlane.xlu0 %866 }
 0x35c   :  { %4335 = vrcp.f32 %v867_v12 }
 0x35f   :  { %v870_v14 = vpop.xlane.xlu1 %869 }
 0x360   :  { %4337 = vrcp.f32 %v870_v14 }
 0x361   :  { %v4332_v16 = vpop.eup %4331 }
 0x362   :  { %v891_v20 = vmul.f32 %v4332_v16, %v4950_v24 }
 0x363   :  { %v873_v17 = vpop.xlane.xlu0 %872 }
 0x364   :  { %4339 = vrcp.f32 %v873_v17 }
 0x365   :  { %v4334_v19 = vpop.eup %4333 }
 0x366   :  { %v892_v21 = vmul.f32 %v4334_v19, %v4954_v31  ;;  %v5018_v31 = vpack.c.bf16 %v3982_v15, %v3981_v11 }
 0x367   :  { %v876_v22 = vpop.xlane.xlu1 %875 }
 0x368   :  { %4341 = vrcp.f32 %v876_v22  ;;  %v899_v26 = vpack.c.bf16 %v892_v21, %v891_v20 }
 0x369   :  { %v4336_v27 = vpop.eup %4335 }
 0x36a   :  { %4010 = vmatmul.mubr.msk.bf16.vlgmr.msra.gmra.mxu0 %vm810_vm2, %v899_v26  ;;  %v893_v24 = vmul.f32 %v4336_v27, %v4958_v37 }
 0x36b   :  { %4020 = vmatpush3.bf16.msra.mxu0 %v5009_v23  ;;  %4021 = vmatprep.mubr.msk.bf16.mxu0 %vm4740_vm0, %v4739_v40  ;;  %v879_v33 = vpop.xlane.xlu0 %878  ;;  %v1145_v46 = vpop.permute.xlu1 %1144 }
 0x36c   :  { %4031 = vmatprep.subr.bf16.mxu0 %v4739_v40  ;;  %4343 = vrcp.f32 %v879_v33  ;;  %v1150_v9 = vsel %vm621_vm1, %v1145_v46, 0 }
 0x36d   :  { %v4338_v28 = vpop.eup %4337 }
 0x36e   :  { %v894_v30 = vmul.f32 %v4338_v28, %v4962_v42 }
 0x36f   :  { %v1092_v41 = vpop.permute.xlu0 %1091  ;;  %v1089_v49 = vpop.permute.xlu1 %1088 }
 0x370   :  { %v900_v32 = vpack.c.bf16 %v894_v30, %v893_v24  ;;  %v1097_v43 = vsel %vm621_vm1, %v1092_v41, 0 }
 0x371   :  { %v4340_v35 = vpop.eup %4339 }
 0x372   :  { %4016 = vmatmul.mubr.msk.bf16.vlgmr.msra.gmra.mxu1 %vm810_vm2, %v900_v32  ;;  %v895_v38 = vmul.f32 %v4340_v35, %v4966_v44 }
 0x373   :  { %4026 = vmatpush3.bf16.msra.mxu1 %v5018_v31  ;;  %4027 = vmatprep.mubr.msk.bf16.mxu1 %vm4740_vm0, %v4739_v40  ;;  %v1142_v54 = vpop.permute.xlu0 %1141 }
 0x374   :  { %4037 = vmatprep.subr.bf16.mxu1 %v4739_v40 }
 0x375   :  { %v4342_v36 = vpop.eup %4341 }
 0x376   :  { %v896_v37 = vmul.f32 %v4342_v36, %v4970_v48 }
 0x377   :  { %v1195_v57 = vpop.permute.xlu0 %1194 }
 0x378   :  { %v901_v42 = vpack.c.bf16 %v896_v37, %v895_v38 }
 0x379   :  { %v4344_v56 = vpop.eup %4343 }
 0x37a   :  { %4022 = vmatmul.mubr.msk.bf16.vlgmr.msra.gmra.mxu0 %vm810_vm2, %v901_v42  ;;  %v897_v0 = vmul.f32 %v4344_v56, %v4974_v52 }
 0x37b   :  { %4032 = vmatpush3.bf16.xpose.msra.mxu0 %v1097_v43  ;;  %4033 = vmatprep.mubr.msk.bf16.mxu0 %vm4740_vm0, %v4739_v40 }
 0x37c   :  { %4043 = vmatprep.subr.bf16.mxu0 %v4739_v40 }
 0x382   :  { %4034 = vmatmul.mubr.msk.bf16.vlgmr.msra.gmra.mxu0 %vm621_vm1, %v1089_v49 }
 0x383   :  { %4045 = vmatprep.mubr.msk.bf16.mxu0 %vm4740_vm0, %v4739_v40 }
 0x3a0   :  { %v882_v44 = vpop.xlane.xlu1 %881 }
 0x3a1   :  { %4345 = vrcp.f32 %v882_v44 }
 0x3a4   :  { %v1198_v48 = vpop.permute.xlu1 %1197 }
 0x3a5   :  { %v1203_v50 = vsel %vm621_vm1, %v1198_v48, 0 }
 0x3a6   :  { %4044 = vmatpush3.bf16.xpose.msra.mxu0 %v1203_v50 }
 0x3a7   :  { %4055 = vmatprep.subr.bf16.mxu0 %v4739_v40 }
 0x3a8   :  { %v1251_v7 = vpop.permute.xlu1 %1250 }
 0x3a9   :  { %v1256_v10 = vsel %vm621_vm1, %v1251_v7, 0 }
 0x3ac   :  { %v1248_v52 = vpop.permute.xlu1 %1247 }
 0x3ad   :  { %4046 = vmatmul.mubr.msk.bf16.vlgmr.msra.gmra.mxu0 %vm621_vm1, %v1195_v57 }
 0x3ae   :  { %v4346_v59 = vpop.eup %4345  ;;  %4057 = vmatprep.mubr.msk.bf16.mxu0 %vm4740_vm0, %v4739_v40 }
 0x3af   :  { %v898_v5 = vmul.f32 %v4346_v59, %v4997_v8 }
 0x3b1   :  { %v902_v6 = vpack.c.bf16 %v898_v5, %v897_v0 }
 0x3b3   :  { %4028 = vmatmul.mubr.msk.bf16.vlgmr.msra.gmra.mxu1 %vm810_vm2, %v902_v6 }
 0x3b4   :  { %4038 = vmatpush3.bf16.xpose.msra.mxu1 %v1150_v9  ;;  %4039 = vmatprep.mubr.msk.bf16.mxu1 %vm4740_vm0, %v4739_v40 }
 0x3b5   :  { %4049 = vmatprep.subr.bf16.mxu1 %v4739_v40 }
 0x3bb   :  { %4040 = vmatmul.mubr.msk.bf16.vlgmr.msra.gmra.mxu1 %vm621_vm1, %v1142_v54 }
 0x3bc   :  { %4050 = vmatpush3.bf16.xpose.msra.mxu1 %v1256_v10  ;;  %4051 = vmatprep.mubr.msk.bf16.mxu1 %vm4740_vm0, %v4739_v40 }
 0x3bd   :  { %4061 = vmatprep.subr.bf16.mxu1 %v4739_v40 }
 0x3c3   :  { %4052 = vmatmul.mubr.msk.bf16.vlgmr.msra.gmra.mxu1 %vm621_vm1, %v1248_v52 }
 0x3c4   :  { %4063 = vmatprep.mubr.msk.bf16.mxu1 %vm4740_vm0, %v4739_v40 }
 0x42a   :  { %v5055_v8 = vpop.f32.mrf.mxu0 }
 0x42c   :  { %v4011_v11 = vpop.f32.mrf.mxu0 }
 0x42e   :  { %v5057_v12 = vpop.f32.mrf.mxu0 }
 0x42f   :  { %v1079_v13 = vpack.c.bf16 %v5057_v12, %v5055_v8 }
 0x430   :  { %v4012_v14 = vpop.f32.mrf.mxu0 }
 0x432   :  { %v5061_v15 = vpop.f32.mrf.mxu1 }
 0x434   :  { %v4017_v16 = vpop.f32.mrf.mxu1 }
 0x436   :  { %v5063_v17 = vpop.f32.mrf.mxu1 }
 0x437   :  { %v1080_v18 = vpack.c.bf16 %v5063_v17, %v5061_v15 }
 0x438   :  { %v4018_v19 = vpop.f32.mrf.mxu1 }
 0x43a   :  { %v5067_v20 = vpop.f32.mrf.mxu0 }
 0x43c   :  { %v4023_v21 = vpop.f32.mrf.mxu0 }
 0x43e   :  { %v5069_v22 = vpop.f32.mrf.mxu0 }
 0x43f   :  { %v1081_v26 = vpack.c.bf16 %v5069_v22, %v5067_v20 }
 0x440   :  { %v4024_v27 = vpop.f32.mrf.mxu0 }
 0x442   :  { %v1133_v28 = vpop.f32.mrf.mxu0 }
 0x443   :  { %v1134_v24 = vadd.f32 %v1133_v28, %v4915_v25 }
 0x444   :  { %v4035_v30 = vpop.f32.mrf.mxu0 }
 0x445   :  { %v1299_v32 = vsel %vm810_vm2, %v1134_v24, -inf }
 0x446   :  { %1300 = vmax.xlane.f32.xlu0 %v1299_v32  ;;  %v1136_v33 = vpop.f32.mrf.mxu0 }
 0x447   :  { %v1137_v35 = vadd.f32 %v1136_v33, %v4918_v29 }
 0x448   :  { %v4036_v36 = vpop.f32.mrf.mxu0 }
 0x449   :  { %v1302_v38 = vsel %vm810_vm2, %v1137_v35, -inf }
 0x44a   :  { %1303 = vmax.xlane.f32.xlu1 %v1302_v38 }
 0x46d   :  { %v1239_v37 = vpop.f32.mrf.mxu0 }
 0x46e   :  { %v1240_v10 = vadd.f32 %v1239_v37, %v4930_v45 }
 0x46f   :  { %v4047_v41 = vpop.f32.mrf.mxu0 }
 0x470   :  { %v1311_v19 = vsel %vm810_vm2, %v1240_v10, -inf }
 0x471   :  { %v1242_v42 = vpop.f32.mrf.mxu0 }
 0x472   :  { %v1243_v43 = vadd.f32 %v1242_v42, %v4934_v51 }
 0x473   :  { %v5078_v46 = vpop.f32.mrf.mxu1  ;;  %v4048_v49 = vpop.f32.mrf.mxu0 }
 0x474   :  { %v1314_v44 = vsel %vm810_vm2, %v1243_v43, -inf }
 0x475   :  { %v4029_v48 = vpop.f32.mrf.mxu1  ;;  %1315 = vmax.xlane.f32.xlu1 %v1314_v44 }
 0x477   :  { %v5081_v50 = vpop.f32.mrf.mxu1 }
 0x478   :  { %v1082_v54 = vpack.c.bf16 %v5081_v50, %v5078_v46 }
 0x479   :  { %v4030_v56 = vpop.f32.mrf.mxu1 }
 0x47b   :  { %v1186_v57 = vpop.f32.mrf.mxu1 }
 0x47c   :  { %v1187_v59 = vadd.f32 %v1186_v57, %v4922_v34 }
 0x47d   :  { %v4041_v0 = vpop.f32.mrf.mxu1 }
 0x47e   :  { %v1305_v5 = vsel %vm810_vm2, %v1187_v59, -inf }
 0x47f   :  { %v1189_v6 = vpop.f32.mrf.mxu1  ;;  %1306 = vmax.xlane.f32.xlu0 %v1305_v5 }
 0x480   :  { %v1190_v9 = vadd.f32 %v1189_v6, %v4926_v39 }
 0x481   :  { %v4042_v7 = vpop.f32.mrf.mxu1 }
 0x482   :  { %v1308_v52 = vsel %vm810_vm2, %v1190_v9, -inf }
 0x483   :  { %v1292_v11 = vpop.f32.mrf.mxu1  ;;  %1309 = vmax.xlane.f32.xlu0 %v1308_v52 }
 0x484   :  { %v1293_v16 = vadd.f32 %v1292_v11, %v4938_v58 }
 0x485   :  { %v4053_v14 = vpop.f32.mrf.mxu1 }
 0x486   :  { %v1317_v30 = vsel %vm810_vm2, %v1293_v16, -inf }
 0x487   :  { %v1295_v21 = vpop.f32.mrf.mxu1  ;;  %1312 = vmax.xlane.f32.xlu0 %v1311_v19 }
 0x488   :  { %v1296_v27 = vadd.f32 %v1295_v21, %v4942_v3 }
 0x489   :  { %v4054_v28 = vpop.f32.mrf.mxu1 }
 0x48a   :  { %v1320_v32 = vsel %vm810_vm2, %v1296_v27, -inf }
 0x48b   :  { %1318 = vmax.xlane.f32.xlu0 %v1317_v30  ;;  %1321 = vmax.xlane.f32.xlu1 %v1320_v32 }
 0x4cf   :  { %v1301_v33 = vpop.xlane.xlu0 %1300 }
 0x4d0   :  { %v1323_v36 = vsub.f32 %v1134_v24, %v1301_v33 }
 0x4d2   :  { %v1331_v38 = vmul.f32 1.442695, %v1323_v36 }
 0x4d3   :  { %v1304_v37 = vpop.xlane.xlu1 %1303 }
 0x4d4   :  { %4347 = vpow2.f32 %v1331_v38  ;;  %v1324_v41 = vsub.f32 %v1137_v35, %v1304_v37 }
 0x4d6   :  { %v1333_v42 = vmul.f32 1.442695, %v1324_v41 }
 0x4d8   :  { %4349 = vpow2.f32 %v1333_v42 }
 0x4e1   :  { %v5095_v49 = vpop.eup %4347 }
 0x4e2   :  { %v1347_v44 = vsel %vm810_vm2, %v5095_v49, 0.0 }
 0x4e3   :  { %1348 = vadd.xlane.f32.xlu0 %v1347_v44 }
 0x4e5   :  { %v5099_v48 = vpop.eup %4349 }
 0x4e6   :  { %v1350_v56 = vsel %vm810_vm2, %v5099_v48, 0.0 }
 0x4e7   :  { %1351 = vadd.xlane.f32.xlu1 %v1350_v56 }
 0x4fe   :  { %v1316_v57 = vpop.xlane.xlu1 %1315 }
 0x4ff   :  { %v1328_v5 = vsub.f32 %v1243_v43, %v1316_v57 }
 0x501   :  { %v1341_v52 = vmul.f32 1.442695, %v1328_v5 }
 0x508   :  { %v1307_v24 = vpop.xlane.xlu0 %1306 }
 0x509   :  { %v1325_v0 = vsub.f32 %v1187_v59, %v1307_v24 }
 0x50b   :  { %v1335_v6 = vmul.f32 1.442695, %v1325_v0 }
 0x50c   :  { %v1310_v35 = vpop.xlane.xlu0 %1309 }
 0x50d   :  { %4351 = vpow2.f32 %v1335_v6  ;;  %v1326_v7 = vsub.f32 %v1190_v9, %v1310_v35 }
 0x50f   :  { %v1337_v11 = vmul.f32 1.442695, %v1326_v7 }
 0x510   :  { %v1313_v14 = vpop.xlane.xlu0 %1312 }
 0x511   :  { %4353 = vpow2.f32 %v1337_v11  ;;  %v1327_v19 = vsub.f32 %v1240_v10, %v1313_v14 }
 0x512   :  { %4355 = vpow2.f32 %v1341_v52 }
 0x513   :  { %v1339_v21 = vmul.f32 1.442695, %v1327_v19 }
 0x514   :  { %v1319_v28 = vpop.xlane.xlu0 %1318  ;;  %v1322_v42 = vpop.xlane.xlu1 %1321 }
 0x515   :  { %4357 = vpow2.f32 %v1339_v21  ;;  %v1329_v30 = vsub.f32 %v1293_v16, %v1319_v28  ;;  %v1330_v44 = vsub.f32 %v1296_v27, %v1322_v42 }
 0x517   :  { %v1343_v32 = vmul.f32 1.442695, %v1329_v30  ;;  %v1345_v56 = vmul.f32 1.442695, %v1330_v44 }
 0x519   :  { %4359 = vpow2.f32 %v1343_v32 }
 0x51a   :  { %v4352_v33 = vpop.eup %4351  ;;  %4361 = vpow2.f32 %v1345_v56 }
 0x51b   :  { %v1353_v59 = vsel %vm810_vm2, %v4352_v33, 0.0 }
 0x51c   :  { %1354 = vadd.xlane.f32.xlu0 %v1353_v59 }
 0x51e   :  { %v4354_v43 = vpop.eup %4353 }
 0x51f   :  { %v1356_v36 = vsel %vm810_vm2, %v4354_v43, 0.0  ;;  %v5105_v9 = vpop.eup %4355 }
 0x520   :  { %1357 = vadd.xlane.f32.xlu1 %v1356_v36  ;;  %v1362_v16 = vsel %vm810_vm2, %v5105_v9, 0.0 }
 0x522   :  { %v5107_v38 = vpop.eup %4357 }
 0x523   :  { %v1359_v10 = vsel %vm810_vm2, %v5107_v38, 0.0 }
 0x524   :  { %1360 = vadd.xlane.f32.xlu0 %v1359_v10  ;;  %1363 = vadd.xlane.f32.xlu1 %v1362_v16 }
 0x526   :  { %v5113_v37 = vpop.eup %4359 }
 0x527   :  { %v1365_v41 = vsel %vm810_vm2, %v5113_v37, 0.0  ;;  %v4362_v57 = vpop.eup %4361 }
 0x528   :  { %1366 = vadd.xlane.f32.xlu0 %v1365_v41  ;;  %v1368_v24 = vsel %vm810_vm2, %v4362_v57, 0.0 }
 0x535   :  { %1440 = vrot.lane.b32.xlu1 %v4980_v63, %s4741_s8 }
 0x539   :  { %1488 = vrot.lane.b32.xlu1 %v5009_v23, %s4741_s8 }
 0x53e   :  { %1392 = vrot.lane.b32.xlu0 %v4978_v62, %s4741_s8 }
 0x542   :  { %1772 = vrot.lane.b32.xlu0 %v4868_v47, %s4731_s14 }
 0x546   :  { %1770 = vrot.lane.b32.xlu0 %v4875_v55, %s4731_s14 }
 0x54a   :  { %1821 = vrot.lane.b32.xlu0 %v4886_v61, %s4731_s14 }
 0x54e   :  { %1872 = vrot.lane.b32.xlu0 %v4897_v2, %s4731_s14 }
 0x55d   :  { %1369 = vadd.xlane.f32.xlu1 %v1368_v24  ;;  %v4267_v24 = vld [vmem:[#allocation14 + $0x8] sm:$0xff]  }
 0x56c   :  { %v1349_v0 = vpop.xlane.xlu0 %1348 }
 0x56e   :  { %1536 = vrot.lane.b32.xlu1 %v5018_v31, %s4741_s8 }
 0x570   :  { %v1352_v27 = vpop.xlane.xlu1 %1351 }
 0x571   :  { %4363 = vrcp.f32 %v1352_v27 }
 0x572   :  { %1823 = vrot.lane.b32.xlu1 %v4873_v53, %s4731_s14  ;;  %4365 = vrcp.f32 %v1349_v0 }
 0x576   :  { %1874 = vrot.lane.b32.xlu1 %v4884_v60, %s4731_s14 }
 0x57a   :  { %1925 = vrot.lane.b32.xlu1 %v4895_v1, %s4731_s14 }
 0x57e   :  { %1923 = vrot.lane.b32.xlu1 %v4906_v4, %s4731_s14  ;;  %v4364_v52 = vpop.eup %4363 }
 0x57f   :  { %v4366_v19 = vpop.eup %4365  ;;  %v1380_v21 = vmul.f32 %v4364_v52, %v5099_v48  ;;  %v4270_v52 = vld [vmem:[#allocation14 + $0x10] sm:$0xff]  }
 0x580   :  { %v1379_v32 = vmul.f32 %v4366_v19, %v5095_v49 }
 0x582   :  { %v1387_v36 = vpack.c.bf16 %v1380_v21, %v1379_v32 }
 0x5a5   :  { %v1355_v5 = vpop.xlane.xlu0 %1354 }
 0x5a6   :  { %4367 = vrcp.f32 %v1355_v5 }
 0x5a9   :  { %v1358_v6 = vpop.xlane.xlu1 %1357 }
 0x5aa   :  { %4369 = vrcp.f32 %v1358_v6 }
 0x5ad   :  { %v1361_v35 = vpop.xlane.xlu0 %1360  ;;  %v1364_v7 = vpop.xlane.xlu1 %1363 }
 0x5ae   :  { %4371 = vrcp.f32 %v1361_v35 }
 0x5af   :  { %4373 = vrcp.f32 %v1364_v7  ;;  %v4269_v7 = vld [vmem:[#allocation14 + $0x18] sm:$0xff]  }
 0x5b1   :  { %v1367_v11 = vpop.xlane.xlu0 %1366  ;;  %v1441_v14 = vpop.permute.xlu1 %1440 }
 0x5b2   :  { %4062 = vmatpush3.bf16.msra.mxu1 %v1441_v14  ;;  %4375 = vrcp.f32 %v1367_v11 }
 0x5b3   :  { %4073 = vmatprep.subr.bf16.mxu1 %v4739_v40  ;;  %v4368_v28 = vpop.eup %4367 }
 0x5b4   :  { %v1381_v10 = vmul.f32 %v4368_v28, %v4352_v33 }
 0x5b5   :  { %v1393_v30 = vpop.permute.xlu0 %1392  ;;  %v1489_v41 = vpop.permute.xlu1 %1488 }
 0x5b6   :  { %4056 = vmatpush3.bf16.msra.mxu0 %v1393_v30 }
 0x5b7   :  { %v4370_v59 = vpop.eup %4369  ;;  %4067 = vmatprep.subr.bf16.mxu0 %v4739_v40 }
 0x5b8   :  { %v1382_v16 = vmul.f32 %v4370_v59, %v4354_v43 }
 0x5b9   :  { %4058 = vmatmul.mubr.msk.bf16.vlgmr.msra.gmra.mxu0 %vm810_vm2, %v1387_v36  ;;  %v1773_v8 = vpop.permute.xlu0 %1772 }
 0x5ba   :  { %4068 = vmatpush3.bf16.msra.mxu0 %v1489_v41  ;;  %v1388_v42 = vpack.c.bf16 %v1382_v16, %v1381_v10  ;;  %4069 = vmatprep.mubr.msk.bf16.mxu0 %vm4740_vm0, %v4739_v40  ;;  %v1778_v32 = vsel %vm621_vm1, %v1773_v8, 0 }
 0x5bb   :  { %v4372_v48 = vpop.eup %4371  ;;  %4079 = vmatprep.subr.bf16.mxu0 %v4269_v7 }
 0x5bc   :  { %v4374_v44 = vpop.eup %4373  ;;  %4064 = vmatmul.mubr.msk.bf16.vlgmr.msra.gmra.mxu1 %vm810_vm2, %v1388_v42  ;;  %v1383_v49 = vmul.f32 %v4372_v48, %v5107_v38 }
 0x5bd   :  { %v1384_v56 = vmul.f32 %v4374_v44, %v5105_v9  ;;  %4075 = vmatprep.mubr.msk.bf16.mxu1 %vm4740_vm0, %v4739_v40  ;;  %v4268_v9 = vld [vmem:[#allocation14] sm:$0xff]  }
 0x5bf   :  { %v1389_v33 = vpack.c.bf16 %v1384_v56, %v1383_v49  ;;  %v4376_v0 = vpop.eup %4375 }
 0x5c0   :  { %v1385_v6 = vmul.f32 %v4376_v0, %v5113_v37 }
 0x5c1   :  { %4070 = vmatmul.mubr.msk.bf16.vlgmr.msra.gmra.mxu0 %vm810_vm2, %v1389_v33 }
 0x5c2   :  { %4080 = vmatpush3.bf16.msra.mxu0 %v4269_v7 }
 0x5c3   :  { %4081 = vmatprep.subr.bf16.mxu0 %v4270_v52 }
 0x5c6   :  { %4082 = vmatpush3.bf16.msra.mxu0 %v4270_v52 }
 0x5c7   :  { %4103 = vmatprep.subr.bf16.mxu0 %v4739_v40 }
 0x5e6   :  { %v1370_v43 = vpop.xlane.xlu1 %1369 }
 0x5e7   :  { %4377 = vrcp.f32 %v1370_v43 }
 0x5ea   :  { %v1537_v27 = vpop.permute.xlu1 %1536 }
 0x5eb   :  { %4074 = vmatpush3.bf16.msra.mxu1 %v1537_v27 }
 0x5ec   :  { %4091 = vmatprep.subr.bf16.mxu1 %v4267_v24 }
 0x5ee   :  { %v1824_v11 = vpop.permute.xlu1 %1823 }
 0x5ef   :  { %v1829_v37 = vsel %vm621_vm1, %v1824_v11, 0 }
 0x5f2   :  { %v1875_v12 = vpop.permute.xlu1 %1874 }
 0x5f3   :  { %v1880_v27 = vsel %vm621_vm1, %v1875_v12, 0 }
 0x5f4   :  { %v4378_v5 = vpop.eup %4377 }
 0x5f5   :  { %v1386_v38 = vmul.f32 %v4378_v5, %v4362_v57 }
 0x5f6   :  { %v1926_v15 = vpop.permute.xlu1 %1925 }
 0x5f7   :  { %v1390_v35 = vpack.c.bf16 %v1386_v38, %v1385_v6 }
 0x5f9   :  { %4076 = vmatmul.mubr.msk.bf16.vlgmr.msra.gmra.mxu1 %vm810_vm2, %v1390_v35 }
 0x5fa   :  { %4092 = vmatpush3.bf16.msra.mxu1 %v4267_v24  ;;  %4095 = vmatprep.mubr.msk.bf16.mxu1 %vm621_vm1, %v1079_v13  ;;  %v1771_v13 = vpop.permute.xlu0 %1770  ;;  %v1924_v20 = vpop.permute.xlu1 %1923 }
 0x5fb   :  { %4093 = vmatprep.subr.bf16.mxu1 %v4268_v9 }
 0x5fe   :  { %4094 = vmatpush3.bf16.msra.mxu1 %v4268_v9  ;;  %v1822_v17 = vpop.permute.xlu0 %1821 }
 0x5ff   :  { %4109 = vmatprep.subr.bf16.mxu1 %v4739_v40 }
 0x601   :  { %4096 = vmatmul.mubr.msk.bf16.vlgmr.msra.gmra.mxu1 %vm621_vm1, %v1080_v18  ;;  %v1931_v18 = vsel %vm621_vm1, %v1926_v15, 0 }
 0x602   :  { %4110 = vmatpush3.bf16.xpose.msra.mxu1 %v1829_v37  ;;  %4099 = vmatprep.mubr.msk.bf16.mxu1 %vm621_vm1, %v1081_v26  ;;  %v1873_v38 = vpop.permute.xlu0 %1872 }
 0x603   :  { %4121 = vmatprep.subr.bf16.mxu1 %v4739_v40 }
 0x609   :  { %4100 = vmatmul.mubr.msk.bf16.gmra.mxu1 %vm621_vm1, %v1082_v54 }
 0x60a   :  { %4111 = vmatprep.mubr.msk.bf16.mxu1 %vm4740_vm0, %v4739_v40 }
 0x611   :  { %4112 = vmatmul.mubr.msk.bf16.vlgmr.msra.gmra.mxu1 %vm621_vm1, %v1822_v17 }
 0x612   :  { %4122 = vmatpush3.bf16.xpose.msra.mxu1 %v1931_v18  ;;  %4123 = vmatprep.mubr.msk.bf16.mxu1 %vm4740_vm0, %v4739_v40 }
 0x613   :  { %4133 = vmatprep.subr.bf16.mxu1 %v4739_v40 }
 0x619   :  { %4124 = vmatmul.mubr.msk.bf16.vlgmr.msra.gmra.mxu1 %vm621_vm1, %v1924_v20 }
 0x61a   :  { %4135 = vmatprep.mubr.msk.bf16.mxu1 %vm4740_vm0, %v4739_v40 }
 0x679   :  { %v1432_v22 = vpop.f32.mrf.mxu0 }
 0x67b   :  { %v4059_v26 = vpop.f32.mrf.mxu0 }
 0x67c   :  { %v1480_v46 = vpop.f32.mrf.mxu1 }
 0x67d   :  { %v1435_v50 = vpop.f32.mrf.mxu0 }
 0x67e   :  { %v1583_v54 = vpack.c.bf16 %v1435_v50, %v1432_v22  ;;  %v4065_v57 = vpop.f32.mrf.mxu1 }
 0x67f   :  { %v4060_v14 = vpop.f32.mrf.mxu0 }
 0x680   :  { %v1483_v19 = vpop.f32.mrf.mxu1  ;;  %4083 = vmatprep.mubr.msk.bf16.mxu0 %vm621_vm1, %v1583_v54 }
 0x681   :  { %v1584_v21 = vpack.c.bf16 %v1483_v19, %v1480_v46  ;;  %v1528_v28 = vpop.f32.mrf.mxu0 }
 0x682   :  { %v4066_v30 = vpop.f32.mrf.mxu1 }
 0x683   :  { %v4071_v59 = vpop.f32.mrf.mxu0  ;;  %4084 = vmatmul.mubr.msk.bf16.vlgmr.msra.gmra.mxu0 %vm621_vm1, %v1584_v21 }
 0x684   :  { %4104 = vmatpush3.bf16.xpose.msra.mxu0 %v1778_v32 }
 0x685   :  { %v1531_v36 = vpop.f32.mrf.mxu0  ;;  %4115 = vmatprep.subr.bf16.mxu0 %v4739_v40 }
 0x686   :  { %v1585_v10 = vpack.c.bf16 %v1531_v36, %v1528_v28 }
 0x687   :  { %v4072_v16 = vpop.f32.mrf.mxu0 }
 0x688   :  { %4087 = vmatprep.mubr.msk.bf16.mxu0 %vm621_vm1, %v1585_v10 }
 0x6b9   :  { %v1576_v41 = vpop.f32.mrf.mxu1 }
 0x6bb   :  { %v4077_v42 = vpop.f32.mrf.mxu1 }
 0x6bd   :  { %v1579_v48 = vpop.f32.mrf.mxu1 }
 0x6be   :  { %v1586_v44 = vpack.c.bf16 %v1579_v48, %v1576_v41 }
 0x6bf   :  { %v4078_v49 = vpop.f32.mrf.mxu1 }
 0x6c0   :  { %4088 = vmatmul.mubr.msk.bf16.gmra.mxu0 %vm621_vm1, %v1586_v44 }
 0x6c1   :  { %v5193_v56 = vpop.f32.mrf.mxu1  ;;  %4105 = vmatprep.mubr.msk.bf16.mxu0 %vm4740_vm0, %v4739_v40 }
 0x6c3   :  { %v5197_v33 = vpop.f32.mrf.mxu1 }
 0x6c5   :  { %v5199_v43 = vpop.f32.mrf.mxu1 }
 0x6c7   :  { %v5201_v24 = vpop.f32.mrf.mxu1 }
 0x6c8   :  { %4106 = vmatmul.mubr.msk.bf16.vlgmr.msra.gmra.mxu0 %vm621_vm1, %v1771_v13 }
 0x6c9   :  { %4116 = vmatpush3.bf16.xpose.msra.mxu0 %v1880_v27  ;;  %v5205_v0 = vpop.f32.mrf.mxu1  ;;  %4117 = vmatprep.mubr.msk.bf16.mxu0 %vm4740_vm0, %v4739_v40 }
 0x6ca   :  { %4127 = vmatprep.subr.bf16.mxu0 %v4739_v40 }
 0x6cb   :  { %v5210_v5 = vpop.f32.mrf.mxu1 }
 0x6cd   :  { %v5212_v6 = vpop.f32.mrf.mxu1 }
 0x6cf   :  { %v5214_v35 = vpop.f32.mrf.mxu1 }
 0x6d0   :  { %4118 = vmatmul.mubr.msk.bf16.vlgmr.msra.gmra.mxu0 %vm621_vm1, %v1873_v38 }
 0x6d1   :  { %v1865_v9 = vpop.f32.mrf.mxu1  ;;  %4129 = vmatprep.mubr.msk.bf16.mxu0 %vm4740_vm0, %v4739_v40 }
 0x6d2   :  { %v1866_v19 = vadd.f32 %v1865_v9, %v4922_v34 }
 0x6d3   :  { %v4113_v7 = vpop.f32.mrf.mxu1 }
 0x6d4   :  { %v1980_v36 = vsel %vm810_vm2, %v1866_v19, -inf }
 0x6d5   :  { %v1868_v52 = vpop.f32.mrf.mxu1 }
 0x6d6   :  { %v1869_v59 = vadd.f32 %v1868_v52, %v4926_v39 }
 0x6d7   :  { %v4114_v11 = vpop.f32.mrf.mxu1 }
 0x6d8   :  { %v1983_v34 = vsel %vm810_vm2, %v1869_v59, -inf }
 0x6d9   :  { %v1967_v37 = vpop.f32.mrf.mxu1 }
 0x6da   :  { %v1968_v39 = vadd.f32 %v1967_v37, %v4938_v58 }
 0x6db   :  { %v4125_v8 = vpop.f32.mrf.mxu1 }
 0x6dd   :  { %v1970_v12 = vpop.f32.mrf.mxu1 }
 0x6de   :  { %v1971_v44 = vadd.f32 %v1970_v12, %v4942_v3 }
 0x6df   :  { %v4126_v13 = vpop.f32.mrf.mxu1 }
 0x6e0   :  { %v1995_v38 = vsel %vm810_vm2, %v1971_v44, -inf }
 0x743   :  { %v5219_v15 = vpop.f32.mrf.mxu0 }
 0x745   :  { %v5221_v17 = vpop.f32.mrf.mxu0 }
 0x747   :  { %v5223_v18 = vpop.f32.mrf.mxu0 }
 0x749   :  { %v5225_v20 = vpop.f32.mrf.mxu0 }
 0x780   :  { %v5227_v22 = vpop.f32.mrf.mxu0 }
 0x782   :  { %v5229_v26 = vpop.f32.mrf.mxu0 }
 0x784   :  { %v5231_v46 = vpop.f32.mrf.mxu0 }
 0x786   :  { %v5233_v50 = vpop.f32.mrf.mxu0 }
 0x788   :  { %v1814_v54 = vpop.f32.mrf.mxu0 }
 0x789   :  { %v1815_v57 = vadd.f32 %v1814_v54, %v4915_v25 }
 0x78a   :  { %v4107_v14 = vpop.f32.mrf.mxu0 }
 0x78b   :  { %v1974_v21 = vsel %vm810_vm2, %v1815_v57, -inf }
 0x78c   :  { %1975 = vmax.xlane.f32.xlu0 %v1974_v21  ;;  %v1817_v28 = vpop.f32.mrf.mxu0 }
 0x78d   :  { %v1818_v30 = vadd.f32 %v1817_v28, %v4918_v29 }
 0x78e   :  { %v4108_v32 = vpop.f32.mrf.mxu0 }
 0x78f   :  { %v1977_v10 = vsel %vm810_vm2, %v1818_v30, -inf }
 0x790   :  { %1981 = vmax.xlane.f32.xlu0 %v1980_v36  ;;  %1978 = vmax.xlane.f32.xlu1 %v1977_v10  ;;  %v1916_v16 = vpop.f32.mrf.mxu0 }
 0x791   :  { %v1917_v41 = vadd.f32 %v1916_v16, %v4930_v45  ;;  %v1992_v45 = vsel %vm810_vm2, %v1968_v39, -inf }
 0x792   :  { %v4119_v25 = vpop.f32.mrf.mxu0 }
 0x793   :  { %v1986_v49 = vsel %vm810_vm2, %v1917_v41, -inf }
 0x794   :  { %1984 = vmax.xlane.f32.xlu0 %v1983_v34  ;;  %v1919_v42 = vpop.f32.mrf.mxu0 }
 0x795   :  { %v5245_v48 = vadd.f32 %v1919_v42, %v4934_v51 }
 0x796   :  { %v4120_v29 = vpop.f32.mrf.mxu0 }
 0x797   :  { %v1989_v27 = vsel %vm810_vm2, %v5245_v48, -inf }
 0x798   :  { %1987 = vmax.xlane.f32.xlu0 %v1986_v49  ;;  %1990 = vmax.xlane.f32.xlu1 %v1989_v27 }
 0x79c   :  { %1993 = vmax.xlane.f32.xlu0 %v1992_v45  ;;  %1996 = vmax.xlane.f32.xlu1 %v1995_v38 }
 0x815   :  { %v1976_v51 = vpop.xlane.xlu0 %1975 }
 0x816   :  { %v1998_v13 = vsub.f32 %v1815_v57, %v1976_v51 }
 0x818   :  { %v2006_v36 = vmul.f32 1.442695, %v1998_v13 }
 0x819   :  { %v1982_v9 = vpop.xlane.xlu0 %1981  ;;  %v1979_v58 = vpop.xlane.xlu1 %1978 }
 0x81a   :  { %v2000_v7 = vsub.f32 %v1866_v19, %v1982_v9  ;;  %v1999_v54 = vsub.f32 %v1818_v30, %v1979_v58 }
 0x81c   :  { %v2010_v52 = vmul.f32 1.442695, %v2000_v7  ;;  %v2008_v19 = vmul.f32 1.442695, %v1999_v54 }
 0x81d   :  { %v1985_v11 = vpop.xlane.xlu0 %1984 }
 0x81e   :  { %4379 = vpow2.f32 %v2010_v52  ;;  %v2001_v3 = vsub.f32 %v1869_v59, %v1985_v11 }
 0x820   :  { %v2012_v37 = vmul.f32 1.442695, %v2001_v3 }
 0x821   :  { %v1988_v8 = vpop.xlane.xlu0 %1987  ;;  %v1991_v12 = vpop.xlane.xlu1 %1990 }
 0x822   :  { %4381 = vpow2.f32 %v2012_v37  ;;  %v2002_v10 = vsub.f32 %v1917_v41, %v1988_v8  ;;  %v2003_v7 = vsub.f32 %v5245_v48, %v1991_v12 }
 0x824   :  { %v2014_v59 = vmul.f32 1.442695, %v2002_v10  ;;  %v2016_v52 = vmul.f32 1.442695, %v2003_v7 }
 0x825   :  { %v1994_v14 = vpop.xlane.xlu0 %1993  ;;  %v1997_v21 = vpop.xlane.xlu1 %1996 }
 0x826   :  { %v2004_v28 = vsub.f32 %v1968_v39, %v1994_v14  ;;  %v2005_v32 = vsub.f32 %v1971_v44, %v1997_v21 }
 0x828   :  { %v2018_v16 = vmul.f32 1.442695, %v2004_v28  ;;  %v2020_v25 = vmul.f32 1.442695, %v2005_v32 }
 0x82a   :  { %4383 = vpow2.f32 %v2018_v16 }
 0x82b   :  { %v4380_v34 = vpop.eup %4379  ;;  %4385 = vpow2.f32 %v2020_v25 }
 0x82c   :  { %4387 = vpow2.f32 %v2006_v36  ;;  %v2028_v42 = vsel %vm810_vm2, %v4380_v34, 0.0 }
 0x82d   :  { %4389 = vpow2.f32 %v2008_v19  ;;  %2029 = vadd.xlane.f32.xlu0 %v2028_v42 }
 0x82e   :  { %4391 = vpow2.f32 %v2014_v59 }
 0x82f   :  { %v4382_v57 = vpop.eup %4381  ;;  %4393 = vpow2.f32 %v2016_v52  ;;  %v4271_v52 = vld [vmem:[#allocation14 + $0x28] sm:$0xff]  }
 0x830   :  { %v2031_v30 = vsel %vm810_vm2, %v4382_v57, 0.0 }
 0x831   :  { %2032 = vadd.xlane.f32.xlu1 %v2031_v30 }
 0x837   :  { %v5256_v29 = vpop.eup %4383 }
 0x838   :  { %v5258_v41 = vpop.eup %4385  ;;  %v2040_v39 = vsel %vm810_vm2, %v5256_v29, 0.0 }
 0x839   :  { %v4388_v44 = vpop.eup %4387  ;;  %2041 = vadd.xlane.f32.xlu0 %v2040_v39  ;;  %v2043_v49 = vsel %vm810_vm2, %v5258_v41, 0.0 }
 0x83a   :  { %v4390_v27 = vpop.eup %4389  ;;  %2044 = vadd.xlane.f32.xlu1 %v2043_v49  ;;  %v2022_v45 = vsel %vm810_vm2, %v4388_v44, 0.0 }
 0x83b   :  { %v5265_v38 = vpop.eup %4391  ;;  %v2025_v51 = vsel %vm810_vm2, %v4390_v27, 0.0 }
 0x83c   :  { %v2034_v9 = vsel %vm810_vm2, %v5265_v38, 0.0  ;;  %v5285_v58 = vpop.eup %4393 }
 0x83d   :  { %2023 = vadd.xlane.f32.xlu0 %v2022_v45  ;;  %v2037_v11 = vsel %vm810_vm2, %v5285_v58, 0.0 }
 0x83e   :  { %2026 = vadd.xlane.f32.xlu1 %v2025_v51 }
 0x841   :  { %2035 = vadd.xlane.f32.xlu0 %v2034_v9 }
 0x84f   :  { %2113 = vrot.lane.b32.xlu1 %v4980_v63, %s4731_s14 }
 0x853   :  { %2160 = vrot.lane.b32.xlu1 %v5009_v23, %s4731_s14 }
 0x857   :  { %2066 = vrot.lane.b32.xlu0 %v4978_v62, %s4731_s14 }
 0x85b   :  { %2362 = vrot.lane.b32.xlu0 %v4868_v47, %s4742_s9 }
 0x85f   :  { %2413 = vrot.lane.b32.xlu0 %v4873_v53, %s4742_s9 }
 0x863   :  { %2464 = vrot.lane.b32.xlu0 %v4884_v60, %s4742_s9 }
 0x867   :  { %2462 = vrot.lane.b32.xlu0 %v4897_v2, %s4742_s9 }
 0x877   :  { %2038 = vadd.xlane.f32.xlu1 %v2037_v11 }
 0x888   :  { %2207 = vrot.lane.b32.xlu1 %v5018_v31, %s4731_s14 }
 0x88c   :  { %2360 = vrot.lane.b32.xlu1 %v4875_v55, %s4742_s9 }
 0x890   :  { %2411 = vrot.lane.b32.xlu1 %v4886_v61, %s4742_s9 }
 0x894   :  { %2515 = vrot.lane.b32.xlu1 %v4895_v1, %s4742_s9 }
 0x898   :  { %2513 = vrot.lane.b32.xlu1 %v4906_v4, %s4742_s9 }
 0x8b6   :  { %v2030_v47 = vpop.xlane.xlu0 %2029 }
 0x8b7   :  { %4395 = vrcp.f32 %v2030_v47 }
 0x8ba   :  { %v2033_v53 = vpop.xlane.xlu1 %2032 }
 0x8bb   :  { %4397 = vrcp.f32 %v2033_v53 }
 0x8c2   :  { %v2042_v60 = vpop.xlane.xlu0 %2041 }
 0x8c3   :  { %v2045_v2 = vpop.xlane.xlu1 %2044 }
 0x8c4   :  { %v4396_v48 = vpop.eup %4395 }
 0x8c5   :  { %v2056_v8 = vmul.f32 %v4396_v48, %v4380_v34 }
 0x8c6   :  { %v2024_v3 = vpop.xlane.xlu0 %2023 }
 0x8c7   :  { %4399 = vrcp.f32 %v2024_v3  ;;  %v2027_v37 = vpop.xlane.xlu1 %2026 }
 0x8c8   :  { %v4398_v55 = vpop.eup %4397  ;;  %4401 = vrcp.f32 %v2027_v37 }
 0x8c9   :  { %v2057_v61 = vmul.f32 %v4398_v55, %v4382_v57  ;;  %4403 = vrcp.f32 %v2042_v60 }
 0x8ca   :  { %v2036_v12 = vpop.xlane.xlu0 %2035  ;;  %4405 = vrcp.f32 %v2045_v2 }
 0x8cb   :  { %v2114_v13 = vpop.permute.xlu1 %2113  ;;  %v2063_v1 = vpack.c.bf16 %v2057_v61, %v2056_v8  ;;  %4407 = vrcp.f32 %v2036_v12 }
 0x8cc   :  { %4134 = vmatpush3.bf16.msra.mxu1 %v2114_v13 }
 0x8cd   :  { %4145 = vmatprep.subr.bf16.mxu1 %v4739_v40 }
 0x8ce   :  { %v2067_v4 = vpop.permute.xlu0 %2066 }
 0x8cf   :  { %4136 = vmatmul.mubr.msk.bf16.vlgmr.msra.gmra.mxu1 %vm810_vm2, %v2063_v1  ;;  %4128 = vmatpush3.bf16.msra.mxu0 %v2067_v4  ;;  %v2161_v36 = vpop.permute.xlu1 %2160 }
 0x8d0   :  { %4139 = vmatprep.subr.bf16.mxu0 %v4739_v40  ;;  %4147 = vmatprep.mubr.msk.bf16.mxu1 %vm4740_vm0, %v4739_v40 }
 0x8d2   :  { %v2363_v42 = vpop.permute.xlu0 %2362 }
 0x8d3   :  { %v2368_v30 = vsel %vm621_vm1, %v2363_v42, 0 }
 0x8d4   :  { %v4400_v54 = vpop.eup %4399 }
 0x8d5   :  { %v4402_v14 = vpop.eup %4401  ;;  %v2054_v21 = vmul.f32 %v4400_v54, %v4388_v44 }
 0x8d6   :  { %v2055_v28 = vmul.f32 %v4402_v14, %v4390_v27  ;;  %v4404_v10 = vpop.eup %4403  ;;  %v2414_v44 = vpop.permute.xlu0 %2413 }
 0x8d7   :  { %v4406_v16 = vpop.eup %4405  ;;  %v2060_v19 = vmul.f32 %v4404_v10, %v5256_v29  ;;  %v2419_v51 = vsel %vm621_vm1, %v2414_v44, 0 }
 0x8d8   :  { %v2062_v32 = vpack.c.bf16 %v2055_v28, %v2054_v21  ;;  %v2061_v34 = vmul.f32 %v4406_v16, %v5258_v41  ;;  %v4408_v29 = vpop.eup %4407  ;;  %v4475_v28 = vld [vmem:[#allocation8] sm:$0xff] }
 0x8d9   :  { %v2058_v27 = vmul.f32 %v4408_v29, %v5265_v38 }
 0x8da   :  { %4130 = vmatmul.mubr.msk.bf16.vlgmr.msra.gmra.mxu0 %vm810_vm2, %v2062_v32  ;;  %v2065_v57 = vpack.c.bf16 %v2061_v34, %v2060_v19  ;;  %v2465_v55 = vpop.permute.xlu0 %2464  ;;  %v4476_v19 = vld [vmem:[#allocation8 + $0x8] sm:$0xff] }
 0x8db   :  { %4140 = vmatpush3.bf16.msra.mxu0 %v2161_v36  ;;  %4141 = vmatprep.mubr.msk.bf16.mxu0 %vm4740_vm0, %v4739_v40  ;;  %v2470_v13 = vsel %vm621_vm1, %v2465_v55, 0 }
 0x8dc   :  { %4151 = vmatprep.subr.bf16.mxu0 %v4271_v52 }
 0x900   :  { %v2039_v25 = vpop.xlane.xlu1 %2038 }
 0x901   :  { %4409 = vrcp.f32 %v2039_v25 }
 0x904   :  { %v2208_v59 = vpop.permute.xlu1 %2207 }
 0x905   :  { %4146 = vmatpush3.bf16.msra.mxu1 %v2208_v59 }
 0x906   :  { %4163 = vmatprep.subr.bf16.mxu1 %v4739_v40 }
 0x908   :  { %4148 = vmatmul.mubr.msk.bf16.vlgmr.msra.gmra.mxu1 %vm810_vm2, %v2065_v57  ;;  %v2361_v39 = vpop.permute.xlu1 %2360 }
 0x909   :  { %4164 = vmatpush3.bf16.xpose.msra.mxu1 %v2368_v30  ;;  %4165 = vmatprep.mubr.msk.bf16.mxu1 %vm4740_vm0, %v4739_v40 }
 0x90a   :  { %4169 = vmatprep.subr.bf16.mxu1 %v4739_v40 }
 0x90c   :  { %v2412_v49 = vpop.permute.xlu1 %2411 }
 0x90e   :  { %v4410_v41 = vpop.eup %4409 }
 0x90f   :  { %v2059_v45 = vmul.f32 %v4410_v41, %v5285_v58  ;;  %v4272_v58 = vld [vmem:[#allocation14 + $0x20] sm:$0xff]   ;;  %v4477_v41 = vld [vmem:[#allocation8 + $0x10] sm:$0xff] }
 0x910   :  { %4166 = vmatmul.mubr.msk.bf16.vlgmr.msra.gmra.mxu1 %vm621_vm1, %v2361_v39  ;;  %v2516_v7 = vpop.permute.xlu1 %2515 }
 0x911   :  { %4170 = vmatpush3.bf16.xpose.msra.mxu1 %v2419_v51  ;;  %v2064_v9 = vpack.c.bf16 %v2059_v45, %v2058_v27  ;;  %4171 = vmatprep.mubr.msk.bf16.mxu1 %vm4740_vm0, %v4739_v40  ;;  %v2521_v38 = vsel %vm621_vm1, %v2516_v7, 0  ;;  %v4478_v7 = vld [vmem:[#allocation8 + $0x18] sm:$0xff] }
 0x912   :  { %4181 = vmatprep.subr.bf16.mxu1 %v4739_v40 }
 0x913   :  { %4142 = vmatmul.mubr.msk.bf16.vlgmr.msra.gmra.mxu0 %vm810_vm2, %v2064_v9 }
 0x914   :  { %4152 = vmatpush3.bf16.msra.mxu0 %v4271_v52  ;;  %v2514_v11 = vpop.permute.xlu1 %2513 }
 0x915   :  { %4153 = vmatprep.subr.bf16.mxu0 %v4272_v58 }
 0x918   :  { %4172 = vmatmul.mubr.msk.bf16.vlgmr.msra.gmra.mxu1 %vm621_vm1, %v2412_v49  ;;  %4154 = vmatpush3.bf16.msra.mxu0 %v4272_v58 }
 0x919   :  { %4182 = vmatpush3.bf16.xpose.msra.mxu1 %v2521_v38  ;;  %4183 = vmatprep.mubr.msk.bf16.mxu1 %vm4740_vm0, %v4739_v40 }
 0x91a   :  { %4193 = vmatprep.subr.bf16.mxu1 %v4739_v40  ;;  %4175 = vmatprep.subr.bf16.mxu0 %v4739_v40 }
 0x920   :  { %4184 = vmatmul.mubr.msk.bf16.vlgmr.msra.gmra.mxu1 %vm621_vm1, %v2514_v11 }
 0x921   :  { %4195 = vmatprep.mubr.msk.bf16.mxu1 %vm4740_vm0, %v4739_v40 }
 0x98f   :  { %v2153_v47 = vpop.f32.mrf.mxu1 }
 0x991   :  { %v4137_v53 = vpop.f32.mrf.mxu1 }
 0x993   :  { %v2156_v60 = vpop.f32.mrf.mxu1 }
 0x994   :  { %v2255_v61 = vpack.c.bf16 %v2156_v60, %v2153_v47  ;;  %v2463_v47 = vpop.permute.xlu0 %2462 }
 0x995   :  { %v4138_v2 = vpop.f32.mrf.mxu1 }
 0x99a   :  { %v2106_v48 = vpop.f32.mrf.mxu0 }
 0x99c   :  { %v4131_v3 = vpop.f32.mrf.mxu0 }
 0x99e   :  { %v2109_v37 = vpop.f32.mrf.mxu0 }
 0x99f   :  { %v2254_v8 = vpack.c.bf16 %v2109_v37, %v2106_v48  ;;  %v1748_v48 = vadd.f32 %v5193_v56, %v5219_v15  ;;  %v1740_v37 = vadd.f32 %v5197_v33, %v5221_v17 }
 0x9a0   :  { %v4132_v12 = vpop.f32.mrf.mxu0 }
 0x9a1   :  { %4155 = vmatprep.mubr.msk.bf16.mxu0 %vm621_vm1, %v2254_v8 }
 0x9a2   :  { %4156 = vmatmul.mubr.msk.bf16.vlgmr.msra.gmra.mxu0 %vm621_vm1, %v2255_v61  ;;  %v1751_v61 = vadd.f32 %v5199_v43, %v5223_v18 }
 0x9a3   :  { %4176 = vmatpush3.bf16.xpose.msra.mxu0 %v2470_v13 }
 0x9a4   :  { %4187 = vmatprep.subr.bf16.mxu0 %v4739_v40 }
 0x9c8   :  { %v2247_v1 = vpop.f32.mrf.mxu1 }
 0x9ca   :  { %v4149_v4 = vpop.f32.mrf.mxu1 }
 0x9cc   :  { %v2250_v54 = vpop.f32.mrf.mxu1 }
 0x9cd   :  { %v2257_v44 = vpack.c.bf16 %v2250_v54, %v2247_v1  ;;  %v1743_v1 = vadd.f32 %v5201_v24, %v5225_v20  ;;  %v1756_v24 = vadd.f32 %v5210_v5, %v5229_v26 }
 0x9ce   :  { %v4150_v14 = vpop.f32.mrf.mxu1 }
 0x9d0   :  { %v2404_v21 = vpop.f32.mrf.mxu1 }
 0x9d1   :  { %v2405_v32 = vadd.f32 %v4475_v28, %v2404_v21  ;;  %v1764_v28 = vadd.f32 %v5205_v0, %v5227_v22  ;;  %v1759_v22 = vadd.f32 %v5214_v35, %v5233_v50  ;;  %v4481_v35 = vld [vmem:[#allocation8 + $0x28] sm:$0xff] }
 0x9d2   :  { %v4167_v36 = vpop.f32.mrf.mxu1 }
 0x9d3   :  { %v2200_v10 = vpop.f32.mrf.mxu0  ;;  %v2564_v16 = vsel %vm810_vm2, %v2405_v32, -inf }
 0x9d4   :  { %2565 = vmax.xlane.f32.xlu0 %v2564_v16  ;;  %v2407_v25 = vpop.f32.mrf.mxu1  ;;  %v1767_v16 = vadd.f32 %v5212_v6, %v5231_v46  ;;  %v4479_v46 = vld [vmem:[#allocation8 + $0x20] sm:$0xff] }
 0x9d5   :  { %v2408_v34 = vadd.f32 %v4476_v19, %v2407_v25  ;;  %v4143_v59 = vpop.f32.mrf.mxu0 }
 0x9d6   :  { %v4168_v42 = vpop.f32.mrf.mxu1 }
 0x9d7   :  { %v2203_v57 = vpop.f32.mrf.mxu0  ;;  %v2567_v30 = vsel %vm810_vm2, %v2408_v34, -inf }
 0x9d8   :  { %v2256_v39 = vpack.c.bf16 %v2203_v57, %v2200_v10  ;;  %2568 = vmax.xlane.f32.xlu1 %v2567_v30  ;;  %v2455_v29 = vpop.f32.mrf.mxu1 }
 0x9d9   :  { %v2456_v49 = vadd.f32 %v4477_v41, %v2455_v29  ;;  %v4144_v27 = vpop.f32.mrf.mxu0  ;;  %v4480_v29 = vld [vmem:[#allocation8 + $0x30] sm:$0xff] }
 0x9da   :  { %4159 = vmatprep.mubr.msk.bf16.mxu0 %vm621_vm1, %v2256_v39  ;;  %v4173_v45 = vpop.f32.mrf.mxu1 }
 0x9db   :  { %4160 = vmatmul.mubr.msk.bf16.gmra.mxu0 %vm621_vm1, %v2257_v44  ;;  %v2570_v51 = vsel %vm810_vm2, %v2456_v49, -inf  ;;  %v4482_v45 = vld [vmem:[#allocation8 + $0x38] sm:$0xff] }
 0x9dc   :  { %2571 = vmax.xlane.f32.xlu0 %v2570_v51  ;;  %v2458_v9 = vpop.f32.mrf.mxu1  ;;  %4177 = vmatprep.mubr.msk.bf16.mxu0 %vm4740_vm0, %v4739_v40 }
 0x9dd   :  { %v2459_v52 = vadd.f32 %v4478_v7, %v2458_v9 }
 0x9de   :  { %v4174_v38 = vpop.f32.mrf.mxu1 }
 0x9df   :  { %v2573_v58 = vsel %vm810_vm2, %v2459_v52, -inf }
 0x9e0   :  { %2574 = vmax.xlane.f32.xlu0 %v2573_v58  ;;  %v2557_v11 = vpop.f32.mrf.mxu1 }
 0x9e1   :  { %v2558_v44 = vadd.f32 %v4480_v29, %v2557_v11 }
 0x9e2   :  { %v4185_v53 = vpop.f32.mrf.mxu1 }
 0x9e3   :  { %4178 = vmatmul.mubr.msk.bf16.vlgmr.msra.gmra.mxu0 %vm621_vm1, %v2463_v47  ;;  %v2582_v9 = vsel %vm810_vm2, %v2558_v44, -inf }
 0x9e4   :  { %v2560_v60 = vpop.f32.mrf.mxu1  ;;  %4189 = vmatprep.mubr.msk.bf16.mxu0 %vm4740_vm0, %v4739_v40 }
 0x9e5   :  { %v2561_v51 = vadd.f32 %v4482_v45, %v2560_v60 }
 0x9e6   :  { %v4186_v2 = vpop.f32.mrf.mxu1 }
 0x9e7   :  { %v2585_v11 = vsel %vm810_vm2, %v2561_v51, -inf }
 0xa5d   :  { %v2566_v15 = vpop.xlane.xlu0 %2565 }
 0xa5e   :  { %v2588_v33 = vsub.f32 %v2405_v32, %v2566_v15 }
 0xa60   :  { %v2596_v43 = vmul.f32 1.442695, %v2588_v33 }
 0xa61   :  { %v2569_v17 = vpop.xlane.xlu1 %2568 }
 0xa62   :  { %v4157_v3 = vpop.f32.mrf.mxu0  ;;  %v2589_v21 = vsub.f32 %v2408_v34, %v2569_v17  ;;  %4411 = vpow2.f32 %v2596_v43 }
 0xa63   :  { %v5351_v55 = vadd.f32 %v4157_v3, %v1748_v48 }
 0xa64   :  { %v2321_v8 = vpop.f32.mrf.mxu0  ;;  %v2598_v25 = vmul.f32 1.442695, %v2589_v21 }
 0xa65   :  { %v5355_v12 = vadd.f32 %v2321_v8, %v1740_v37  ;;  %v2572_v14 = vpop.xlane.xlu0 %2571 }
 0xa66   :  { %v4158_v13 = vpop.f32.mrf.mxu0  ;;  %v2590_v18 = vsub.f32 %v2456_v49, %v2572_v14  ;;  %4413 = vpow2.f32 %v2598_v25 }
 0xa67   :  { %v5359_v4 = vadd.f32 %v4158_v13, %v1751_v61 }
 0xa68   :  { %v2324_v54 = vpop.f32.mrf.mxu0  ;;  %v2600_v32 = vmul.f32 1.442695, %v2590_v18 }
 0xa69   :  { %v5361_v56 = vadd.f32 %v2324_v54, %v1743_v1  ;;  %v2575_v36 = vpop.xlane.xlu0 %2574 }
 0xa6a   :  { %v2591_v34 = vsub.f32 %v2459_v52, %v2575_v36  ;;  %4415 = vpow2.f32 %v2600_v32 }
 0xa6c   :  { %v2602_v26 = vmul.f32 1.442695, %v2591_v34 }
 0xa6e   :  { %4417 = vpow2.f32 %v2602_v26 }
 0xa6f   :  { %v5382_v52 = vpop.eup %4411 }
 0xa70   :  { %v2612_v58 = vsel %vm810_vm2, %v5382_v52, 0.0 }
 0xa73   :  { %v4414_v38 = vpop.eup %4413 }
 0xa74   :  { %v2615_v60 = vsel %vm810_vm2, %v4414_v38, 0.0 }
 0xa77   :  { %v4416_v47 = vpop.eup %4415 }
 0xa78   :  { %v2618_v53 = vsel %vm810_vm2, %v4416_v47, 0.0 }
 0xa7b   :  { %v4418_v2 = vpop.eup %4417 }
 0xa7c   :  { %v2621_v48 = vsel %vm810_vm2, %v4418_v2, 0.0 }
 0xa9b   :  { %v4161_v10 = vpop.f32.mrf.mxu0 }
 0xa9c   :  { %v5367_v20 = vadd.f32 %v4161_v10, %v1764_v28 }
 0xa9d   :  { %v2337_v19 = vpop.f32.mrf.mxu0 }
 0xa9e   :  { %v5371_v59 = vadd.f32 %v2337_v19, %v1756_v24 }
 0xa9f   :  { %v4162_v0 = vpop.f32.mrf.mxu0 }
 0xaa0   :  { %v5375_v42 = vadd.f32 %v4162_v0, %v1767_v16 }
 0xaa1   :  { %v2340_v5 = vpop.f32.mrf.mxu0 }
 0xaa2   :  { %v5377_v57 = vadd.f32 %v2340_v5, %v1759_v22 }
 0xaa3   :  { %v2506_v6 = vpop.f32.mrf.mxu0 }
 0xaa4   :  { %v2507_v30 = vadd.f32 %v4479_v46, %v2506_v6 }
 0xaa5   :  { %v4179_v39 = vpop.f32.mrf.mxu0 }
 0xaa6   :  { %v2576_v41 = vsel %vm810_vm2, %v2507_v30, -inf }
 0xaa7   :  { %2577 = vmax.xlane.f32.xlu0 %v2576_v41  ;;  %v2509_v49 = vpop.f32.mrf.mxu0 }
 0xaa8   :  { %v2510_v50 = vadd.f32 %v4481_v35, %v2509_v49 }
 0xaa9   :  { %v4180_v27 = vpop.f32.mrf.mxu0 }
 0xaaa   :  { %v2579_v7 = vsel %vm810_vm2, %v2510_v50, -inf }
 0xaab   :  { %2583 = vmax.xlane.f32.xlu0 %v2582_v9  ;;  %2580 = vmax.xlane.f32.xlu1 %v2579_v7 }
 0xaaf   :  { %2613 = vadd.xlane.f32.xlu0 %v2612_v58  ;;  %2586 = vmax.xlane.f32.xlu1 %v2585_v11 }
 0xab3   :  { %2619 = vadd.xlane.f32.xlu0 %v2618_v53  ;;  %2616 = vadd.xlane.f32.xlu1 %v2615_v60  ;;  %v4274_v60 = vld [vmem:[#allocation14 + $0x30] sm:$0xff]  }
 0xab7   :  { %2622 = vadd.xlane.f32.xlu1 %v2621_v48 }
 0xb30   :  { %v2578_v3 = vpop.xlane.xlu0 %2577 }
 0xb31   :  { %v2592_v37 = vsub.f32 %v2507_v30, %v2578_v3 }
 0xb33   :  { %v2604_v1 = vmul.f32 1.442695, %v2592_v37 }
 0xb34   :  { %v2584_v8 = vpop.xlane.xlu0 %2583  ;;  %v2581_v61 = vpop.xlane.xlu1 %2580 }
 0xb35   :  { %v2594_v13 = vsub.f32 %v2558_v44, %v2584_v8  ;;  %v2593_v10 = vsub.f32 %v2510_v50, %v2581_v61 }
 0xb37   :  { %v2608_v54 = vmul.f32 1.442695, %v2594_v13  ;;  %v2606_v24 = vmul.f32 1.442695, %v2593_v10 }
 0xb38   :  { %v2587_v15 = vpop.xlane.xlu1 %2586  ;;  %v2614_v32 = vpop.xlane.xlu0 %2613 }
 0xb39   :  { %4419 = vpow2.f32 %v2608_v54  ;;  %v2595_v14 = vsub.f32 %v2561_v51, %v2587_v15 }
 0xb3a   :  { %4421 = vpow2.f32 %v2604_v1 }
 0xb3b   :  { %v2610_v33 = vmul.f32 1.442695, %v2595_v14 }
 0xb3c   :  { %v2617_v19 = vpop.xlane.xlu1 %2616 }
 0xb3d   :  { %4423 = vpow2.f32 %v2610_v33 }
 0xb3e   :  { %4425 = vpow2.f32 %v2606_v24 }
 0xb3f   :  { %4427 = vrcp.f32 %v2617_v19 }
 0xb40   :  { %v2623_v34 = vpop.xlane.xlu1 %2622 }
 0xb41   :  { %4429 = vrcp.f32 %v2623_v34 }
 0xb42   :  { %4431 = vrcp.f32 %v2614_v32  ;;  %v5427_v32 = vld [vmem:[%s5581_s10] sm:$0xff] }
 0xb46   :  { %v4420_v17 = vpop.eup %4419 }
 0xb47   :  { %v2630_v21 = vsel %vm810_vm2, %v4420_v17, 0.0  ;;  %v5391_v28 = vpop.eup %4421 }
 0xb48   :  { %2631 = vadd.xlane.f32.xlu0 %v2630_v21  ;;  %v2624_v18 = vsel %vm810_vm2, %v5391_v28, 0.0 }
 0xb4a   :  { %v4424_v43 = vpop.eup %4423 }
 0xb4b   :  { %v2633_v36 = vsel %vm810_vm2, %v4424_v43, 0.0  ;;  %v4426_v16 = vpop.eup %4425 }
 0xb4c   :  { %2625 = vadd.xlane.f32.xlu0 %v2624_v18  ;;  %2634 = vadd.xlane.f32.xlu1 %v2633_v36  ;;  %v2627_v25 = vsel %vm810_vm2, %v4426_v16, 0.0 }
 0xb5d   :  { %2703 = vrot.lane.b32.xlu1 %v4980_v63, %s4742_s9  ;;  %v2620_v63 = vpop.xlane.xlu0 %2619 }
 0xb5e   :  { %4433 = vrcp.f32 %v2620_v63 }
 0xb61   :  { %2750 = vrot.lane.b32.xlu1 %v5009_v23, %s4742_s9 }
 0xb62   :  { %2656 = vrot.lane.b32.xlu0 %v4978_v62, %s4742_s9  ;;  %v4428_v62 = vpop.eup %4427 }
 0xb63   :  { %v4430_v0 = vpop.eup %4429  ;;  %v2645_v46 = vmul.f32 %v4428_v62, %v4414_v38 }
 0xb64   :  { %v4432_v22 = vpop.eup %4431  ;;  %v2647_v30 = vmul.f32 %v4430_v0, %v4418_v2 }
 0xb6b   :  { %v4434_v6 = vpop.eup %4433 }
 0xb6c   :  { %v2646_v44 = vmul.f32 %v4434_v6, %v4416_v47 }
 0xb6e   :  { %v2653_v49 = vpack.c.bf16 %v2647_v30, %v2646_v44 }
 0xb85   :  { %2628 = vadd.xlane.f32.xlu1 %v2627_v25 }
 0xb96   :  { %2797 = vrot.lane.b32.xlu1 %v5018_v31, %s4742_s9  ;;  %v2644_v31 = vmul.f32 %v4432_v22, %v5382_v52 }
 0xb98   :  { %v2652_v41 = vpack.c.bf16 %v2645_v46, %v2644_v31 }
 0xbd1   :  { %v2632_v23 = vpop.xlane.xlu0 %2631 }
 0xbd5   :  { %v2626_v5 = vpop.xlane.xlu0 %2625  ;;  %v2635_v26 = vpop.xlane.xlu1 %2634 }
 0xbd6   :  { %4435 = vrcp.f32 %v2635_v26 }
 0xbd7   :  { %4437 = vrcp.f32 %v2632_v23 }
 0xbd8   :  { %4439 = vrcp.f32 %v2626_v5 }
 0xbd9   :  { %v2657_v39 = vpop.permute.xlu0 %2656  ;;  %v2704_v29 = vpop.permute.xlu1 %2703 }
 0xbda   :  { %4188 = vmatpush3.bf16.msra.mxu0 %v2657_v39  ;;  %4194 = vmatpush3.bf16.msra.mxu1 %v2704_v29  ;;  %v4483_v39 = vld [vmem:[#allocation2] sm:$0xff] }
 0xbdb   :  { %4199 = vmatprep.subr.bf16.mxu0 %v4739_v40  ;;  %4205 = vmatprep.subr.bf16.mxu1 %v4739_v40 }
 0xbdd   :  { %4190 = vmatmul.mubr.msk.bf16.vlgmr.msra.gmra.mxu0 %vm810_vm2, %v2652_v41  ;;  %4196 = vmatmul.mubr.msk.bf16.vlgmr.msra.gmra.mxu1 %vm810_vm2, %v2653_v49  ;;  %v2751_v35 = vpop.permute.xlu1 %2750  ;;  %v4484_v41 = vld [vmem:[#allocation2 + $0x10] sm:$0xff] }
 0xbde   :  { %4200 = vmatpush3.bf16.msra.mxu0 %v2751_v35  ;;  %4207 = vmatprep.mubr.msk.bf16.mxu1 %vm4740_vm0, %v4739_v40 }
 0xbdf   :  { %4201 = vmatprep.mubr.msk.bf16.mxu0 %vm4740_vm0, %v4739_v40  ;;  %v4273_v40 = vld [vmem:[#allocation14 + $0x38] sm:$0xff]  }
 0xbe0   :  { %4211 = vmatprep.subr.bf16.mxu0 %v4273_v40 }
 0xbe3   :  { %v4436_v50 = vpop.eup %4435 }
 0xbe4   :  { %v4438_v45 = vpop.eup %4437  ;;  %v2651_v51 = vmul.f32 %v4436_v50, %v4424_v43 }
 0xbe5   :  { %v2650_v7 = vmul.f32 %v4438_v45, %v4420_v17  ;;  %v4440_v38 = vpop.eup %4439 }
 0xbe6   :  { %v2648_v11 = vmul.f32 %v4440_v38, %v5391_v28 }
 0xbe7   :  { %v2655_v52 = vpack.c.bf16 %v2651_v51, %v2650_v7 }
 0xc0e   :  { %v2629_v27 = vpop.xlane.xlu1 %2628 }
 0xc0f   :  { %4441 = vrcp.f32 %v2629_v27 }
 0xc12   :  { %v2798_v9 = vpop.permute.xlu1 %2797 }
 0xc13   :  { %4206 = vmatpush3.bf16.msra.mxu1 %v2798_v9 }
 0xc16   :  { %4208 = vmatmul.mubr.msk.bf16.vlgmr.msra.gmra.mxu1 %vm810_vm2, %v2655_v52 }
 0xc1c   :  { %v4442_v58 = vpop.eup %4441 }
 0xc1d   :  { %v2649_v47 = vmul.f32 %v4442_v58, %v4426_v16  ;;  %v2950_v16 = vlaneseq }
 0xc1f   :  { %v2654_v53 = vpack.c.bf16 %v2649_v47, %v2648_v11  ;;  %v5421_v25 = vshrl.u32 %v2950_v16, 7  ;;  %v4487_v11 = vld [vmem:[#allocation2 + $0x20] sm:$0xff] }
 0xc20   :  { %v4278_v16 = vld [vmem:[#allocation16 + $0x60] ss:$8 sps:$4 sm:$0xff]  }
 0xc21   :  { %4202 = vmatmul.mubr.msk.bf16.vlgmr.msra.gmra.mxu0 %vm810_vm2, %v2654_v53  ;;  %v2952_v19 = vsub.s32 0, %v5421_v25 }
 0xc22   :  { %4212 = vmatpush3.bf16.msra.mxu0 %v4273_v40 }
 0xc23   :  { %4213 = vmatprep.subr.bf16.mxu0 %v4274_v60  ;;  %v2953_v62 = vrot.slane %v5427_v32, %v2952_v19  ;;  %v4283_v19 = vld [vmem:[#allocation16 + $0x54] ss:$8 sps:$4 sm:$0xff]  }
 0xc26   :  { %4214 = vmatpush3.bf16.msra.mxu0 %v4274_v60  ;;  %v4488_v60 = vld [vmem:[#allocation2 + $0x30] sm:$0xff] }
 0xc9d   :  { %v2696_v2 = vpop.f32.mrf.mxu0  ;;  %v2743_v48 = vpop.f32.mrf.mxu1 }
 0xc9f   :  { %v4191_v3 = vpop.f32.mrf.mxu0  ;;  %v4197_v37 = vpop.f32.mrf.mxu1 }
 0xca0   :  { %v4277_v3 = vld [vmem:[#allocation16 + $0x74] ss:$8 sps:$4 sm:$0xff]  }
 0xca1   :  { %v2699_v8 = vpop.f32.mrf.mxu0  ;;  %v2746_v61 = vpop.f32.mrf.mxu1  ;;  %3191 = vmatprep.subr.bf16.mxu1 %v4277_v3 }
 0xca2   :  { %v2844_v13 = vpack.c.bf16 %v2699_v8, %v2696_v2  ;;  %v2845_v1 = vpack.c.bf16 %v2746_v61, %v2743_v48 }
 0xca3   :  { %v4192_v54 = vpop.f32.mrf.mxu0  ;;  %v4198_v15 = vpop.f32.mrf.mxu1 }
 0xca4   :  { %4215 = vmatprep.mubr.msk.bf16.mxu0 %vm621_vm1, %v2844_v13 }
 0xca5   :  { %4216 = vmatmul.mubr.msk.bf16.vlgmr.msra.gmra.mxu0 %vm621_vm1, %v2845_v1 }
 0xcd6   :  { %v2837_v14 = vpop.f32.mrf.mxu1 }
 0xcd8   :  { %v4209_v33 = vpop.f32.mrf.mxu1 }
 0xcda   :  { %v2840_v17 = vpop.f32.mrf.mxu1 }
 0xcdb   :  { %v2847_v10 = vpack.c.bf16 %v2840_v17, %v2837_v14 }
 0xcdc   :  { %v4210_v21 = vpop.f32.mrf.mxu1 }
 0xce1   :  { %v2790_v28 = vpop.f32.mrf.mxu0 }
 0xce3   :  { %v4203_v43 = vpop.f32.mrf.mxu0 }
 0xce5   :  { %v2793_v18 = vpop.f32.mrf.mxu0 }
 0xce6   :  { %v2846_v36 = vpack.c.bf16 %v2793_v18, %v2790_v28 }
 0xce7   :  { %v4204_v24 = vpop.f32.mrf.mxu0 }
 0xce8   :  { %4219 = vmatprep.mubr.msk.bf16.mxu0 %vm621_vm1, %v2846_v36  ;;  %v4280_v24 = vld [vmem:[#allocation16 + $0x64] ss:$8 sps:$4 sm:$0xff]  }
 0xce9   :  { %4220 = vmatmul.mubr.msk.bf16.gmra.mxu0 %vm621_vm1, %v2847_v10 }
 0xd65   :  { %v4217_v34 = vpop.f32.mrf.mxu0 }
 0xd66   :  { %v2944_v23 = vadd.f32 %v4217_v34, %v5351_v55  ;;  %v4485_v55 = vld [vmem:[#allocation2 + $0x8] sm:$0xff]  ;;  %v4281_v34 = vld [vmem:[#allocation16 + $0x50] ss:$8 sps:$4 sm:$0xff]  }
 0xd67   :  { %v2911_v63 = vpop.f32.mrf.mxu0 }
 0xd68   :  { %v2942_v0 = vadd.f32 %v2911_v63, %v5355_v12  ;;  %v2956_v6 = vadd.f32 %v2953_v62, %v2944_v23  ;;  %v4486_v12 = vld [vmem:[#allocation2 + $0x18] sm:$0xff]  ;;  %v4286_v63 = vld [vmem:[#allocation16 + $0x44] ss:$8 sps:$4 sm:$0xff]   ;;  %v4284_v23 = vld [vmem:[#allocation16 + $0x40] ss:$8 sps:$4 sm:$0xff]  }
 0xd69   :  { %v4218_v22 = vpop.f32.mrf.mxu0 }
 0xd6a   :  { %v2954_v5 = vadd.f32 %v2953_v62, %v2942_v0  ;;  %v2945_v46 = vadd.f32 %v4218_v22, %v5359_v4  ;;  %v2964_v49 = vadd.f32 %v4484_v41, %v2956_v6  ;;  %v4287_v0 = vld [vmem:[#allocation16 + $0x30] ss:$8 sps:$4 sm:$0xff]   ;;  %v4292_v22 = vld [vmem:[#allocation16 + $0x24] ss:$8 sps:$4 sm:$0xff]   ;;  %v4295_v6 = vld [vmem:[#allocation16 + $0x14] ss:$8 sps:$4 sm:$0xff]  }
 0xd6b   :  { %v2914_v26 = vpop.f32.mrf.mxu0 }
 0xd6c   :  { %v2943_v30 = vadd.f32 %v2914_v26, %v5361_v56  ;;  %v2962_v29 = vadd.f32 %v4483_v39, %v2954_v5  ;;  %v2957_v44 = vadd.f32 %v2953_v62, %v2945_v46  ;;  %v4743_v5 = vmov 0   ;;  %v4290_v26 = vld [vmem:[#allocation16 + $0x20] ss:$8 sps:$4 sm:$0xff]   ;;  %v4293_v46 = vld [vmem:[#allocation16 + $0x10] ss:$8 sps:$4 sm:$0xff]  }
 0xd6d   :  { %3223 = vmatprep.mubr.bf16.mxu1 %v4743_v5  ;;  %v4296_v39 = vld [vmem:[#allocation16] ss:$8 sps:$4 sm:$0xff]  }
 0xd6e   :  { %v2955_v31 = vadd.f32 %v2953_v62, %v2943_v30  ;;  %2970 = vadd.xlane.f32.xlu0 %v2962_v29  ;;  %v2965_v50 = vadd.f32 %v4486_v12, %v2957_v44  ;;  %v4298_v30 = vld [vmem:[#allocation16 + $0x4] ss:$8 sps:$4 sm:$0xff]  }
 0xd70   :  { %v2963_v35 = vadd.f32 %v4485_v55, %v2955_v31 }
 0xd72   :  { %2974 = vadd.xlane.f32.xlu0 %v2964_v49  ;;  %2972 = vadd.xlane.f32.xlu1 %v2963_v35 }
 0xd76   :  { %2976 = vadd.xlane.f32.xlu0 %v2965_v50 }
 0xda9   :  { %v4221_v27 = vpop.f32.mrf.mxu0 }
 0xdaa   :  { %v2948_v4 = vadd.f32 %v4221_v27, %v5367_v20  ;;  %v4489_v20 = vld [vmem:[#allocation2 + $0x28] sm:$0xff] }
 0xdab   :  { %v2927_v45 = vpop.f32.mrf.mxu0 }
 0xdac   :  { %v2946_v56 = vadd.f32 %v2927_v45, %v5371_v59  ;;  %v2960_v52 = vadd.f32 %v2953_v62, %v2948_v4 }
 0xdad   :  { %v4222_v51 = vpop.f32.mrf.mxu0 }
 0xdae   :  { %v2958_v9 = vadd.f32 %v2953_v62, %v2946_v56  ;;  %v2949_v38 = vadd.f32 %v4222_v51, %v5375_v42  ;;  %v5441_v2 = vadd.f32 %v4488_v60, %v2960_v52  ;;  %v4490_v42 = vld [vmem:[#allocation2 + $0x38] sm:$0xff]  ;;  %v4306_v60 = vld [vmem:[#allocation17 + $0x20] sm:$0xff]  }
 0xdaf   :  { %v2930_v7 = vpop.f32.mrf.mxu0  ;;  %v4299_v52 = vld [vmem:[#allocation17 + $0x78] sm:$0xff]  }
 0xdb0   :  { %v2947_v58 = vadd.f32 %v2930_v7, %v5377_v57  ;;  %v5438_v47 = vadd.f32 %v4487_v11, %v2958_v9  ;;  %v2961_v53 = vadd.f32 %v2953_v62, %v2949_v38  ;;  %v4275_v57 = vld [vmem:[#allocation16 + $0x70] ss:$8 sps:$4 sm:$0xff]   ;;  %3871 = vmatprep.subr.bf16.mxu0 %v4299_v52 }
 0xdb1   :  { %3192 = vmatpush1.bf16.msra.mxu1 %v4275_v57  ;;  %v4300_v38 = vld [vmem:[#allocation17 + $0x38] sm:$0xff]   ;;  %v4302_v11 = vld [vmem:[#allocation17 + $0x30] sm:$0xff]  }
 0xdb2   :  { %v2959_v40 = vadd.f32 %v2953_v62, %v2947_v58  ;;  %2978 = vadd.xlane.f32.xlu0 %v5438_v47  ;;  %v5447_v48 = vadd.f32 %v4490_v42, %v2961_v53  ;;  %3193 = vmatprep.subr.bf16.mxu1 %v4280_v24  ;;  %v4289_v62 = vld [vmem:[#allocation16 + $0x34] ss:$8 sps:$4 sm:$0xff]   ;;  %v4305_v53 = vld [vmem:[#allocation17 + $0x60] sm:$0xff]  }
 0xdb3   :  { %v4301_v58 = vld [vmem:[#allocation17 + $0x70] sm:$0xff]   ;;  %3872 = vmatpush3.bf16.msra.mxu0 %v4300_v38 }
 0xdb4   :  { %v5443_v59 = vadd.f32 %v4489_v20, %v2959_v40  ;;  %3873 = vmatprep.subr.bf16.mxu0 %v4301_v58  ;;  %v4304_v40 = vld [vmem:[#allocation17 + $0x28] sm:$0xff]   ;;  %v4308_v20 = vld [vmem:[#allocation17 + $0x18] sm:$0xff]  }
 0xdb5   :  { %3194 = vmatpush1.bf16.msra.mxu1 %v4278_v16 }
 0xdb6   :  { %2982 = vadd.xlane.f32.xlu0 %v5441_v2  ;;  %2980 = vadd.xlane.f32.xlu1 %v5443_v59 }
 0xdb7   :  { %3195 = vmatprep.subr.bf16.mxu1 %v4283_v19  ;;  %3874 = vmatpush3.bf16.msra.mxu0 %v4302_v11 }
 0xdb9   :  { %3196 = vmatpush1.bf16.msra.mxu1 %v4281_v34 }
 0xdba   :  { %2984 = vadd.xlane.f32.xlu1 %v5447_v48  ;;  %3197 = vmatprep.subr.bf16.mxu1 %v4286_v63 }
 0xdbd   :  { %3198 = vmatpush1.bf16.msra.mxu1 %v4284_v23 }
 0xdbe   :  { %3199 = vmatprep.subr.bf16.mxu1 %v4289_v62 }
 0xdc1   :  { %3200 = vmatpush1.bf16.msra.mxu1 %v4287_v0 }
 0xdc2   :  { %3201 = vmatprep.subr.bf16.mxu1 %v4292_v22 }
 0xdc5   :  { %3202 = vmatpush1.bf16.msra.mxu1 %v4290_v26 }
 0xdc6   :  { %3203 = vmatprep.subr.bf16.mxu1 %v4295_v6 }
 0xdc9   :  { %3204 = vmatpush1.bf16.msra.mxu1 %v4293_v46 }
 0xdca   :  { %3205 = vmatprep.subr.bf16.mxu1 %v4298_v30 }
 0xdcd   :  { %3206 = vmatpush1.bf16.msra.mxu1 %v4296_v39 }
 0xdf7   :  { %v2971_v37 = vpop.xlane.xlu0 %2970 }
 0xdf8   :  { %v2987_v8 = vmul.f32 0.0078125, %v2971_v37 }
 0xdfa   :  { %v5450_v61 = vsub.f32 %v2962_v29, %v2987_v8 }
 0xdfb   :  { %v2975_v13 = vpop.xlane.xlu0 %2974  ;;  %v2973_v1 = vpop.xlane.xlu1 %2972 }
 0xdfc   :  { %v2989_v54 = vmul.f32 0.0078125, %v2975_v13  ;;  %v2988_v15 = vmul.f32 0.0078125, %v2973_v1  ;;  %v3003_v14 = vmul.f32 %v5450_v61, %v5450_v61 }
 0xdfe   :  { %v5454_v33 = vsub.f32 %v2964_v49, %v2989_v54  ;;  %v5456_v17 = vsub.f32 %v2963_v35, %v2988_v15  ;;  %3011 = vadd.xlane.f32.xlu0 %v3003_v14 }
 0xdff   :  { %v2977_v21 = vpop.xlane.xlu0 %2976 }
 0xe00   :  { %v2990_v28 = vmul.f32 0.0078125, %v2977_v21  ;;  %v3005_v43 = vmul.f32 %v5454_v33, %v5454_v33  ;;  %v3004_v18 = vmul.f32 %v5456_v17, %v5456_v17  ;;  %v3061_v21 = vsub.s32 1, %v5421_v25 }
 0xe02   :  { %v5462_v36 = vsub.f32 %v2965_v50, %v2990_v28  ;;  %3015 = vadd.xlane.f32.xlu0 %v3005_v43  ;;  %3013 = vadd.xlane.f32.xlu1 %v3004_v18  ;;  %v3062_v18 = vrot.slane %v5427_v32, %v3061_v21 }
 0xe04   :  { %v3006_v10 = vmul.f32 %v5462_v36, %v5462_v36 }
 0xe06   :  { %3017 = vadd.xlane.f32.xlu1 %v3006_v10  ;;  %v3073_v10 = vsub.s32 2, %v5421_v25 }
 0xe08   :  { %v3074_v34 = vrot.slane %v5427_v32, %v3073_v10 }
 0xe3b   :  { %v2979_v29 = vpop.xlane.xlu0 %2978 }
 0xe3c   :  { %v2991_v31 = vmul.f32 0.0078125, %v2979_v29 }
 0xe3e   :  { %v5468_v44 = vsub.f32 %v5438_v47, %v2991_v31  ;;  %v4303_v47 = vld [vmem:[#allocation17 + $0x68] sm:$0xff]  }
 0xe3f   :  { %v2983_v41 = vpop.xlane.xlu0 %2982  ;;  %v2981_v49 = vpop.xlane.xlu1 %2980  ;;  %3875 = vmatprep.subr.bf16.mxu0 %v4303_v47 }
 0xe40   :  { %v2993_v55 = vmul.f32 0.0078125, %v2983_v41  ;;  %v2992_v35 = vmul.f32 0.0078125, %v2981_v49  ;;  %v3007_v12 = vmul.f32 %v5468_v44, %v5468_v44  ;;  %3876 = vmatpush3.bf16.msra.mxu0 %v4304_v40 }
 0xe41   :  { %3877 = vmatprep.subr.bf16.mxu0 %v4305_v53 }
 0xe42   :  { %v5473_v50 = vsub.f32 %v5441_v2, %v2993_v55  ;;  %v5476_v27 = vsub.f32 %v5443_v59, %v2992_v35  ;;  %3019 = vadd.xlane.f32.xlu0 %v3007_v12  ;;  %v4307_v2 = vld [vmem:[#allocation17 + $0x58] sm:$0xff]  }
 0xe43   :  { %v2985_v45 = vpop.xlane.xlu1 %2984 }
 0xe44   :  { %v2994_v4 = vmul.f32 0.0078125, %v2985_v45  ;;  %v3009_v56 = vmul.f32 %v5473_v50, %v5473_v50  ;;  %v3008_v51 = vmul.f32 %v5476_v27, %v5476_v27  ;;  %3878 = vmatpush3.bf16.msra.mxu0 %v4306_v60 }
 0xe45   :  { %3879 = vmatprep.subr.bf16.mxu0 %v4307_v2 }
 0xe46   :  { %v5483_v9 = vsub.f32 %v5447_v48, %v2994_v4  ;;  %3023 = vadd.xlane.f32.xlu0 %v3009_v56  ;;  %3021 = vadd.xlane.f32.xlu1 %v3008_v51 }
 0xe48   :  { %v3010_v7 = vmul.f32 %v5483_v9, %v5483_v9  ;;  %3880 = vmatpush3.bf16.msra.mxu0 %v4308_v20 }
 0xe4a   :  { %3025 = vadd.xlane.f32.xlu1 %v3010_v7 }
 0xe87   :  { %v3012_v59 = vpop.xlane.xlu0 %3011 }
 0xe88   :  { %v3027_v42 = vmul.f32 0.0078125, %v3012_v59 }
 0xe8a   :  { %v3035_v48 = vadd.f32 1e-05, %v3027_v42  ;;  %v4309_v42 = vld [vmem:[#allocation17 + $0x50] sm:$0xff]  }
 0xe8b   :  { %v3016_v57 = vpop.xlane.xlu0 %3015  ;;  %v3014_v3 = vpop.xlane.xlu1 %3013  ;;  %3881 = vmatprep.subr.bf16.mxu0 %v4309_v42 }
 0xe8c   :  { %4443 = vrsqrt.f32 %v3035_v48  ;;  %v3029_v37 = vmul.f32 0.0078125, %v3016_v57  ;;  %v3028_v8 = vmul.f32 0.0078125, %v3014_v3  ;;  %v4310_v57 = vld [vmem:[#allocation17 + $0x10] sm:$0xff]   ;;  %v4311_v3 = vld [vmem:[#allocation17 + $0x48] sm:$0xff]  }
 0xe8d   :  { %3882 = vmatpush3.bf16.msra.mxu0 %v4310_v57 }
 0xe8e   :  { %v3036_v13 = vadd.f32 1e-05, %v3028_v8  ;;  %v3037_v1 = vadd.f32 1e-05, %v3029_v37  ;;  %v4312_v37 = vld [vmem:[#allocation17 + $0x8] sm:$0xff]   ;;  %3883 = vmatprep.subr.bf16.mxu0 %v4311_v3 }
 0xe8f   :  { %v3018_v54 = vpop.xlane.xlu1 %3017 }
 0xe90   :  { %v3030_v15 = vmul.f32 0.0078125, %v3018_v54  ;;  %4445 = vrsqrt.f32 %v3036_v13  ;;  %v3105_v54 = vsub.s32 3, %v5421_v25 }
 0xe91   :  { %4447 = vrsqrt.f32 %v3037_v1  ;;  %3884 = vmatpush3.bf16.msra.mxu0 %v4312_v37  ;;  %v4314_v1 = vld [vmem:[#allocation17] sm:$0xff]  }
 0xe92   :  { %v3038_v14 = vadd.f32 1e-05, %v3030_v15  ;;  %v3106_v21 = vrot.slane %v5427_v32, %v3105_v54 }
 0xe94   :  { %4449 = vrsqrt.f32 %v3038_v14 }
 0xe99   :  { %v4444_v28 = vpop.eup %4443 }
 0xe9a   :  { %v3051_v43 = vmul.f32 %v4444_v28, %v5450_v61 }
 0xe9c   :  { %v3063_v19 = vmul.f32 %v3062_v18, %v3051_v43 }
 0xe9d   :  { %v4446_v24 = vpop.eup %4445 }
 0xe9e   :  { %v3052_v16 = vmul.f32 %v4446_v24, %v5456_v17  ;;  %v4448_v63 = vpop.eup %4447  ;;  %v5494_v22 = vadd.f32 %v3074_v34, %v3063_v19 }
 0xe9f   :  { %v3053_v61 = vmul.f32 %v4448_v63, %v5454_v33 }
 0xea0   :  { %v3064_v62 = vmul.f32 %v3062_v18, %v3052_v16 }
 0xea1   :  { %v4450_v23 = vpop.eup %4449  ;;  %v3065_v17 = vmul.f32 %v3062_v18, %v3053_v61 }
 0xea2   :  { %v3054_v0 = vmul.f32 %v4450_v23, %v5462_v36  ;;  %v5496_v26 = vadd.f32 %v3074_v34, %v3064_v62 }
 0xea3   :  { %v5504_v39 = vadd.f32 %v3074_v34, %v3065_v17 }
 0xea4   :  { %v3083_v6 = vpack.c.bf16 %v5496_v26, %v5494_v22  ;;  %v3066_v46 = vmul.f32 %v3062_v18, %v3054_v0 }
 0xea6   :  { %3224 = vmatmul.mubr.bf16.vlgmr.msra.gmra.mxu1 %v3083_v6  ;;  %v5502_v30 = vadd.f32 %v3074_v34, %v3066_v46 }
 0xea7   :  { %3233 = vmatprep.mubr.bf16.mxu1 %v4743_v5 }
 0xea8   :  { %v3084_v36 = vpack.c.bf16 %v5502_v30, %v5504_v39 }
 0xeae   :  { %3234 = vmatmul.mubr.bf16.gmra.mxu1 %v3084_v36 }
 0xeaf   :  { %3243 = vmatprep.mubr.bf16.mxu1 %v4743_v5 }
 0xecb   :  { %v3020_v29 = vpop.xlane.xlu0 %3019 }
 0xecc   :  { %v3031_v33 = vmul.f32 0.0078125, %v3020_v29 }
 0xece   :  { %v3039_v31 = vadd.f32 1e-05, %v3031_v33 }
 0xecf   :  { %v3024_v41 = vpop.xlane.xlu0 %3023  ;;  %v3022_v49 = vpop.xlane.xlu1 %3021 }
 0xed0   :  { %4451 = vrsqrt.f32 %v3039_v31  ;;  %v3033_v55 = vmul.f32 0.0078125, %v3024_v41  ;;  %v3032_v35 = vmul.f32 0.0078125, %v3022_v49 }
 0xed2   :  { %v3040_v12 = vadd.f32 1e-05, %v3032_v35  ;;  %v3041_v45 = vadd.f32 1e-05, %v3033_v55 }
 0xed3   :  { %v3026_v4 = vpop.xlane.xlu1 %3025 }
 0xed4   :  { %v3034_v56 = vmul.f32 0.0078125, %v3026_v4  ;;  %4453 = vrsqrt.f32 %v3040_v12 }
 0xed5   :  { %4455 = vrsqrt.f32 %v3041_v45 }
 0xed6   :  { %v3042_v51 = vadd.f32 1e-05, %v3034_v56 }
 0xed8   :  { %4457 = vrsqrt.f32 %v3042_v51 }
 0xedd   :  { %v4452_v7 = vpop.eup %4451 }
 0xede   :  { %v3055_v52 = vmul.f32 %v4452_v7, %v5468_v44 }
 0xee0   :  { %v3067_v11 = vmul.f32 %v3062_v18, %v3055_v52 }
 0xee1   :  { %v4454_v38 = vpop.eup %4453 }
 0xee2   :  { %v3056_v58 = vmul.f32 %v4454_v38, %v5476_v27  ;;  %v4456_v47 = vpop.eup %4455  ;;  %v5512_v2 = vadd.f32 %v3074_v34, %v3067_v11 }
 0xee3   :  { %v3057_v59 = vmul.f32 %v4456_v47, %v5473_v50  ;;  %v4313_v50 = vld [vmem:[#allocation17 + $0x40] sm:$0xff]  }
 0xee4   :  { %v3068_v53 = vmul.f32 %v3062_v18, %v3056_v58  ;;  %3885 = vmatprep.subr.bf16.mxu0 %v4313_v50 }
 0xee5   :  { %v4458_v40 = vpop.eup %4457  ;;  %v3069_v27 = vmul.f32 %v3062_v18, %v3057_v59  ;;  %3886 = vmatpush3.bf16.msra.mxu0 %v4314_v1 }
 0xee6   :  { %v3058_v60 = vmul.f32 %v4458_v40, %v5483_v9  ;;  %v5514_v20 = vadd.f32 %v3074_v34, %v3068_v53 }
 0xee7   :  { %v5522_v8 = vadd.f32 %v3074_v34, %v3069_v27 }
 0xee8   :  { %v3085_v48 = vpack.c.bf16 %v5514_v20, %v5512_v2  ;;  %v3070_v44 = vmul.f32 %v3062_v18, %v3058_v60 }
 0xeea   :  { %3244 = vmatmul.mubr.bf16.gmra.mxu1 %v3085_v48  ;;  %v5520_v9 = vadd.f32 %v3074_v34, %v3070_v44 }
 0xeeb   :  { %3253 = vmatprep.mubr.bf16.mxu1 %v4743_v5  ;;  %v217_v5 = vld [vmem:[%s5581_s10 + $0x8] sm:$0xff]  ;;  %s4744_s10 = smov [#allocation19]  }
 0xeec   :  { %v3086_v13 = vpack.c.bf16 %v5520_v9, %v5522_v8  ;;  %v3110_v14 = vrot.slane %v217_v5, %v3105_v54  ;;  %s3618_s29 = sshll.u32 %s4744_s10, 4  ;;  %s3619_s29 = int_to_ptr.vmem [resolvable:$true] %s3618_s29 }
 0xeed   :  { %s4691_s30 = scalar_lea.vmem %s3619_s29, 1024  ;;  %p4696_p9 = scmp.lt.s32.totalorder %s3619_s29, %s3619_s29 }
 0xeee   :  { %p4692_p8 = scmp.ne.s32.totalorder %s3619_s29, %s4691_s30  ;;  %p4697_p10 = scmp.lt.s32.totalorder %s4691_s30, %s4691_s30 }
 0xef0   :  { %p4698_p11 = por %p4697_p10, %p4696_p9 }
 0xef2   :  { %3254 = vmatmul.mubr.bf16.gmra.mxu1 %v3086_v13  ;;  %p4699_p12 = pnand %p4698_p11, %p4692_p8 }
 0xf66   :  { %v3225_v15 = vpop.f32.mrf.mxu1 }
 0xf67   :  { %v3226_v24 = vadd.f32 %v3225_v15, %v3106_v21 }
 0xf68   :  { %v3227_v28 = vpop.f32.mrf.mxu1 }
 0xf69   :  { %v3228_v18 = vadd.f32 %v3227_v28, %v3110_v14  ;;  %v3264_v0 = vmax.f32 %v3226_v24, 0.0 }
 0xf6a   :  { %v3229_v43 = vpop.f32.mrf.mxu1 }
 0xf6b   :  { %v3230_v10 = vadd.f32 %v3229_v43, %v3106_v21  ;;  %v3265_v23 = vmax.f32 %v3228_v18, 0.0 }
 0xf6c   :  { %v3231_v16 = vpop.f32.mrf.mxu1 }
 0xf6d   :  { %v3232_v19 = vadd.f32 %v3231_v16, %v3110_v14  ;;  %v3266_v34 = vmax.f32 %v3230_v10, 0.0  ;;  %v3322_v10 = vsub.s32 4, %v5421_v25 }
 0xf6e   :  { %v3235_v63 = vpop.f32.mrf.mxu1 }
 0xf6f   :  { %v3267_v62 = vmax.f32 %v3232_v19, 0.0  ;;  %v3280_v46 = vpack.c.bf16 %v3266_v34, %v3264_v0  ;;  %v3236_v33 = vadd.f32 %v3235_v63, %v3106_v21  ;;  %v3323_v16 = vrot.slane %v5427_v32, %v3322_v10 }
 0xf70   :  { %v3237_v61 = vpop.f32.mrf.mxu1 }
 0xf71   :  { %v3281_v6 = vpack.c.bf16 %v3267_v62, %v3265_v23  ;;  %v3238_v36 = vadd.f32 %v3237_v61, %v3110_v14  ;;  %v3268_v12 = vmax.f32 %v3236_v33, 0.0 }
 0xf72   :  { %v3239_v17 = vpop.f32.mrf.mxu1 }
 0xf73   :  { %v3240_v29 = vadd.f32 %v3239_v17, %v3106_v21  ;;  %3452 = vmatprep.mubr.bf16.mxu0 %v3281_v6  ;;  %v3269_v55 = vmax.f32 %v3238_v36, 0.0 }
 0xf74   :  { %v3241_v31 = vpop.f32.mrf.mxu1  ;;  %3453 = vmatmul.mubr.bf16.vlgmr.msra.gmra.mxu0 %v3280_v46 }
 0xf75   :  { %v3242_v41 = vadd.f32 %v3241_v31, %v3110_v14  ;;  %v3270_v49 = vmax.f32 %v3240_v29, 0.0 }
 0xf77   :  { %v3271_v35 = vmax.f32 %v3242_v41, 0.0  ;;  %v3282_v4 = vpack.c.bf16 %v3270_v49, %v3268_v12 }
 0xf79   :  { %v3283_v45 = vpack.c.bf16 %v3271_v35, %v3269_v55 }
 0xf7b   :  { %3460 = vmatprep.mubr.bf16.mxu0 %v3283_v45 }
 0xf7c   :  { %3461 = vmatmul.mubr.bf16.gmra.mxu0 %v3282_v4 }
 0xfaa   :  { %v3245_v56 = vpop.f32.mrf.mxu1 }
 0xfab   :  { %v3246_v58 = vadd.f32 %v3245_v56, %v3106_v21 }
 0xfac   :  { %v3247_v51 = vpop.f32.mrf.mxu1 }
 0xfad   :  { %v3248_v52 = vadd.f32 %v3247_v51, %v3110_v14  ;;  %v3272_v42 = vmax.f32 %v3246_v58, 0.0 }
 0xfae   :  { %v3249_v7 = vpop.f32.mrf.mxu1 }
 0xfaf   :  { %v3250_v38 = vadd.f32 %v3249_v7, %v3106_v21  ;;  %v3273_v60 = vmax.f32 %v3248_v52, 0.0 }
 0xfb0   :  { %v3251_v11 = vpop.f32.mrf.mxu1 }
 0xfb1   :  { %v3252_v47 = vadd.f32 %v3251_v11, %v3110_v14  ;;  %v3274_v40 = vmax.f32 %v3250_v38, 0.0 }
 0xfb2   :  { %v3255_v53 = vpop.f32.mrf.mxu1 }
 0xfb3   :  { %v3275_v59 = vmax.f32 %v3252_v47, 0.0  ;;  %v3284_v57 = vpack.c.bf16 %v3274_v40, %v3272_v42  ;;  %v3256_v50 = vadd.f32 %v3255_v53, %v3106_v21 }
 0xfb4   :  { %v3257_v48 = vpop.f32.mrf.mxu1 }
 0xfb5   :  { %v3285_v44 = vpack.c.bf16 %v3275_v59, %v3273_v60  ;;  %v3258_v3 = vadd.f32 %v3257_v48, %v3110_v14  ;;  %v3276_v28 = vmax.f32 %v3256_v50, 0.0 }
 0xfb6   :  { %v3259_v27 = vpop.f32.mrf.mxu1 }
 0xfb7   :  { %v3260_v37 = vadd.f32 %v3259_v27, %v3106_v21  ;;  %3468 = vmatprep.mubr.bf16.mxu0 %v3285_v44  ;;  %v3277_v5 = vmax.f32 %v3258_v3, 0.0 }
 0xfb8   :  { %v3261_v13 = vpop.f32.mrf.mxu1  ;;  %3469 = vmatmul.mubr.bf16.gmra.mxu0 %v3284_v57 }
 0xfb9   :  { %v3262_v1 = vadd.f32 %v3261_v13, %v3110_v14  ;;  %v3278_v54 = vmax.f32 %v3260_v37, 0.0 }
 0xfbb   :  { %v3279_v15 = vmax.f32 %v3262_v1, 0.0  ;;  %v3286_v18 = vpack.c.bf16 %v3278_v54, %v3276_v28 }
 0xfbd   :  { %v3287_v43 = vpack.c.bf16 %v3279_v15, %v3277_v5 }
 0xfbf   :  { %3476 = vmatprep.mubr.bf16.mxu0 %v3287_v43 }
 0xfc0   :  { %3477 = vmatmul.mubr.bf16.gmra.mxu0 %v3286_v18 }
0x1034   :  { %v3887_v24 = vpop.f32.mrf.mxu0 }
0x1036   :  { %v3888_v19 = vpop.f32.mrf.mxu0 }
0x1037   :  { %v3889_v34 = vadd.f32 %v3888_v19, %v3887_v24 }
0x1038   :  { %v3890_v63 = vpop.f32.mrf.mxu0 }
0x1039   :  { %v3455_v21 = vadd.f32 %v3889_v34, %v3323_v16 }
0x103a   :  { %v3891_v23 = vpop.f32.mrf.mxu0 }
0x103b   :  { %v3892_v62 = vadd.f32 %v3891_v23, %v3890_v63  ;;  %v3485_v14 = vadd.f32 %v3455_v21, %v5494_v22 }
0x103c   :  { %v3893_v0 = vpop.f32.mrf.mxu0 }
0x103d   :  { %v3458_v61 = vadd.f32 %v3892_v62, %v3323_v16  ;;  %3493 = vadd.xlane.f32.xlu0 %v3485_v14 }
0x103e   :  { %v3894_v6 = vpop.f32.mrf.mxu0 }
0x103f   :  { %v3895_v46 = vadd.f32 %v3894_v6, %v3893_v0  ;;  %v3486_v17 = vadd.f32 %v3458_v61, %v5496_v26 }
0x1040   :  { %v3896_v36 = vpop.f32.mrf.mxu0 }
0x1041   :  { %v3463_v29 = vadd.f32 %v3895_v46, %v3323_v16  ;;  %3495 = vadd.xlane.f32.xlu1 %v3486_v17 }
0x1042   :  { %v3897_v33 = vpop.f32.mrf.mxu0 }
0x1043   :  { %v3898_v31 = vadd.f32 %v3897_v33, %v3896_v36  ;;  %v3487_v41 = vadd.f32 %v3463_v29, %v5504_v39 }
0x1045   :  { %v3466_v49 = vadd.f32 %v3898_v31, %v3323_v16  ;;  %3497 = vadd.xlane.f32.xlu0 %v3487_v41 }
0x1047   :  { %v3488_v55 = vadd.f32 %v3466_v49, %v5502_v30 }
0x1049   :  { %3499 = vadd.xlane.f32.xlu1 %v3488_v55 }
0x1078   :  { %v3899_v22 = vpop.f32.mrf.mxu0 }
0x107a   :  { %v3900_v35 = vpop.f32.mrf.mxu0 }
0x107b   :  { %v3901_v12 = vadd.f32 %v3900_v35, %v3899_v22  ;;  %v3583_v22 = vsub.s32 5, %v5421_v25 }
0x107c   :  { %v3902_v45 = vpop.f32.mrf.mxu0 }
0x107d   :  { %v3471_v4 = vadd.f32 %v3901_v12, %v3323_v16  ;;  %v3595_v12 = vsub.s32 6, %v5421_v25 }
0x107e   :  { %v3903_v56 = vpop.f32.mrf.mxu0 }
0x107f   :  { %v3904_v51 = vadd.f32 %v3903_v56, %v3902_v45  ;;  %v3489_v26 = vadd.f32 %v3471_v4, %v5512_v2  ;;  %v3584_v4 = vrot.slane %v5427_v32, %v3583_v22 }
0x1080   :  { %v3905_v7 = vpop.f32.mrf.mxu0 }
0x1081   :  { %v3474_v52 = vadd.f32 %v3904_v51, %v3323_v16  ;;  %3501 = vadd.xlane.f32.xlu0 %v3489_v26  ;;  %v3596_v51 = vrot.slane %v5427_v32, %v3595_v12 }
0x1082   :  { %v3906_v38 = vpop.f32.mrf.mxu0 }
0x1083   :  { %v3907_v58 = vadd.f32 %v3906_v38, %v3905_v7  ;;  %v3490_v39 = vadd.f32 %v3474_v52, %v5514_v20 }
0x1084   :  { %v3908_v11 = vpop.f32.mrf.mxu0 }
0x1085   :  { %v3479_v47 = vadd.f32 %v3907_v58, %v3323_v16  ;;  %3503 = vadd.xlane.f32.xlu1 %v3490_v39 }
0x1086   :  { %v3909_v30 = vpop.f32.mrf.mxu0 }
0x1087   :  { %v3910_v40 = vadd.f32 %v3909_v30, %v3908_v11  ;;  %v3491_v53 = vadd.f32 %v3479_v47, %v5522_v8 }
0x1089   :  { %v3482_v60 = vadd.f32 %v3910_v40, %v3323_v16  ;;  %3505 = vadd.xlane.f32.xlu0 %v3491_v53 }
0x108b   :  { %v3492_v59 = vadd.f32 %v3482_v60, %v5520_v9 }
0x108d   :  { %3507 = vadd.xlane.f32.xlu1 %v3492_v59 }
0x10c6   :  { %v3494_v2 = vpop.xlane.xlu0 %3493 }
0x10c7   :  { %v3509_v42 = vmul.f32 0.0078125, %v3494_v2 }
0x10c9   :  { %v3517_v48 = vsub.f32 %v3485_v14, %v3509_v42 }
0x10ca   :  { %v3496_v44 = vpop.xlane.xlu1 %3495 }
0x10cb   :  { %v3510_v57 = vmul.f32 0.0078125, %v3496_v44  ;;  %v3525_v27 = vmul.f32 %v3517_v48, %v3517_v48 }
0x10cd   :  { %v3518_v3 = vsub.f32 %v3486_v17, %v3510_v57  ;;  %3533 = vadd.xlane.f32.xlu0 %v3525_v27 }
0x10ce   :  { %v3498_v20 = vpop.xlane.xlu0 %3497 }
0x10cf   :  { %v3511_v37 = vmul.f32 0.0078125, %v3498_v20  ;;  %v3526_v50 = vmul.f32 %v3518_v3, %v3518_v3 }
0x10d1   :  { %v3519_v13 = vsub.f32 %v3487_v41, %v3511_v37  ;;  %3535 = vadd.xlane.f32.xlu1 %v3526_v50 }
0x10d2   :  { %v3500_v1 = vpop.xlane.xlu1 %3499 }
0x10d3   :  { %v3512_v8 = vmul.f32 0.0078125, %v3500_v1  ;;  %v3527_v54 = vmul.f32 %v3519_v13, %v3519_v13 }
0x10d5   :  { %v3520_v5 = vsub.f32 %v3488_v55, %v3512_v8  ;;  %3537 = vadd.xlane.f32.xlu0 %v3527_v54 }
0x10d7   :  { %v3528_v9 = vmul.f32 %v3520_v5, %v3520_v5 }
0x10d9   :  { %3539 = vadd.xlane.f32.xlu1 %v3528_v9 }
0x110a   :  { %v3502_v15 = vpop.xlane.xlu0 %3501 }
0x110b   :  { %v3513_v28 = vmul.f32 0.0078125, %v3502_v15 }
0x110d   :  { %v5541_v43 = vsub.f32 %v3489_v26, %v3513_v28 }
0x110e   :  { %v3504_v18 = vpop.xlane.xlu1 %3503 }
0x110f   :  { %v3514_v10 = vmul.f32 0.0078125, %v3504_v18  ;;  %v3529_v24 = vmul.f32 %v5541_v43, %v5541_v43 }
0x1111   :  { %v5545_v16 = vsub.f32 %v3490_v39, %v3514_v10  ;;  %3541 = vadd.xlane.f32.xlu0 %v3529_v24 }
0x1112   :  { %v3506_v19 = vpop.xlane.xlu0 %3505 }
0x1113   :  { %v3515_v34 = vmul.f32 0.0078125, %v3506_v19  ;;  %v3530_v63 = vmul.f32 %v5545_v16, %v5545_v16 }
0x1115   :  { %v5549_v21 = vsub.f32 %v3491_v53, %v3515_v34  ;;  %3543 = vadd.xlane.f32.xlu1 %v3530_v63 }
0x1116   :  { %v3508_v23 = vpop.xlane.xlu1 %3507 }
0x1117   :  { %v3516_v62 = vmul.f32 0.0078125, %v3508_v23  ;;  %v3531_v14 = vmul.f32 %v5549_v21, %v5549_v21 }
0x1119   :  { %v5553_v0 = vsub.f32 %v3492_v59, %v3516_v62  ;;  %3545 = vadd.xlane.f32.xlu0 %v3531_v14 }
0x111b   :  { %v3532_v61 = vmul.f32 %v5553_v0, %v5553_v0 }
0x111d   :  { %3547 = vadd.xlane.f32.xlu1 %v3532_v61 }
0x1156   :  { %v3534_v6 = vpop.xlane.xlu0 %3533 }
0x1157   :  { %v3549_v46 = vmul.f32 0.0078125, %v3534_v6 }
0x1159   :  { %v3557_v17 = vadd.f32 1e-05, %v3549_v46 }
0x115a   :  { %v3536_v36 = vpop.xlane.xlu1 %3535 }
0x115b   :  { %4459 = vrsqrt.f32 %v3557_v17  ;;  %v3550_v29 = vmul.f32 0.0078125, %v3536_v36 }
0x115d   :  { %v3558_v33 = vadd.f32 1e-05, %v3550_v29 }
0x115e   :  { %v3538_v31 = vpop.xlane.xlu0 %3537 }
0x115f   :  { %4461 = vrsqrt.f32 %v3558_v33  ;;  %v3551_v41 = vmul.f32 0.0078125, %v3538_v31 }
0x1161   :  { %v3559_v49 = vadd.f32 1e-05, %v3551_v41 }
0x1162   :  { %v3540_v55 = vpop.xlane.xlu1 %3539 }
0x1163   :  { %4463 = vrsqrt.f32 %v3559_v49  ;;  %v3552_v35 = vmul.f32 0.0078125, %v3540_v55 }
0x1165   :  { %v3560_v45 = vadd.f32 1e-05, %v3552_v35 }
0x1167   :  { %4465 = vrsqrt.f32 %v3560_v45 }
0x1168   :  { %v4460_v56 = vpop.eup %4459 }
0x1169   :  { %v3573_v26 = vmul.f32 %v4460_v56, %v3517_v48 }
0x116b   :  { %v3585_v7 = vmul.f32 %v3584_v4, %v3573_v26 }
0x116c   :  { %v4462_v52 = vpop.eup %4461 }
0x116d   :  { %v3597_v38 = vadd.f32 %v3596_v51, %v3585_v7  ;;  %v3574_v58 = vmul.f32 %v4462_v52, %v3518_v3 }
0x116f   :  { %3605 = vst [vmem:[#allocation19] sm:$0xff] %v3597_v38  ;;  %v3586_v39 = vmul.f32 %v3584_v4, %v3574_v58 }
0x1170   :  { %v4464_v11 = vpop.eup %4463 }
0x1171   :  { %v3598_v47 = vadd.f32 %v3596_v51, %v3586_v39  ;;  %v3575_v30 = vmul.f32 %v4464_v11, %v3519_v13 }
0x1173   :  { %3606 = vst [vmem:[#allocation19 + $0x8] sm:$0xff] %v3598_v47  ;;  %v3587_v40 = vmul.f32 %v3584_v4, %v3575_v30 }
0x1174   :  { %v4466_v25 = vpop.eup %4465 }
0x1175   :  { %v3599_v53 = vadd.f32 %v3596_v51, %v3587_v40  ;;  %v3576_v60 = vmul.f32 %v4466_v25, %v3520_v5 }
0x1177   :  { %3607 = vst [vmem:[#allocation19 + $0x10] sm:$0xff] %v3599_v53  ;;  %v3588_v59 = vmul.f32 %v3584_v4, %v3576_v60 }
0x1179   :  { %v3600_v2 = vadd.f32 %v3596_v51, %v3588_v59 }
0x117b   :  { %3608 = vst [vmem:[#allocation19 + $0x18] sm:$0xff] %v3600_v2 }
0x119a   :  { %v3542_v32 = vpop.xlane.xlu0 %3541 }
0x119b   :  { %v3553_v42 = vmul.f32 0.0078125, %v3542_v32 }
0x119d   :  { %v3561_v48 = vadd.f32 1e-05, %v3553_v42 }
0x119e   :  { %v3544_v44 = vpop.xlane.xlu1 %3543 }
0x119f   :  { %4467 = vrsqrt.f32 %v3561_v48  ;;  %v3554_v57 = vmul.f32 0.0078125, %v3544_v44 }
0x11a1   :  { %v3562_v27 = vadd.f32 1e-05, %v3554_v57 }
0x11a2   :  { %v3546_v3 = vpop.xlane.xlu0 %3545 }
0x11a3   :  { %4469 = vrsqrt.f32 %v3562_v27  ;;  %v3555_v20 = vmul.f32 0.0078125, %v3546_v3 }
0x11a5   :  { %v3563_v37 = vadd.f32 1e-05, %v3555_v20 }
0x11a6   :  { %v3548_v50 = vpop.xlane.xlu1 %3547 }
0x11a7   :  { %4471 = vrsqrt.f32 %v3563_v37  ;;  %v3556_v13 = vmul.f32 0.0078125, %v3548_v50 }
0x11a9   :  { %v3564_v1 = vadd.f32 1e-05, %v3556_v13 }
0x11ab   :  { %4473 = vrsqrt.f32 %v3564_v1 }
0x11ac   :  { %v4468_v8 = vpop.eup %4467 }
0x11ad   :  { %v3577_v54 = vmul.f32 %v4468_v8, %v5541_v43 }
0x11af   :  { %v3589_v5 = vmul.f32 %v3584_v4, %v3577_v54 }
0x11b0   :  { %v4470_v9 = vpop.eup %4469 }
0x11b1   :  { %v3601_v15 = vadd.f32 %v3596_v51, %v3589_v5  ;;  %v3578_v28 = vmul.f32 %v4470_v9, %v5545_v16 }
0x11b3   :  { %3609 = vst [vmem:[#allocation19 + $0x20] sm:$0xff] %v3601_v15  ;;  %v3590_v18 = vmul.f32 %v3584_v4, %v3578_v28 }
0x11b4   :  { %v4472_v10 = vpop.eup %4471 }
0x11b5   :  { %v3602_v24 = vadd.f32 %v3596_v51, %v3590_v18  ;;  %v3579_v19 = vmul.f32 %v4472_v10, %v5549_v21 }
0x11b7   :  { %3610 = vst [vmem:[#allocation19 + $0x28] sm:$0xff] %v3602_v24  ;;  %v3591_v34 = vmul.f32 %v3584_v4, %v3579_v19 }
0x11b8   :  { %v4474_v63 = vpop.eup %4473 }
0x11b9   :  { %v3603_v23 = vadd.f32 %v3596_v51, %v3591_v34  ;;  %v3580_v62 = vmul.f32 %v4474_v63, %v5553_v0 }
0x11bb   :  { %3611 = vst [vmem:[#allocation19 + $0x30] sm:$0xff] %v3603_v23  ;;  %v3592_v43 = vmul.f32 %v3584_v4, %v3580_v62 }
0x11bd   :  { %v3604_v14 = vadd.f32 %v3596_v51, %v3592_v43 }
0x11bf   :  { %3612 = vst [vmem:[#allocation19 + $0x38] sm:$0xff] %v3604_v14 }
0x11c0   :  { %4702 = shalt.err (!%p4699_p12)
}
0x11c1   :  { %3624 = dma.vmem_to_hbm [thread:$0]  %s3619_s29, 1024, %s5582_s11, [#allocation4], %s4727_s22, %s4727_s22, %s4728_s23  }
0x11c2   :  { %4723 = dma.done.wait [#allocation4], 1024  }
0x11c3   :  { %4724 = vsyncadd [#allocation4], 4294966272 }
0x11c4   :  { %3628 = vsyncpa [#allocation3], 1 }
0x11c5   :  { %3629 = vsyncpa [#allocation6], 1 }
0x11c6   :  { %3630 = vsyncpa [#allocation9], 1 }
0x11c7   :  { %3631 = vsyncpa [#allocation12], 1 }
0x11c8   :  { %3632 = vsyncpa [#allocation15], 1 }
0x11c9   :  { %3633 = vsyncpa [#allocation18], 1 }
0x11ca   :  { %3634 = vsyncpa [#allocation4], 1 }

</bundles_post_ra>
